<compile_context>
chip_gen: v7x
topology: tpu7x:2x2x1
jax: 0.10.0
libtpu: 0.0.40
codegen_flags: <defaults>
</compile_context>

<pallas_src>
import jax
import jax.numpy as jnp
from jax.experimental import pallas as pl
from jax.experimental.pallas import tpu as pltpu

# FLAME parameter dims used by the reference module (self.human_models.flame.*)
SHAPE_PARAM_DIM = 100
EXPR_CODE_DIM = 50
POSE_DIM = 12
CAM_DIM = 3
FEAT_DIM = 2048

D_TOTAL = POSE_DIM + SHAPE_PARAM_DIM + EXPR_CODE_DIM + CAM_DIM  # 165
D_PAD = ((D_TOTAL + 127) // 128) * 128                          # 256


def _default_k_tile():
    """Per-generation K chunk.

    Grid-step overhead (~0.35 us/step) dominates this ~2 MiB DMA-bound head, so:
      * v7x (~3.2 TB/s HBM): single step, grid=(1,)
      * v6e / v5e:           two steps of 1024 (keeps weight-DMA/compute overlap
                             while halving fixed overhead vs. 4 steps of 512)
    """
    try:
        kind = jax.devices()[0].device_kind.lower()
    except Exception:
        return 1024
    if "v7" in kind:
        return FEAT_DIM  # grid=(1,)
    return 1024          # grid=(2,)


def _face_regressor_kernel(x_ref, w_ref, b_ref, o_ref):
    # x_ref: (N, K_TILE, HW) float32  -- channel chunk of the NCHW view
    # w_ref: (K_TILE, D_PAD) bfloat16 -- chunk of [pose|shape|expr|cam], 1/HW pre-folded
    # b_ref: (1, D_PAD)      float32
    # o_ref: (N, D_PAD)      float32  -- VMEM-resident across the K ("arbitrary")
    #                                    axis; used directly as the accumulator.
    k = pl.program_id(0)

    @pl.when(k == 0)
    def _():
        # Initialize the resident output block with the (broadcast) bias; this
        # replaces the previous zeros-init + epilogue "acc + b" store.
        o_ref[...] = jnp.zeros(o_ref.shape, o_ref.dtype) + b_ref[...]

    # Spatial sum over HW; the 1/HW of img_feat.mean((2,3)) is folded into w.
    feat = jnp.sum(x_ref[...], axis=-1)  # (N, K_TILE) f32
    o_ref[...] += jnp.dot(
        feat.astype(jnp.bfloat16), w_ref[...],
        preferred_element_type=jnp.float32,
    )


def face_regressor_forward(img_feat_nchw, w_scaled_bf16, b_pad_f32, k_tile=None):
    """img_feat_nchw: (N, 2048, H, W) float32.

    w_scaled_bf16: (2048, D_PAD) bfloat16, heads concatenated, zero-padded,
                   with 1/(H*W) folded in (see prepare_head_params).
    b_pad_f32:     (D_PAD,) float32, zero-padded concatenated biases.
    Returns (root_pose, jaw_pose, shape_param, expr_param, cam_param) like PyTorch.
    """
    N, C, H, W = img_feat_nchw.shape
    assert C == FEAT_DIM, f"FaceRegressor expects {FEAT_DIM} channels, got {C}"
    HW = H * W

    # Fail loudly on unpadded / mis-shaped params (review correctness concern).
    assert w_scaled_bf16.shape == (FEAT_DIM, D_PAD), w_scaled_bf16.shape
    assert w_scaled_bf16.dtype == jnp.bfloat16, w_scaled_bf16.dtype
    assert b_pad_f32.shape == (D_PAD,), b_pad_f32.shape

    if k_tile is None:
        k_tile = _default_k_tile()
    assert C % k_tile == 0
    n_k = C // k_tile

    # Free view of NCHW (no HBM transpose / relayout in the wrapper).
    x = img_feat_nchw.reshape(N, C, HW)
    b2d = b_pad_f32.reshape(1, D_PAD)

    cost = pl.CostEstimate(
        flops=2 * N * C * D_PAD,
        transcendentals=0,
        bytes_accessed=(x.size * 4 + w_scaled_bf16.size * 2
                        + b2d.size * 4 + N * D_PAD * 4),
    )

    out_padded = pl.pallas_call(
        _face_regressor_kernel,
        out_shape=jax.ShapeDtypeStruct((N, D_PAD), jnp.float32),
        grid_spec=pltpu.PrefetchScalarGridSpec(
            num_scalar_prefetch=0,
            grid=(n_k,),
            in_specs=[
                # (N, K_TILE, HW): last dim = full extent (HW), 2nd-last div by 8.
                pl.BlockSpec((N, k_tile, HW), lambda k: (0, k, 0)),
                pl.BlockSpec((k_tile, D_PAD), lambda k: (k, 0)),
                pl.BlockSpec((1, D_PAD), lambda k: (0, 0)),
            ],
            # Same output block across K -> VMEM-resident accumulator.
            out_specs=pl.BlockSpec((N, D_PAD), lambda k: (0, 0)),
        ),
        compiler_params=pltpu.CompilerParams(
            dimension_semantics=("arbitrary",),  # K is a reduction axis
        ),
        cost_estimate=cost,
    )(x, w_scaled_bf16, b2d)

    # glue: slice the concatenated heads
    o0 = 0
    pose_param = out_padded[:, o0:o0 + POSE_DIM]; o0 += POSE_DIM
    shape_param = out_padded[:, o0:o0 + SHAPE_PARAM_DIM]; o0 += SHAPE_PARAM_DIM
    expr_param = out_padded[:, o0:o0 + EXPR_CODE_DIM]; o0 += EXPR_CODE_DIM
    cam_param = out_padded[:, o0:o0 + CAM_DIM]

    root_pose = pose_param[:, :6]
    jaw_pose = pose_param[:, 6:]
    return root_pose, jaw_pose, shape_param, expr_param, cam_param


def init_params(key):
    """Deterministic synthetic f32 params with the PyTorch heads' shapes.

    Returns concatenated (w_all, b_all): (2048, 165) and (165,) float32.
    """
    dims = [POSE_DIM, SHAPE_PARAM_DIM, EXPR_CODE_DIM, CAM_DIM]
    keys = jax.random.split(key, 2 * len(dims))
    ws, bs = [], []
    bound = 1.0 / (FEAT_DIM ** 0.5)  # mimic nn.Linear default init range
    for i, d in enumerate(dims):
        w = jax.random.uniform(keys[2 * i], (FEAT_DIM, d),
                               minval=-bound, maxval=bound, dtype=jnp.float32)
        b = jax.random.uniform(keys[2 * i + 1], (d,),
                               minval=-bound, maxval=bound, dtype=jnp.float32)
        ws.append(w)
        bs.append(b)
    w_all = jnp.concatenate(ws, axis=1)  # (2048, 165)
    b_all = jnp.concatenate(bs, axis=0)  # (165,)
    return w_all, b_all


def prepare_head_params(w_all_f32, b_all_f32, hw):
    """Offline param prep (done once, outside the kernel's critical path):

      * zero-pad output dim to D_PAD=256 (lane-dense MXU output)
      * fold 1/HW of the spatial mean into the weights (kernel uses a sum)
      * cast weights to bfloat16 (halves the dominant HBM read); bias stays f32
    """
    assert w_all_f32.shape == (FEAT_DIM, D_TOTAL), w_all_f32.shape
    assert b_all_f32.shape == (D_TOTAL,), b_all_f32.shape
    w_pad = jnp.pad(w_all_f32, ((0, 0), (0, D_PAD - D_TOTAL)))   # (2048, 256)
    b_pad = jnp.pad(b_all_f32, ((0, D_PAD - D_TOTAL),))          # (256,)
    w_scaled_bf16 = (w_pad * (1.0 / float(hw))).astype(jnp.bfloat16)
    return w_scaled_bf16, b_pad


if __name__ == "__main__":
    key = jax.random.PRNGKey(0)
    k_x, k_p = jax.random.split(key)

    # Small shapes consistent with the module: batch=2, C=2048 (fixed by the
    # module), spatial 8x8.
    N, H, W = 2, 8, 8
    img_feat = jax.random.normal(k_x, (N, FEAT_DIM, H, W), dtype=jnp.float32)

    w_all_f32, b_all_f32 = init_params(k_p)
    w_scaled_bf16, b_pad_f32 = prepare_head_params(w_all_f32, b_all_f32, H * W)

    outs = face_regressor_forward(img_feat, w_scaled_bf16, b_pad_f32)
    outs = jax.block_until_ready(outs)

    root_pose, jaw_pose, shape_param, expr_param, cam_param = outs
    assert root_pose.shape == (N, 6)
    assert jaw_pose.shape == (N, 6)
    assert shape_param.shape == (N, SHAPE_PARAM_DIM)
    assert expr_param.shape == (N, EXPR_CODE_DIM)
    assert cam_param.shape == (N, CAM_DIM)

    # Validate against the full-f32 reference of the PyTorch semantics (bounds
    # the bf16 weight/feature quantization error, review correctness concern).
    feat_ref = img_feat.mean(axis=(2, 3))                 # (N, 2048) f32
    full_ref = feat_ref @ w_all_f32 + b_all_f32           # (N, 165)  f32
    ref_pose = full_ref[:, :POSE_DIM]
    ref_shape = full_ref[:, POSE_DIM:POSE_DIM + SHAPE_PARAM_DIM]
    ref_expr = full_ref[:, POSE_DIM + SHAPE_PARAM_DIM:
                        POSE_DIM + SHAPE_PARAM_DIM + EXPR_CODE_DIM]
    ref_cam = full_ref[:, D_TOTAL - CAM_DIM:D_TOTAL]

    atol = 5e-3  # bf16 quantization of weights + pooled features
    assert jnp.allclose(ref_pose[:, :6], root_pose, atol=atol)
    assert jnp.allclose(ref_pose[:, 6:], jaw_pose, atol=atol)
    assert jnp.allclose(ref_shape, shape_param, atol=atol)
    assert jnp.allclose(ref_expr, expr_param, atol=atol)
    assert jnp.allclose(ref_cam, cam_param, atol=atol)

    print("KERNEL_OK")
</pallas_src>

<mosaic_0001>
module attributes {stable_mosaic.version = 11 : i64} {
  func.func @_face_regressor_kernel(%arg0: i32, %arg1: memref<2x1024x64xf32, #tpu.memory_space<vmem>>, %arg2: memref<1024x256xbf16, #tpu.memory_space<vmem>>, %arg3: memref<1x256xf32, #tpu.memory_space<vmem>>, %arg4: memref<2x256xf32, #tpu.memory_space<vmem>>) attributes {dimension_semantics = [#tpu.dimension_semantics<arbitrary>], iteration_bounds = array<i64: 2>, scalar_prefetch = 0 : i64, scratch_operands = 0 : i64, tpu.core_type = #tpu.core_type<tc>, window_params = [{transform_indices = @transform_0, window_bounds = array<i64: 2, 1024, 64>}, {transform_indices = @transform_1, window_bounds = array<i64: 1024, 256>}, {pipeline_mode = #tpu.pipeline_mode<synchronous>, transform_indices = @transform_2, window_bounds = array<i64: 1, 256>}, {pipeline_mode = #tpu.pipeline_mode<synchronous>, transform_indices = @transform_3, window_bounds = array<i64: 2, 256>}]} {
    %c0_i32 = arith.constant 0 : i32
    %0 = arith.cmpi eq, %arg0, %c0_i32 : i32
    %1 = arith.extui %0 : i1 to i32
    %c0_i32_0 = arith.constant 0 : i32
    %2 = arith.cmpi ne, %1, %c0_i32_0 : i32
    scf.if %2 {
      %cst_10 = arith.constant 0.000000e+00 : f32
      %11 = vector.broadcast %cst_10 : f32 to vector<2x256xf32>
      %c0_11 = arith.constant 0 : index
      %c0_12 = arith.constant 0 : index
      %12 = vector.load %arg3[%c0_11, %c0_12] : memref<1x256xf32, #tpu.memory_space<vmem>>, vector<1x256xf32>
      %13 = vector.broadcast %12 : vector<1x256xf32> to vector<2x256xf32>
      %14 = arith.addf %11, %13 : vector<2x256xf32>
      %c0_13 = arith.constant 0 : index
      %c0_14 = arith.constant 0 : index
      %15 = vector.load %arg4[%c0_13, %c0_14] : memref<2x256xf32, #tpu.memory_space<vmem>>, vector<2x256xf32>
      tpu.vector_store %arg4[%c0_13, %c0_14], %14 {strides = array<i32>} : memref<2x256xf32, #tpu.memory_space<vmem>>, vector<2x256xf32>,
    } else {
    }
    %c0 = arith.constant 0 : index
    %c0_1 = arith.constant 0 : index
    %c0_2 = arith.constant 0 : index
    %3 = vector.load %arg1[%c0, %c0_1, %c0_2] : memref<2x1024x64xf32, #tpu.memory_space<vmem>>, vector<2x1024x64xf32>
    %cst = arith.constant dense<0.000000e+00> : vector<2x1024xf32>
    %4 = vector.multi_reduction <add>, %3, %cst [2] : vector<2x1024x64xf32> to vector<2x1024xf32>
    %c0_3 = arith.constant 0 : index
    %c0_4 = arith.constant 0 : index
    %5 = vector.load %arg4[%c0_3, %c0_4] : memref<2x256xf32, #tpu.memory_space<vmem>>, vector<2x256xf32>
    %6 = arith.truncf %4 : vector<2x1024xf32> to vector<2x1024xbf16>
    %c0_5 = arith.constant 0 : index
    %c0_6 = arith.constant 0 : index
    %7 = vector.load %arg2[%c0_5, %c0_6] : memref<1024x256xbf16, #tpu.memory_space<vmem>>, vector<1024x256xbf16>
    %cst_7 = arith.constant dense<0.000000e+00> : vector<2x256xf32>
    %8 = tpu.matmul %6, %7, %cst_7 {dimension_numbers = #tpu.dot_dimension_numbers<[1], [0], [0], [1], [0, 0, 1, 1], [], []>} : vector<2x1024xbf16>, vector<1024x256xbf16>, vector<2x256xf32> -> vector<2x256xf32>
    %9 = arith.addf %5, %8 : vector<2x256xf32>
    %c0_8 = arith.constant 0 : index
    %c0_9 = arith.constant 0 : index
    %10 = vector.load %arg4[%c0_8, %c0_9] : memref<2x256xf32, #tpu.memory_space<vmem>>, vector<2x256xf32>
    tpu.vector_store %arg4[%c0_8, %c0_9], %9 {strides = array<i32>} : memref<2x256xf32, #tpu.memory_space<vmem>>, vector<2x256xf32>,
    return
  }
  func.func @transform_0(%arg0: i32) -> (i32, i32, i32) {
    %c0_i32 = arith.constant 0 : i32
    %c0_i32_0 = arith.constant 0 : i32
    %c0_i32_1 = arith.constant 0 : i32
    return %c0_i32, %arg0, %c0_i32_0 : i32, i32, i32
  }
  func.func @transform_1(%arg0: i32) -> (i32, i32) {
    %c0_i32 = arith.constant 0 : i32
    %c0_i32_0 = arith.constant 0 : i32
    return %arg0, %c0_i32 : i32, i32
  }
  func.func @transform_2(%arg0: i32) -> (i32, i32) {
    %c0_i32 = arith.constant 0 : i32
    %c0_i32_0 = arith.constant 0 : i32
    %c0_i32_1 = arith.constant 0 : i32
    return %c0_i32, %c0_i32_0 : i32, i32
  }
  func.func @transform_3(%arg0: i32) -> (i32, i32) {
    %c0_i32 = arith.constant 0 : i32
    %c0_i32_0 = arith.constant 0 : i32
    %c0_i32_1 = arith.constant 0 : i32
    return %c0_i32, %c0_i32_0 : i32, i32
  }
}

</mosaic_0001>

<bundles_post_ra>
// kernel: tpu_custom_call.1
= control target key start
LH: loop header
LB: loop body
LE: loop exit
PB: predicated region body
PF: predicated region fallthrough
CT: control target
= control target key end

     0   :  { %8 = vsyncpa [#allocation4], 0  ;;  %s5593_s12 = smov 0   ;;  %s5595_s13 = smov 0   ;;  %s7681_s0 = inlined_call_operand.vmem [shape: f32[2,2048,64], index: 0, kind: input, shape index: {}]   ;;  %s7682_s1 = inlined_call_operand.vmem [shape: bf16[2048,256], index: 1, kind: input, shape index: {}]   ;;  %s7683_s2 = inlined_call_operand.vmem [shape: f32[1,256], index: 2, kind: input, shape index: {}]   ;;  %s7684_s3 = inlined_call_operand.hbm [shape: f32[2,256], index: 3, kind: output, shape index: {}]  }
   0x1   :  { %s5597_s14 = smov 0  }
   0x2 LB: > { %s5609_s15 = sadd.s32 4294967295, %s5569_s14   ;;  %s5612_s16 = sadd.s32 1, %s5569_s14   ;;  %s5569_s14 = sphi %s5597_s14, %s7713_s14   ;;  %s5565_s13 = sphi %s5595_s13, %s7712_s13   ;;  %s5561_s12 = sphi %s5593_s12, %s7711_s12  }
   0x3   : > { %s18_s17 = ssub.s32 %s5569_s14, %s5612_s16  ;;  %s21_s18 = sadd.s32 1, %s5565_s13 }
   0x4   : > { %p19_p0 = scmp.eq.s32.totalorder %s18_s17, 0  ;;  %p28_p1 = scmp.ne.s32.totalorder %s5565_s13, %s5561_s12 }
   0x5   : > { %p29_p2 = scmp.eq.s32.totalorder %s5569_s14, 0  ;;  %p5138_p4 = scmp.ge.s32.totalorder %s5569_s14, 2 }
   0x6   : > { %s5621_s19 = scalar_select %p19_p0, %s5565_s13, %s21_s18  }
   0x7   : > { %p30_p3 = por %p29_p2, %p28_p1  ;;  %125 = sbr.rel (%p5138_p4) target bundleno = 146 (0x92), region = 20 }
   0xe   : > { %128 = sbr.rel (!%p30_p3) target bundleno = 146 (0x92), region = 24  ;;  %s130_s20 = sand.u32 (%p30_p3), 1, %s5565_s13  }
   0xf   : > { %s5281_s21 = sshll.u32 (%p30_p3), %s5569_s14, 10  ;;  %s5139_s22 = sshll.u32 (%p30_p3), %s130_s20, 11 }
  0x10   : > { %s5629_s25 = scalar_lea.vmem (%p30_p3), %s7681_s0, %s5281_s21  ;;  %s5634_s26 = scalar_lea.vmem (%p30_p3), [#allocation2], %s5139_s22 }
  0x11   : > { %v673_v0 = vld [vmem:[%s5629_s25] sm:$0xff] (%p30_p3)  ;;  %v675_v1 = vld [vmem:[%s5629_s25 + $0x8] sm:$0xff] (%p30_p3)  ;;  %v677_v2 = vld [vmem:[%s5629_s25 + $0x10] sm:$0xff] (%p30_p3) }
  0x12   : > { %674 = vst [vmem:[%s5634_s26] sm:$0xff] (%p30_p3), %v673_v0  ;;  %676 = vst [vmem:[%s5634_s26 + $0x8] sm:$0xff] (%p30_p3), %v675_v1  ;;  %v679_v3 = vld [vmem:[%s5629_s25 + $0x18] sm:$0xff] (%p30_p3)  ;;  %v681_v4 = vld [vmem:[%s5629_s25 + $0x20] sm:$0xff] (%p30_p3) }
  0x13   : > { %678 = vst [vmem:[%s5634_s26 + $0x10] sm:$0xff] (%p30_p3), %v677_v2  ;;  %v683_v5 = vld [vmem:[%s5629_s25 + $0x28] sm:$0xff] (%p30_p3)  ;;  %680 = vst [vmem:[%s5634_s26 + $0x18] sm:$0xff] (%p30_p3), %v679_v3  ;;  %v685_v6 = vld [vmem:[%s5629_s25 + $0x30] sm:$0xff] (%p30_p3) }
  0x14   : > { %682 = vst [vmem:[%s5634_s26 + $0x20] sm:$0xff] (%p30_p3), %v681_v4  ;;  %684 = vst [vmem:[%s5634_s26 + $0x28] sm:$0xff] (%p30_p3), %v683_v5  ;;  %v687_v7 = vld [vmem:[%s5629_s25 + $0x38] sm:$0xff] (%p30_p3)  ;;  %v689_v8 = vld [vmem:[%s5629_s25 + $0x40] sm:$0xff] (%p30_p3) }
  0x15   : > { %686 = vst [vmem:[%s5634_s26 + $0x30] sm:$0xff] %v685_v6  ;;  %688 = vst [vmem:[%s5634_s26 + $0x38] sm:$0xff] %v687_v7  ;;  %v691_v9 = vld [vmem:[%s5629_s25 + $0x48] sm:$0xff]  ;;  %v693_v10 = vld [vmem:[%s5629_s25 + $0x50] sm:$0xff] }
  0x16   : > { %690 = vst [vmem:[%s5634_s26 + $0x40] sm:$0xff] %v689_v8  ;;  %v695_v11 = vld [vmem:[%s5629_s25 + $0x58] sm:$0xff]  ;;  %692 = vst [vmem:[%s5634_s26 + $0x48] sm:$0xff] %v691_v9  ;;  %v697_v12 = vld [vmem:[%s5629_s25 + $0x60] sm:$0xff] }
  0x17   : > { %694 = vst [vmem:[%s5634_s26 + $0x50] sm:$0xff] %v693_v10  ;;  %696 = vst [vmem:[%s5634_s26 + $0x58] sm:$0xff] %v695_v11  ;;  %v699_v13 = vld [vmem:[%s5629_s25 + $0x68] sm:$0xff]  ;;  %v701_v14 = vld [vmem:[%s5629_s25 + $0x70] sm:$0xff] }
  0x18   : > { %698 = vst [vmem:[%s5634_s26 + $0x60] sm:$0xff] %v697_v12  ;;  %700 = vst [vmem:[%s5634_s26 + $0x68] sm:$0xff] %v699_v13  ;;  %v703_v15 = vld [vmem:[%s5629_s25 + $0x78] sm:$0xff]  ;;  %v705_v16 = vld [vmem:[%s5629_s25 + $0x80] sm:$0xff] }
  0x19   : > { %702 = vst [vmem:[%s5634_s26 + $0x70] sm:$0xff] %v701_v14  ;;  %v707_v17 = vld [vmem:[%s5629_s25 + $0x88] sm:$0xff]  ;;  %704 = vst [vmem:[%s5634_s26 + $0x78] sm:$0xff] %v703_v15  ;;  %v709_v18 = vld [vmem:[%s5629_s25 + $0x90] sm:$0xff] }
  0x1a   : > { %706 = vst [vmem:[%s5634_s26 + $0x80] sm:$0xff] %v705_v16  ;;  %708 = vst [vmem:[%s5634_s26 + $0x88] sm:$0xff] %v707_v17  ;;  %v711_v19 = vld [vmem:[%s5629_s25 + $0x98] sm:$0xff]  ;;  %v713_v20 = vld [vmem:[%s5629_s25 + $0xa0] sm:$0xff] }
  0x1b   : > { %710 = vst [vmem:[%s5634_s26 + $0x90] sm:$0xff] %v709_v18  ;;  %712 = vst [vmem:[%s5634_s26 + $0x98] sm:$0xff] %v711_v19  ;;  %v715_v21 = vld [vmem:[%s5629_s25 + $0xa8] sm:$0xff]  ;;  %v717_v22 = vld [vmem:[%s5629_s25 + $0xb0] sm:$0xff] }
  0x1c   : > { %714 = vst [vmem:[%s5634_s26 + $0xa0] sm:$0xff] %v713_v20  ;;  %v719_v23 = vld [vmem:[%s5629_s25 + $0xb8] sm:$0xff]  ;;  %716 = vst [vmem:[%s5634_s26 + $0xa8] sm:$0xff] %v715_v21  ;;  %v721_v24 = vld [vmem:[%s5629_s25 + $0xc0] sm:$0xff] }
  0x1d   : > { %718 = vst [vmem:[%s5634_s26 + $0xb0] sm:$0xff] %v717_v22  ;;  %720 = vst [vmem:[%s5634_s26 + $0xb8] sm:$0xff] %v719_v23  ;;  %v723_v25 = vld [vmem:[%s5629_s25 + $0xc8] sm:$0xff]  ;;  %v725_v26 = vld [vmem:[%s5629_s25 + $0xd0] sm:$0xff] }
  0x1e   : > { %722 = vst [vmem:[%s5634_s26 + $0xc0] sm:$0xff] %v721_v24  ;;  %724 = vst [vmem:[%s5634_s26 + $0xc8] sm:$0xff] %v723_v25  ;;  %v727_v27 = vld [vmem:[%s5629_s25 + $0xd8] sm:$0xff]  ;;  %v729_v28 = vld [vmem:[%s5629_s25 + $0xe0] sm:$0xff] }
  0x1f   : > { %726 = vst [vmem:[%s5634_s26 + $0xd0] sm:$0xff] %v725_v26  ;;  %v731_v29 = vld [vmem:[%s5629_s25 + $0xe8] sm:$0xff]  ;;  %728 = vst [vmem:[%s5634_s26 + $0xd8] sm:$0xff] %v727_v27  ;;  %v733_v30 = vld [vmem:[%s5629_s25 + $0xf0] sm:$0xff] }
  0x20   : > { %730 = vst [vmem:[%s5634_s26 + $0xe0] sm:$0xff] %v729_v28  ;;  %732 = vst [vmem:[%s5634_s26 + $0xe8] sm:$0xff] %v731_v29  ;;  %v735_v31 = vld [vmem:[%s5629_s25 + $0xf8] sm:$0xff]  ;;  %v737_v32 = vld [vmem:[%s5629_s25 + $0x100] sm:$0xff] }
  0x21   : > { %734 = vst [vmem:[%s5634_s26 + $0xf0] sm:$0xff] %v733_v30  ;;  %736 = vst [vmem:[%s5634_s26 + $0xf8] sm:$0xff] %v735_v31  ;;  %v739_v33 = vld [vmem:[%s5629_s25 + $0x108] sm:$0xff]  ;;  %v741_v34 = vld [vmem:[%s5629_s25 + $0x110] sm:$0xff] }
  0x22   : > { %738 = vst [vmem:[%s5634_s26 + $0x100] sm:$0xff] %v737_v32  ;;  %v743_v35 = vld [vmem:[%s5629_s25 + $0x118] sm:$0xff]  ;;  %740 = vst [vmem:[%s5634_s26 + $0x108] sm:$0xff] %v739_v33  ;;  %v745_v36 = vld [vmem:[%s5629_s25 + $0x120] sm:$0xff] }
  0x23   : > { %742 = vst [vmem:[%s5634_s26 + $0x110] sm:$0xff] %v741_v34  ;;  %744 = vst [vmem:[%s5634_s26 + $0x118] sm:$0xff] %v743_v35  ;;  %v747_v37 = vld [vmem:[%s5629_s25 + $0x128] sm:$0xff]  ;;  %v749_v38 = vld [vmem:[%s5629_s25 + $0x130] sm:$0xff] }
  0x24   : > { %746 = vst [vmem:[%s5634_s26 + $0x120] sm:$0xff] %v745_v36  ;;  %748 = vst [vmem:[%s5634_s26 + $0x128] sm:$0xff] %v747_v37  ;;  %v751_v39 = vld [vmem:[%s5629_s25 + $0x138] sm:$0xff]  ;;  %v753_v40 = vld [vmem:[%s5629_s25 + $0x140] sm:$0xff] }
  0x25   : > { %750 = vst [vmem:[%s5634_s26 + $0x130] sm:$0xff] %v749_v38  ;;  %v755_v41 = vld [vmem:[%s5629_s25 + $0x148] sm:$0xff]  ;;  %752 = vst [vmem:[%s5634_s26 + $0x138] sm:$0xff] %v751_v39  ;;  %v757_v42 = vld [vmem:[%s5629_s25 + $0x150] sm:$0xff] }
  0x26   : > { %754 = vst [vmem:[%s5634_s26 + $0x140] sm:$0xff] %v753_v40  ;;  %756 = vst [vmem:[%s5634_s26 + $0x148] sm:$0xff] %v755_v41  ;;  %v759_v43 = vld [vmem:[%s5629_s25 + $0x158] sm:$0xff]  ;;  %v761_v44 = vld [vmem:[%s5629_s25 + $0x160] sm:$0xff] }
  0x27   : > { %758 = vst [vmem:[%s5634_s26 + $0x150] sm:$0xff] %v757_v42  ;;  %760 = vst [vmem:[%s5634_s26 + $0x158] sm:$0xff] %v759_v43  ;;  %v763_v45 = vld [vmem:[%s5629_s25 + $0x168] sm:$0xff]  ;;  %v765_v46 = vld [vmem:[%s5629_s25 + $0x170] sm:$0xff] }
  0x28   : > { %762 = vst [vmem:[%s5634_s26 + $0x160] sm:$0xff] %v761_v44  ;;  %v767_v47 = vld [vmem:[%s5629_s25 + $0x178] sm:$0xff]  ;;  %764 = vst [vmem:[%s5634_s26 + $0x168] sm:$0xff] %v763_v45  ;;  %v769_v48 = vld [vmem:[%s5629_s25 + $0x180] sm:$0xff] }
  0x29   : > { %766 = vst [vmem:[%s5634_s26 + $0x170] sm:$0xff] %v765_v46  ;;  %768 = vst [vmem:[%s5634_s26 + $0x178] sm:$0xff] %v767_v47  ;;  %v771_v49 = vld [vmem:[%s5629_s25 + $0x188] sm:$0xff]  ;;  %v773_v50 = vld [vmem:[%s5629_s25 + $0x190] sm:$0xff] }
  0x2a   : > { %770 = vst [vmem:[%s5634_s26 + $0x180] sm:$0xff] %v769_v48  ;;  %772 = vst [vmem:[%s5634_s26 + $0x188] sm:$0xff] %v771_v49  ;;  %v775_v51 = vld [vmem:[%s5629_s25 + $0x198] sm:$0xff]  ;;  %v777_v52 = vld [vmem:[%s5629_s25 + $0x1a0] sm:$0xff] }
  0x2b   : > { %774 = vst [vmem:[%s5634_s26 + $0x190] sm:$0xff] %v773_v50  ;;  %v779_v53 = vld [vmem:[%s5629_s25 + $0x1a8] sm:$0xff]  ;;  %776 = vst [vmem:[%s5634_s26 + $0x198] sm:$0xff] %v775_v51  ;;  %v781_v54 = vld [vmem:[%s5629_s25 + $0x1b0] sm:$0xff] }
  0x2c   : > { %778 = vst [vmem:[%s5634_s26 + $0x1a0] sm:$0xff] %v777_v52  ;;  %780 = vst [vmem:[%s5634_s26 + $0x1a8] sm:$0xff] %v779_v53  ;;  %v783_v55 = vld [vmem:[%s5629_s25 + $0x1b8] sm:$0xff]  ;;  %v785_v56 = vld [vmem:[%s5629_s25 + $0x1c0] sm:$0xff] }
  0x2d   : > { %782 = vst [vmem:[%s5634_s26 + $0x1b0] sm:$0xff] %v781_v54  ;;  %784 = vst [vmem:[%s5634_s26 + $0x1b8] sm:$0xff] %v783_v55  ;;  %v787_v57 = vld [vmem:[%s5629_s25 + $0x1c8] sm:$0xff]  ;;  %v789_v58 = vld [vmem:[%s5629_s25 + $0x1d0] sm:$0xff] }
  0x2e   : > { %786 = vst [vmem:[%s5634_s26 + $0x1c0] sm:$0xff] %v785_v56  ;;  %v791_v59 = vld [vmem:[%s5629_s25 + $0x1d8] sm:$0xff]  ;;  %788 = vst [vmem:[%s5634_s26 + $0x1c8] sm:$0xff] %v787_v57  ;;  %v793_v60 = vld [vmem:[%s5629_s25 + $0x1e0] sm:$0xff] }
  0x2f   : > { %790 = vst [vmem:[%s5634_s26 + $0x1d0] sm:$0xff] %v789_v58  ;;  %792 = vst [vmem:[%s5634_s26 + $0x1d8] sm:$0xff] %v791_v59  ;;  %v795_v61 = vld [vmem:[%s5629_s25 + $0x1e8] sm:$0xff]  ;;  %v797_v62 = vld [vmem:[%s5629_s25 + $0x1f0] sm:$0xff] }
  0x30   : > { %794 = vst [vmem:[%s5634_s26 + $0x1e0] sm:$0xff] %v793_v60  ;;  %796 = vst [vmem:[%s5634_s26 + $0x1e8] sm:$0xff] %v795_v61  ;;  %v799_v63 = vld [vmem:[%s5629_s25 + $0x1f8] sm:$0xff]  ;;  %v801_v0 = vld [vmem:[%s5629_s25 + $0x200] sm:$0xff] }
  0x31   : > { %798 = vst [vmem:[%s5634_s26 + $0x1f0] sm:$0xff] %v797_v62  ;;  %v803_v1 = vld [vmem:[%s5629_s25 + $0x208] sm:$0xff]  ;;  %800 = vst [vmem:[%s5634_s26 + $0x1f8] sm:$0xff] %v799_v63  ;;  %v805_v2 = vld [vmem:[%s5629_s25 + $0x210] sm:$0xff] }
  0x32   : > { %802 = vst [vmem:[%s5634_s26 + $0x200] sm:$0xff] %v801_v0  ;;  %804 = vst [vmem:[%s5634_s26 + $0x208] sm:$0xff] %v803_v1  ;;  %v807_v3 = vld [vmem:[%s5629_s25 + $0x218] sm:$0xff]  ;;  %v809_v4 = vld [vmem:[%s5629_s25 + $0x220] sm:$0xff] }
  0x33   : > { %806 = vst [vmem:[%s5634_s26 + $0x210] sm:$0xff] %v805_v2  ;;  %808 = vst [vmem:[%s5634_s26 + $0x218] sm:$0xff] %v807_v3  ;;  %v811_v5 = vld [vmem:[%s5629_s25 + $0x228] sm:$0xff]  ;;  %v813_v6 = vld [vmem:[%s5629_s25 + $0x230] sm:$0xff] }
  0x34   : > { %810 = vst [vmem:[%s5634_s26 + $0x220] sm:$0xff] %v809_v4  ;;  %v815_v7 = vld [vmem:[%s5629_s25 + $0x238] sm:$0xff]  ;;  %812 = vst [vmem:[%s5634_s26 + $0x228] sm:$0xff] %v811_v5  ;;  %v817_v8 = vld [vmem:[%s5629_s25 + $0x240] sm:$0xff] }
  0x35   : > { %814 = vst [vmem:[%s5634_s26 + $0x230] sm:$0xff] %v813_v6  ;;  %816 = vst [vmem:[%s5634_s26 + $0x238] sm:$0xff] %v815_v7  ;;  %v819_v9 = vld [vmem:[%s5629_s25 + $0x248] sm:$0xff]  ;;  %v821_v10 = vld [vmem:[%s5629_s25 + $0x250] sm:$0xff] }
  0x36   : > { %818 = vst [vmem:[%s5634_s26 + $0x240] sm:$0xff] %v817_v8  ;;  %820 = vst [vmem:[%s5634_s26 + $0x248] sm:$0xff] %v819_v9  ;;  %v823_v11 = vld [vmem:[%s5629_s25 + $0x258] sm:$0xff]  ;;  %v825_v12 = vld [vmem:[%s5629_s25 + $0x260] sm:$0xff] }
  0x37   : > { %822 = vst [vmem:[%s5634_s26 + $0x250] sm:$0xff] %v821_v10  ;;  %v827_v13 = vld [vmem:[%s5629_s25 + $0x268] sm:$0xff]  ;;  %824 = vst [vmem:[%s5634_s26 + $0x258] sm:$0xff] %v823_v11  ;;  %v829_v14 = vld [vmem:[%s5629_s25 + $0x270] sm:$0xff] }
  0x38   : > { %826 = vst [vmem:[%s5634_s26 + $0x260] sm:$0xff] %v825_v12  ;;  %828 = vst [vmem:[%s5634_s26 + $0x268] sm:$0xff] %v827_v13  ;;  %v831_v15 = vld [vmem:[%s5629_s25 + $0x278] sm:$0xff]  ;;  %v833_v16 = vld [vmem:[%s5629_s25 + $0x280] sm:$0xff] }
  0x39   : > { %830 = vst [vmem:[%s5634_s26 + $0x270] sm:$0xff] %v829_v14  ;;  %832 = vst [vmem:[%s5634_s26 + $0x278] sm:$0xff] %v831_v15  ;;  %v835_v17 = vld [vmem:[%s5629_s25 + $0x288] sm:$0xff]  ;;  %v837_v18 = vld [vmem:[%s5629_s25 + $0x290] sm:$0xff] }
  0x3a   : > { %834 = vst [vmem:[%s5634_s26 + $0x280] sm:$0xff] %v833_v16  ;;  %v839_v19 = vld [vmem:[%s5629_s25 + $0x298] sm:$0xff]  ;;  %836 = vst [vmem:[%s5634_s26 + $0x288] sm:$0xff] %v835_v17  ;;  %v841_v20 = vld [vmem:[%s5629_s25 + $0x2a0] sm:$0xff] }
  0x3b   : > { %838 = vst [vmem:[%s5634_s26 + $0x290] sm:$0xff] %v837_v18  ;;  %840 = vst [vmem:[%s5634_s26 + $0x298] sm:$0xff] %v839_v19  ;;  %v843_v21 = vld [vmem:[%s5629_s25 + $0x2a8] sm:$0xff]  ;;  %v845_v22 = vld [vmem:[%s5629_s25 + $0x2b0] sm:$0xff] }
  0x3c   : > { %842 = vst [vmem:[%s5634_s26 + $0x2a0] sm:$0xff] %v841_v20  ;;  %844 = vst [vmem:[%s5634_s26 + $0x2a8] sm:$0xff] %v843_v21  ;;  %v847_v23 = vld [vmem:[%s5629_s25 + $0x2b8] sm:$0xff]  ;;  %v849_v24 = vld [vmem:[%s5629_s25 + $0x2c0] sm:$0xff] }
  0x3d   : > { %846 = vst [vmem:[%s5634_s26 + $0x2b0] sm:$0xff] %v845_v22  ;;  %v851_v25 = vld [vmem:[%s5629_s25 + $0x2c8] sm:$0xff]  ;;  %848 = vst [vmem:[%s5634_s26 + $0x2b8] sm:$0xff] %v847_v23  ;;  %v853_v26 = vld [vmem:[%s5629_s25 + $0x2d0] sm:$0xff] }
  0x3e   : > { %850 = vst [vmem:[%s5634_s26 + $0x2c0] sm:$0xff] %v849_v24  ;;  %852 = vst [vmem:[%s5634_s26 + $0x2c8] sm:$0xff] %v851_v25  ;;  %v855_v27 = vld [vmem:[%s5629_s25 + $0x2d8] sm:$0xff]  ;;  %v857_v28 = vld [vmem:[%s5629_s25 + $0x2e0] sm:$0xff] }
  0x3f   : > { %854 = vst [vmem:[%s5634_s26 + $0x2d0] sm:$0xff] %v853_v26  ;;  %856 = vst [vmem:[%s5634_s26 + $0x2d8] sm:$0xff] %v855_v27  ;;  %v859_v29 = vld [vmem:[%s5629_s25 + $0x2e8] sm:$0xff]  ;;  %v861_v30 = vld [vmem:[%s5629_s25 + $0x2f0] sm:$0xff] }
  0x40   : > { %858 = vst [vmem:[%s5634_s26 + $0x2e0] sm:$0xff] %v857_v28  ;;  %v863_v31 = vld [vmem:[%s5629_s25 + $0x2f8] sm:$0xff]  ;;  %860 = vst [vmem:[%s5634_s26 + $0x2e8] sm:$0xff] %v859_v29  ;;  %v865_v32 = vld [vmem:[%s5629_s25 + $0x300] sm:$0xff] }
  0x41   : > { %862 = vst [vmem:[%s5634_s26 + $0x2f0] sm:$0xff] %v861_v30  ;;  %864 = vst [vmem:[%s5634_s26 + $0x2f8] sm:$0xff] %v863_v31  ;;  %v867_v33 = vld [vmem:[%s5629_s25 + $0x308] sm:$0xff]  ;;  %v869_v34 = vld [vmem:[%s5629_s25 + $0x310] sm:$0xff] }
  0x42   : > { %866 = vst [vmem:[%s5634_s26 + $0x300] sm:$0xff] %v865_v32  ;;  %868 = vst [vmem:[%s5634_s26 + $0x308] sm:$0xff] %v867_v33  ;;  %v871_v35 = vld [vmem:[%s5629_s25 + $0x318] sm:$0xff]  ;;  %v873_v36 = vld [vmem:[%s5629_s25 + $0x320] sm:$0xff] }
  0x43   : > { %870 = vst [vmem:[%s5634_s26 + $0x310] sm:$0xff] %v869_v34  ;;  %v875_v37 = vld [vmem:[%s5629_s25 + $0x328] sm:$0xff]  ;;  %872 = vst [vmem:[%s5634_s26 + $0x318] sm:$0xff] %v871_v35  ;;  %v877_v38 = vld [vmem:[%s5629_s25 + $0x330] sm:$0xff] }
  0x44   : > { %874 = vst [vmem:[%s5634_s26 + $0x320] sm:$0xff] %v873_v36  ;;  %876 = vst [vmem:[%s5634_s26 + $0x328] sm:$0xff] %v875_v37  ;;  %v879_v39 = vld [vmem:[%s5629_s25 + $0x338] sm:$0xff]  ;;  %v881_v40 = vld [vmem:[%s5629_s25 + $0x340] sm:$0xff] }
  0x45   : > { %878 = vst [vmem:[%s5634_s26 + $0x330] sm:$0xff] %v877_v38  ;;  %880 = vst [vmem:[%s5634_s26 + $0x338] sm:$0xff] %v879_v39  ;;  %v883_v41 = vld [vmem:[%s5629_s25 + $0x348] sm:$0xff]  ;;  %v885_v42 = vld [vmem:[%s5629_s25 + $0x350] sm:$0xff] }
  0x46   : > { %882 = vst [vmem:[%s5634_s26 + $0x340] sm:$0xff] %v881_v40  ;;  %v887_v43 = vld [vmem:[%s5629_s25 + $0x358] sm:$0xff]  ;;  %884 = vst [vmem:[%s5634_s26 + $0x348] sm:$0xff] %v883_v41  ;;  %v889_v44 = vld [vmem:[%s5629_s25 + $0x360] sm:$0xff] }
  0x47   : > { %886 = vst [vmem:[%s5634_s26 + $0x350] sm:$0xff] %v885_v42  ;;  %888 = vst [vmem:[%s5634_s26 + $0x358] sm:$0xff] %v887_v43  ;;  %v891_v45 = vld [vmem:[%s5629_s25 + $0x368] sm:$0xff]  ;;  %v893_v46 = vld [vmem:[%s5629_s25 + $0x370] sm:$0xff] }
  0x48   : > { %890 = vst [vmem:[%s5634_s26 + $0x360] sm:$0xff] %v889_v44  ;;  %892 = vst [vmem:[%s5634_s26 + $0x368] sm:$0xff] %v891_v45  ;;  %v895_v47 = vld [vmem:[%s5629_s25 + $0x378] sm:$0xff]  ;;  %v897_v48 = vld [vmem:[%s5629_s25 + $0x380] sm:$0xff] }
  0x49   : > { %894 = vst [vmem:[%s5634_s26 + $0x370] sm:$0xff] %v893_v46  ;;  %v899_v49 = vld [vmem:[%s5629_s25 + $0x388] sm:$0xff]  ;;  %896 = vst [vmem:[%s5634_s26 + $0x378] sm:$0xff] %v895_v47  ;;  %v901_v50 = vld [vmem:[%s5629_s25 + $0x390] sm:$0xff] }
  0x4a   : > { %898 = vst [vmem:[%s5634_s26 + $0x380] sm:$0xff] %v897_v48  ;;  %900 = vst [vmem:[%s5634_s26 + $0x388] sm:$0xff] %v899_v49  ;;  %v903_v51 = vld [vmem:[%s5629_s25 + $0x398] sm:$0xff]  ;;  %v905_v52 = vld [vmem:[%s5629_s25 + $0x3a0] sm:$0xff] }
  0x4b   : > { %902 = vst [vmem:[%s5634_s26 + $0x390] sm:$0xff] %v901_v50  ;;  %904 = vst [vmem:[%s5634_s26 + $0x398] sm:$0xff] %v903_v51  ;;  %v907_v53 = vld [vmem:[%s5629_s25 + $0x3a8] sm:$0xff]  ;;  %v909_v54 = vld [vmem:[%s5629_s25 + $0x3b0] sm:$0xff] }
  0x4c   : > { %906 = vst [vmem:[%s5634_s26 + $0x3a0] sm:$0xff] %v905_v52  ;;  %v911_v55 = vld [vmem:[%s5629_s25 + $0x3b8] sm:$0xff]  ;;  %908 = vst [vmem:[%s5634_s26 + $0x3a8] sm:$0xff] %v907_v53  ;;  %v913_v56 = vld [vmem:[%s5629_s25 + $0x3c0] sm:$0xff] }
  0x4d   : > { %910 = vst [vmem:[%s5634_s26 + $0x3b0] sm:$0xff] %v909_v54  ;;  %912 = vst [vmem:[%s5634_s26 + $0x3b8] sm:$0xff] %v911_v55  ;;  %v915_v57 = vld [vmem:[%s5629_s25 + $0x3c8] sm:$0xff]  ;;  %v917_v58 = vld [vmem:[%s5629_s25 + $0x3d0] sm:$0xff] }
  0x4e   : > { %914 = vst [vmem:[%s5634_s26 + $0x3c0] sm:$0xff] %v913_v56  ;;  %916 = vst [vmem:[%s5634_s26 + $0x3c8] sm:$0xff] %v915_v57  ;;  %v919_v59 = vld [vmem:[%s5629_s25 + $0x3d8] sm:$0xff]  ;;  %v921_v60 = vld [vmem:[%s5629_s25 + $0x3e0] sm:$0xff] }
  0x4f   : > { %918 = vst [vmem:[%s5634_s26 + $0x3d0] sm:$0xff] %v917_v58  ;;  %v923_v61 = vld [vmem:[%s5629_s25 + $0x3e8] sm:$0xff]  ;;  %920 = vst [vmem:[%s5634_s26 + $0x3d8] sm:$0xff] %v919_v59  ;;  %v925_v62 = vld [vmem:[%s5629_s25 + $0x3f0] sm:$0xff] }
  0x50   : > { %922 = vst [vmem:[%s5634_s26 + $0x3e0] sm:$0xff] %v921_v60  ;;  %924 = vst [vmem:[%s5634_s26 + $0x3e8] sm:$0xff] %v923_v61  ;;  %v927_v63 = vld [vmem:[%s5629_s25 + $0x3f8] sm:$0xff]  ;;  %v929_v0 = vld [vmem:[%s5629_s25 + $0x800] sm:$0xff] }
  0x51   : > { %926 = vst [vmem:[%s5634_s26 + $0x3f0] sm:$0xff] %v925_v62  ;;  %928 = vst [vmem:[%s5634_s26 + $0x3f8] sm:$0xff] %v927_v63  ;;  %v931_v1 = vld [vmem:[%s5629_s25 + $0x808] sm:$0xff]  ;;  %v933_v2 = vld [vmem:[%s5629_s25 + $0x810] sm:$0xff] }
  0x52   : > { %930 = vst [vmem:[%s5634_s26 + $0x400] sm:$0xff] %v929_v0  ;;  %v935_v3 = vld [vmem:[%s5629_s25 + $0x818] sm:$0xff]  ;;  %932 = vst [vmem:[%s5634_s26 + $0x408] sm:$0xff] %v931_v1  ;;  %v937_v4 = vld [vmem:[%s5629_s25 + $0x820] sm:$0xff] }
  0x53   : > { %934 = vst [vmem:[%s5634_s26 + $0x410] sm:$0xff] %v933_v2  ;;  %936 = vst [vmem:[%s5634_s26 + $0x418] sm:$0xff] %v935_v3  ;;  %v939_v5 = vld [vmem:[%s5629_s25 + $0x828] sm:$0xff]  ;;  %v941_v6 = vld [vmem:[%s5629_s25 + $0x830] sm:$0xff] }
  0x54   : > { %938 = vst [vmem:[%s5634_s26 + $0x420] sm:$0xff] %v937_v4  ;;  %940 = vst [vmem:[%s5634_s26 + $0x428] sm:$0xff] %v939_v5  ;;  %v943_v7 = vld [vmem:[%s5629_s25 + $0x838] sm:$0xff]  ;;  %v945_v8 = vld [vmem:[%s5629_s25 + $0x840] sm:$0xff] }
  0x55   : > { %942 = vst [vmem:[%s5634_s26 + $0x430] sm:$0xff] %v941_v6  ;;  %v947_v9 = vld [vmem:[%s5629_s25 + $0x848] sm:$0xff]  ;;  %944 = vst [vmem:[%s5634_s26 + $0x438] sm:$0xff] %v943_v7  ;;  %v949_v10 = vld [vmem:[%s5629_s25 + $0x850] sm:$0xff] }
  0x56   : > { %946 = vst [vmem:[%s5634_s26 + $0x440] sm:$0xff] %v945_v8  ;;  %948 = vst [vmem:[%s5634_s26 + $0x448] sm:$0xff] %v947_v9  ;;  %v951_v11 = vld [vmem:[%s5629_s25 + $0x858] sm:$0xff]  ;;  %v953_v12 = vld [vmem:[%s5629_s25 + $0x860] sm:$0xff] }
  0x57   : > { %950 = vst [vmem:[%s5634_s26 + $0x450] sm:$0xff] %v949_v10  ;;  %952 = vst [vmem:[%s5634_s26 + $0x458] sm:$0xff] %v951_v11  ;;  %v955_v13 = vld [vmem:[%s5629_s25 + $0x868] sm:$0xff]  ;;  %v957_v14 = vld [vmem:[%s5629_s25 + $0x870] sm:$0xff] }
  0x58   : > { %954 = vst [vmem:[%s5634_s26 + $0x460] sm:$0xff] %v953_v12  ;;  %v959_v15 = vld [vmem:[%s5629_s25 + $0x878] sm:$0xff]  ;;  %956 = vst [vmem:[%s5634_s26 + $0x468] sm:$0xff] %v955_v13  ;;  %v961_v16 = vld [vmem:[%s5629_s25 + $0x880] sm:$0xff] }
  0x59   : > { %958 = vst [vmem:[%s5634_s26 + $0x470] sm:$0xff] %v957_v14  ;;  %960 = vst [vmem:[%s5634_s26 + $0x478] sm:$0xff] %v959_v15  ;;  %v963_v17 = vld [vmem:[%s5629_s25 + $0x888] sm:$0xff]  ;;  %v965_v18 = vld [vmem:[%s5629_s25 + $0x890] sm:$0xff] }
  0x5a   : > { %962 = vst [vmem:[%s5634_s26 + $0x480] sm:$0xff] %v961_v16  ;;  %964 = vst [vmem:[%s5634_s26 + $0x488] sm:$0xff] %v963_v17  ;;  %v967_v19 = vld [vmem:[%s5629_s25 + $0x898] sm:$0xff]  ;;  %v969_v20 = vld [vmem:[%s5629_s25 + $0x8a0] sm:$0xff] }
  0x5b   : > { %966 = vst [vmem:[%s5634_s26 + $0x490] sm:$0xff] %v965_v18  ;;  %v971_v21 = vld [vmem:[%s5629_s25 + $0x8a8] sm:$0xff]  ;;  %968 = vst [vmem:[%s5634_s26 + $0x498] sm:$0xff] %v967_v19  ;;  %v973_v22 = vld [vmem:[%s5629_s25 + $0x8b0] sm:$0xff] }
  0x5c   : > { %970 = vst [vmem:[%s5634_s26 + $0x4a0] sm:$0xff] %v969_v20  ;;  %972 = vst [vmem:[%s5634_s26 + $0x4a8] sm:$0xff] %v971_v21  ;;  %v975_v23 = vld [vmem:[%s5629_s25 + $0x8b8] sm:$0xff]  ;;  %v977_v24 = vld [vmem:[%s5629_s25 + $0x8c0] sm:$0xff] }
  0x5d   : > { %974 = vst [vmem:[%s5634_s26 + $0x4b0] sm:$0xff] %v973_v22  ;;  %976 = vst [vmem:[%s5634_s26 + $0x4b8] sm:$0xff] %v975_v23  ;;  %v979_v25 = vld [vmem:[%s5629_s25 + $0x8c8] sm:$0xff]  ;;  %v981_v26 = vld [vmem:[%s5629_s25 + $0x8d0] sm:$0xff] }
  0x5e   : > { %978 = vst [vmem:[%s5634_s26 + $0x4c0] sm:$0xff] %v977_v24  ;;  %v983_v27 = vld [vmem:[%s5629_s25 + $0x8d8] sm:$0xff]  ;;  %980 = vst [vmem:[%s5634_s26 + $0x4c8] sm:$0xff] %v979_v25  ;;  %v985_v28 = vld [vmem:[%s5629_s25 + $0x8e0] sm:$0xff] }
  0x5f   : > { %982 = vst [vmem:[%s5634_s26 + $0x4d0] sm:$0xff] %v981_v26  ;;  %984 = vst [vmem:[%s5634_s26 + $0x4d8] sm:$0xff] %v983_v27  ;;  %v987_v29 = vld [vmem:[%s5629_s25 + $0x8e8] sm:$0xff]  ;;  %v989_v30 = vld [vmem:[%s5629_s25 + $0x8f0] sm:$0xff] }
  0x60   : > { %986 = vst [vmem:[%s5634_s26 + $0x4e0] sm:$0xff] %v985_v28  ;;  %988 = vst [vmem:[%s5634_s26 + $0x4e8] sm:$0xff] %v987_v29  ;;  %v991_v31 = vld [vmem:[%s5629_s25 + $0x8f8] sm:$0xff]  ;;  %v993_v32 = vld [vmem:[%s5629_s25 + $0x900] sm:$0xff] }
  0x61   : > { %990 = vst [vmem:[%s5634_s26 + $0x4f0] sm:$0xff] %v989_v30  ;;  %v995_v33 = vld [vmem:[%s5629_s25 + $0x908] sm:$0xff]  ;;  %992 = vst [vmem:[%s5634_s26 + $0x4f8] sm:$0xff] %v991_v31  ;;  %v997_v34 = vld [vmem:[%s5629_s25 + $0x910] sm:$0xff] }
  0x62   : > { %994 = vst [vmem:[%s5634_s26 + $0x500] sm:$0xff] %v993_v32  ;;  %996 = vst [vmem:[%s5634_s26 + $0x508] sm:$0xff] %v995_v33  ;;  %v999_v35 = vld [vmem:[%s5629_s25 + $0x918] sm:$0xff]  ;;  %v1001_v36 = vld [vmem:[%s5629_s25 + $0x920] sm:$0xff] }
  0x63   : > { %998 = vst [vmem:[%s5634_s26 + $0x510] sm:$0xff] %v997_v34  ;;  %1000 = vst [vmem:[%s5634_s26 + $0x518] sm:$0xff] %v999_v35  ;;  %v1003_v37 = vld [vmem:[%s5629_s25 + $0x928] sm:$0xff]  ;;  %v1005_v38 = vld [vmem:[%s5629_s25 + $0x930] sm:$0xff] }
  0x64   : > { %1002 = vst [vmem:[%s5634_s26 + $0x520] sm:$0xff] %v1001_v36  ;;  %v1007_v39 = vld [vmem:[%s5629_s25 + $0x938] sm:$0xff]  ;;  %1004 = vst [vmem:[%s5634_s26 + $0x528] sm:$0xff] %v1003_v37  ;;  %v1009_v40 = vld [vmem:[%s5629_s25 + $0x940] sm:$0xff] }
  0x65   : > { %1006 = vst [vmem:[%s5634_s26 + $0x530] sm:$0xff] %v1005_v38  ;;  %1008 = vst [vmem:[%s5634_s26 + $0x538] sm:$0xff] %v1007_v39  ;;  %v1011_v41 = vld [vmem:[%s5629_s25 + $0x948] sm:$0xff]  ;;  %v1013_v42 = vld [vmem:[%s5629_s25 + $0x950] sm:$0xff] }
  0x66   : > { %1010 = vst [vmem:[%s5634_s26 + $0x540] sm:$0xff] %v1009_v40  ;;  %1012 = vst [vmem:[%s5634_s26 + $0x548] sm:$0xff] %v1011_v41  ;;  %v1015_v43 = vld [vmem:[%s5629_s25 + $0x958] sm:$0xff]  ;;  %v1017_v44 = vld [vmem:[%s5629_s25 + $0x960] sm:$0xff] }
  0x67   : > { %1014 = vst [vmem:[%s5634_s26 + $0x550] sm:$0xff] %v1013_v42  ;;  %v1019_v45 = vld [vmem:[%s5629_s25 + $0x968] sm:$0xff]  ;;  %1016 = vst [vmem:[%s5634_s26 + $0x558] sm:$0xff] %v1015_v43  ;;  %v1021_v46 = vld [vmem:[%s5629_s25 + $0x970] sm:$0xff] }
  0x68   : > { %1018 = vst [vmem:[%s5634_s26 + $0x560] sm:$0xff] %v1017_v44  ;;  %1020 = vst [vmem:[%s5634_s26 + $0x568] sm:$0xff] %v1019_v45  ;;  %v1023_v47 = vld [vmem:[%s5629_s25 + $0x978] sm:$0xff]  ;;  %v1025_v48 = vld [vmem:[%s5629_s25 + $0x980] sm:$0xff] }
  0x69   : > { %1022 = vst [vmem:[%s5634_s26 + $0x570] sm:$0xff] %v1021_v46  ;;  %1024 = vst [vmem:[%s5634_s26 + $0x578] sm:$0xff] %v1023_v47  ;;  %v1027_v49 = vld [vmem:[%s5629_s25 + $0x988] sm:$0xff]  ;;  %v1029_v50 = vld [vmem:[%s5629_s25 + $0x990] sm:$0xff] }
  0x6a   : > { %1026 = vst [vmem:[%s5634_s26 + $0x580] sm:$0xff] %v1025_v48  ;;  %v1031_v51 = vld [vmem:[%s5629_s25 + $0x998] sm:$0xff]  ;;  %1028 = vst [vmem:[%s5634_s26 + $0x588] sm:$0xff] %v1027_v49  ;;  %v1033_v52 = vld [vmem:[%s5629_s25 + $0x9a0] sm:$0xff] }
  0x6b   : > { %1030 = vst [vmem:[%s5634_s26 + $0x590] sm:$0xff] %v1029_v50  ;;  %1032 = vst [vmem:[%s5634_s26 + $0x598] sm:$0xff] %v1031_v51  ;;  %v1035_v53 = vld [vmem:[%s5629_s25 + $0x9a8] sm:$0xff]  ;;  %v1037_v54 = vld [vmem:[%s5629_s25 + $0x9b0] sm:$0xff] }
  0x6c   : > { %1034 = vst [vmem:[%s5634_s26 + $0x5a0] sm:$0xff] %v1033_v52  ;;  %1036 = vst [vmem:[%s5634_s26 + $0x5a8] sm:$0xff] %v1035_v53  ;;  %v1039_v55 = vld [vmem:[%s5629_s25 + $0x9b8] sm:$0xff]  ;;  %v1041_v56 = vld [vmem:[%s5629_s25 + $0x9c0] sm:$0xff] }
  0x6d   : > { %1038 = vst [vmem:[%s5634_s26 + $0x5b0] sm:$0xff] %v1037_v54  ;;  %v1043_v57 = vld [vmem:[%s5629_s25 + $0x9c8] sm:$0xff]  ;;  %1040 = vst [vmem:[%s5634_s26 + $0x5b8] sm:$0xff] %v1039_v55  ;;  %v1045_v58 = vld [vmem:[%s5629_s25 + $0x9d0] sm:$0xff] }
  0x6e   : > { %1042 = vst [vmem:[%s5634_s26 + $0x5c0] sm:$0xff] %v1041_v56  ;;  %1044 = vst [vmem:[%s5634_s26 + $0x5c8] sm:$0xff] %v1043_v57  ;;  %v1047_v59 = vld [vmem:[%s5629_s25 + $0x9d8] sm:$0xff]  ;;  %v1049_v60 = vld [vmem:[%s5629_s25 + $0x9e0] sm:$0xff] }
  0x6f   : > { %1046 = vst [vmem:[%s5634_s26 + $0x5d0] sm:$0xff] %v1045_v58  ;;  %1048 = vst [vmem:[%s5634_s26 + $0x5d8] sm:$0xff] %v1047_v59  ;;  %v1051_v61 = vld [vmem:[%s5629_s25 + $0x9e8] sm:$0xff]  ;;  %v1053_v62 = vld [vmem:[%s5629_s25 + $0x9f0] sm:$0xff] }
  0x70   : > { %1050 = vst [vmem:[%s5634_s26 + $0x5e0] sm:$0xff] %v1049_v60  ;;  %v1055_v63 = vld [vmem:[%s5629_s25 + $0x9f8] sm:$0xff]  ;;  %1052 = vst [vmem:[%s5634_s26 + $0x5e8] sm:$0xff] %v1051_v61  ;;  %v1057_v0 = vld [vmem:[%s5629_s25 + $0xa00] sm:$0xff] }
  0x71   : > { %1054 = vst [vmem:[%s5634_s26 + $0x5f0] sm:$0xff] %v1053_v62  ;;  %1056 = vst [vmem:[%s5634_s26 + $0x5f8] sm:$0xff] %v1055_v63  ;;  %v1059_v1 = vld [vmem:[%s5629_s25 + $0xa08] sm:$0xff]  ;;  %v1061_v2 = vld [vmem:[%s5629_s25 + $0xa10] sm:$0xff] }
  0x72   : > { %1058 = vst [vmem:[%s5634_s26 + $0x600] sm:$0xff] %v1057_v0  ;;  %1060 = vst [vmem:[%s5634_s26 + $0x608] sm:$0xff] %v1059_v1  ;;  %v1063_v3 = vld [vmem:[%s5629_s25 + $0xa18] sm:$0xff]  ;;  %v1065_v4 = vld [vmem:[%s5629_s25 + $0xa20] sm:$0xff] }
  0x73   : > { %1062 = vst [vmem:[%s5634_s26 + $0x610] sm:$0xff] %v1061_v2  ;;  %v1067_v5 = vld [vmem:[%s5629_s25 + $0xa28] sm:$0xff]  ;;  %1064 = vst [vmem:[%s5634_s26 + $0x618] sm:$0xff] %v1063_v3  ;;  %v1069_v6 = vld [vmem:[%s5629_s25 + $0xa30] sm:$0xff] }
  0x74   : > { %1066 = vst [vmem:[%s5634_s26 + $0x620] sm:$0xff] %v1065_v4  ;;  %1068 = vst [vmem:[%s5634_s26 + $0x628] sm:$0xff] %v1067_v5  ;;  %v1071_v7 = vld [vmem:[%s5629_s25 + $0xa38] sm:$0xff]  ;;  %v1073_v8 = vld [vmem:[%s5629_s25 + $0xa40] sm:$0xff] }
  0x75   : > { %1070 = vst [vmem:[%s5634_s26 + $0x630] sm:$0xff] %v1069_v6  ;;  %1072 = vst [vmem:[%s5634_s26 + $0x638] sm:$0xff] %v1071_v7  ;;  %v1075_v9 = vld [vmem:[%s5629_s25 + $0xa48] sm:$0xff]  ;;  %v1077_v10 = vld [vmem:[%s5629_s25 + $0xa50] sm:$0xff] }
  0x76   : > { %1074 = vst [vmem:[%s5634_s26 + $0x640] sm:$0xff] %v1073_v8  ;;  %v1079_v11 = vld [vmem:[%s5629_s25 + $0xa58] sm:$0xff]  ;;  %1076 = vst [vmem:[%s5634_s26 + $0x648] sm:$0xff] %v1075_v9  ;;  %v1081_v12 = vld [vmem:[%s5629_s25 + $0xa60] sm:$0xff] }
  0x77   : > { %1078 = vst [vmem:[%s5634_s26 + $0x650] sm:$0xff] %v1077_v10  ;;  %1080 = vst [vmem:[%s5634_s26 + $0x658] sm:$0xff] %v1079_v11  ;;  %v1083_v13 = vld [vmem:[%s5629_s25 + $0xa68] sm:$0xff]  ;;  %v1085_v14 = vld [vmem:[%s5629_s25 + $0xa70] sm:$0xff] }
  0x78   : > { %1082 = vst [vmem:[%s5634_s26 + $0x660] sm:$0xff] %v1081_v12  ;;  %1084 = vst [vmem:[%s5634_s26 + $0x668] sm:$0xff] %v1083_v13  ;;  %v1087_v15 = vld [vmem:[%s5629_s25 + $0xa78] sm:$0xff]  ;;  %v1089_v16 = vld [vmem:[%s5629_s25 + $0xa80] sm:$0xff] }
  0x79   : > { %1086 = vst [vmem:[%s5634_s26 + $0x670] sm:$0xff] %v1085_v14  ;;  %v1091_v17 = vld [vmem:[%s5629_s25 + $0xa88] sm:$0xff]  ;;  %1088 = vst [vmem:[%s5634_s26 + $0x678] sm:$0xff] %v1087_v15  ;;  %v1093_v18 = vld [vmem:[%s5629_s25 + $0xa90] sm:$0xff] }
  0x7a   : > { %1090 = vst [vmem:[%s5634_s26 + $0x680] sm:$0xff] %v1089_v16  ;;  %1092 = vst [vmem:[%s5634_s26 + $0x688] sm:$0xff] %v1091_v17  ;;  %v1095_v19 = vld [vmem:[%s5629_s25 + $0xa98] sm:$0xff]  ;;  %v1097_v20 = vld [vmem:[%s5629_s25 + $0xaa0] sm:$0xff] }
  0x7b   : > { %1094 = vst [vmem:[%s5634_s26 + $0x690] sm:$0xff] %v1093_v18  ;;  %1096 = vst [vmem:[%s5634_s26 + $0x698] sm:$0xff] %v1095_v19  ;;  %v1099_v21 = vld [vmem:[%s5629_s25 + $0xaa8] sm:$0xff]  ;;  %v1101_v22 = vld [vmem:[%s5629_s25 + $0xab0] sm:$0xff] }
  0x7c   : > { %1098 = vst [vmem:[%s5634_s26 + $0x6a0] sm:$0xff] %v1097_v20  ;;  %v1103_v23 = vld [vmem:[%s5629_s25 + $0xab8] sm:$0xff]  ;;  %1100 = vst [vmem:[%s5634_s26 + $0x6a8] sm:$0xff] %v1099_v21  ;;  %v1105_v24 = vld [vmem:[%s5629_s25 + $0xac0] sm:$0xff] }
  0x7d   : > { %1102 = vst [vmem:[%s5634_s26 + $0x6b0] sm:$0xff] %v1101_v22  ;;  %1104 = vst [vmem:[%s5634_s26 + $0x6b8] sm:$0xff] %v1103_v23  ;;  %v1107_v25 = vld [vmem:[%s5629_s25 + $0xac8] sm:$0xff]  ;;  %v1109_v26 = vld [vmem:[%s5629_s25 + $0xad0] sm:$0xff] }
  0x7e   : > { %1106 = vst [vmem:[%s5634_s26 + $0x6c0] sm:$0xff] %v1105_v24  ;;  %1108 = vst [vmem:[%s5634_s26 + $0x6c8] sm:$0xff] %v1107_v25  ;;  %v1111_v27 = vld [vmem:[%s5629_s25 + $0xad8] sm:$0xff]  ;;  %v1113_v28 = vld [vmem:[%s5629_s25 + $0xae0] sm:$0xff] }
  0x7f   : > { %1110 = vst [vmem:[%s5634_s26 + $0x6d0] sm:$0xff] %v1109_v26  ;;  %v1115_v29 = vld [vmem:[%s5629_s25 + $0xae8] sm:$0xff]  ;;  %1112 = vst [vmem:[%s5634_s26 + $0x6d8] sm:$0xff] %v1111_v27  ;;  %v1117_v30 = vld [vmem:[%s5629_s25 + $0xaf0] sm:$0xff] }
  0x80   : > { %1114 = vst [vmem:[%s5634_s26 + $0x6e0] sm:$0xff] %v1113_v28  ;;  %1116 = vst [vmem:[%s5634_s26 + $0x6e8] sm:$0xff] %v1115_v29  ;;  %v1119_v31 = vld [vmem:[%s5629_s25 + $0xaf8] sm:$0xff]  ;;  %v1121_v32 = vld [vmem:[%s5629_s25 + $0xb00] sm:$0xff] }
  0x81   : > { %1118 = vst [vmem:[%s5634_s26 + $0x6f0] sm:$0xff] %v1117_v30  ;;  %1120 = vst [vmem:[%s5634_s26 + $0x6f8] sm:$0xff] %v1119_v31  ;;  %v1123_v33 = vld [vmem:[%s5629_s25 + $0xb08] sm:$0xff]  ;;  %v1125_v34 = vld [vmem:[%s5629_s25 + $0xb10] sm:$0xff] }
  0x82   : > { %1122 = vst [vmem:[%s5634_s26 + $0x700] sm:$0xff] %v1121_v32  ;;  %v1127_v35 = vld [vmem:[%s5629_s25 + $0xb18] sm:$0xff]  ;;  %1124 = vst [vmem:[%s5634_s26 + $0x708] sm:$0xff] %v1123_v33  ;;  %v1129_v36 = vld [vmem:[%s5629_s25 + $0xb20] sm:$0xff] }
  0x83   : > { %1126 = vst [vmem:[%s5634_s26 + $0x710] sm:$0xff] %v1125_v34  ;;  %1128 = vst [vmem:[%s5634_s26 + $0x718] sm:$0xff] %v1127_v35  ;;  %v1131_v37 = vld [vmem:[%s5629_s25 + $0xb28] sm:$0xff]  ;;  %v1133_v38 = vld [vmem:[%s5629_s25 + $0xb30] sm:$0xff] }
  0x84   : > { %1130 = vst [vmem:[%s5634_s26 + $0x720] sm:$0xff] %v1129_v36  ;;  %1132 = vst [vmem:[%s5634_s26 + $0x728] sm:$0xff] %v1131_v37  ;;  %v1135_v39 = vld [vmem:[%s5629_s25 + $0xb38] sm:$0xff]  ;;  %v1137_v40 = vld [vmem:[%s5629_s25 + $0xb40] sm:$0xff] }
  0x85   : > { %1134 = vst [vmem:[%s5634_s26 + $0x730] sm:$0xff] %v1133_v38  ;;  %v1139_v41 = vld [vmem:[%s5629_s25 + $0xb48] sm:$0xff]  ;;  %1136 = vst [vmem:[%s5634_s26 + $0x738] sm:$0xff] %v1135_v39  ;;  %v1141_v42 = vld [vmem:[%s5629_s25 + $0xb50] sm:$0xff] }
  0x86   : > { %1138 = vst [vmem:[%s5634_s26 + $0x740] sm:$0xff] %v1137_v40  ;;  %1140 = vst [vmem:[%s5634_s26 + $0x748] sm:$0xff] %v1139_v41  ;;  %v1143_v43 = vld [vmem:[%s5629_s25 + $0xb58] sm:$0xff]  ;;  %v1145_v44 = vld [vmem:[%s5629_s25 + $0xb60] sm:$0xff] }
  0x87   : > { %1142 = vst [vmem:[%s5634_s26 + $0x750] sm:$0xff] %v1141_v42  ;;  %1144 = vst [vmem:[%s5634_s26 + $0x758] sm:$0xff] %v1143_v43  ;;  %v1147_v45 = vld [vmem:[%s5629_s25 + $0xb68] sm:$0xff]  ;;  %v1149_v46 = vld [vmem:[%s5629_s25 + $0xb70] sm:$0xff] }
  0x88   : > { %1146 = vst [vmem:[%s5634_s26 + $0x760] sm:$0xff] %v1145_v44  ;;  %v1151_v47 = vld [vmem:[%s5629_s25 + $0xb78] sm:$0xff]  ;;  %1148 = vst [vmem:[%s5634_s26 + $0x768] sm:$0xff] %v1147_v45  ;;  %v1153_v48 = vld [vmem:[%s5629_s25 + $0xb80] sm:$0xff] }
  0x89   : > { %1150 = vst [vmem:[%s5634_s26 + $0x770] sm:$0xff] %v1149_v46  ;;  %1152 = vst [vmem:[%s5634_s26 + $0x778] sm:$0xff] %v1151_v47  ;;  %v1155_v49 = vld [vmem:[%s5629_s25 + $0xb88] sm:$0xff]  ;;  %v1157_v50 = vld [vmem:[%s5629_s25 + $0xb90] sm:$0xff] }
  0x8a   : > { %1154 = vst [vmem:[%s5634_s26 + $0x780] sm:$0xff] %v1153_v48  ;;  %1156 = vst [vmem:[%s5634_s26 + $0x788] sm:$0xff] %v1155_v49  ;;  %v1159_v51 = vld [vmem:[%s5629_s25 + $0xb98] sm:$0xff]  ;;  %v1161_v52 = vld [vmem:[%s5629_s25 + $0xba0] sm:$0xff] }
  0x8b   : > { %1158 = vst [vmem:[%s5634_s26 + $0x790] sm:$0xff] %v1157_v50  ;;  %v1163_v53 = vld [vmem:[%s5629_s25 + $0xba8] sm:$0xff]  ;;  %1160 = vst [vmem:[%s5634_s26 + $0x798] sm:$0xff] %v1159_v51  ;;  %v1165_v54 = vld [vmem:[%s5629_s25 + $0xbb0] sm:$0xff] }
  0x8c   : > { %1162 = vst [vmem:[%s5634_s26 + $0x7a0] sm:$0xff] %v1161_v52  ;;  %1164 = vst [vmem:[%s5634_s26 + $0x7a8] sm:$0xff] %v1163_v53  ;;  %v1167_v55 = vld [vmem:[%s5629_s25 + $0xbb8] sm:$0xff]  ;;  %v1169_v56 = vld [vmem:[%s5629_s25 + $0xbc0] sm:$0xff] }
  0x8d   : > { %1166 = vst [vmem:[%s5634_s26 + $0x7b0] sm:$0xff] %v1165_v54  ;;  %1168 = vst [vmem:[%s5634_s26 + $0x7b8] sm:$0xff] %v1167_v55  ;;  %v1171_v57 = vld [vmem:[%s5629_s25 + $0xbc8] sm:$0xff]  ;;  %v1173_v58 = vld [vmem:[%s5629_s25 + $0xbd0] sm:$0xff] }
  0x8e   : > { %1170 = vst [vmem:[%s5634_s26 + $0x7c0] sm:$0xff] %v1169_v56  ;;  %v1175_v59 = vld [vmem:[%s5629_s25 + $0xbd8] sm:$0xff]  ;;  %1172 = vst [vmem:[%s5634_s26 + $0x7c8] sm:$0xff] %v1171_v57  ;;  %v1177_v60 = vld [vmem:[%s5629_s25 + $0xbe0] sm:$0xff] }
  0x8f   : > { %1174 = vst [vmem:[%s5634_s26 + $0x7d0] sm:$0xff] %v1173_v58  ;;  %1176 = vst [vmem:[%s5634_s26 + $0x7d8] sm:$0xff] %v1175_v59  ;;  %v1179_v61 = vld [vmem:[%s5629_s25 + $0xbe8] sm:$0xff]  ;;  %v1181_v62 = vld [vmem:[%s5629_s25 + $0xbf0] sm:$0xff] }
  0x90   : > { %1178 = vst [vmem:[%s5634_s26 + $0x7e0] sm:$0xff] %v1177_v60  ;;  %1180 = vst [vmem:[%s5634_s26 + $0x7e8] sm:$0xff] %v1179_v61  ;;  %v1183_v63 = vld [vmem:[%s5629_s25 + $0xbf8] sm:$0xff] }
  0x91   : > { %1182 = vst [vmem:[%s5634_s26 + $0x7f0] sm:$0xff] %v1181_v62  ;;  %1184 = vst [vmem:[%s5634_s26 + $0x7f8] sm:$0xff] %v1183_v63 }
  0x92 PF: > { %p5142_p5 = scmp.ge.s32.totalorder %s5569_s14, 1  ;;  %p1199_p6 = scmp.lt.s32.totalorder %s5569_s14, 3 }
  0x94   : > { %p1200_p7 = pnand %p5142_p5, %p1199_p6 }
  0x96   : > { %1203 = sbr.rel (%p1200_p7) target bundleno = 1070 (0x42e), region = 66 }
  0x9d   : > { %s1206_s27 = sand.u32 1, %s5561_s12   ;;  %s5144_s28 = sshll.u32 %s5609_s15, 7 }
  0x9e   : > { %s5143_s29 = sshll.u32 %s1206_s27, 11  ;;  %p1232_p8 = scmp.lt.s32.totalorder %s5144_s28, 255 }
  0x9f   : > { %s6154_s7 = scalar_lea.vmem [#allocation2], %s5143_s29  ;;  %p5147_p9 = scmp.ne.s32.totalorder %s5609_s15, 0 }
  0xa0   : > { %s7715_s28 = smov (!%p1232_p8, %s5144_s28), 255  ;;  %v1244_v0 = vlaneseq (!%p5147_p9)  ;;  %v1242_v2 = vld [vmem:[%s7683_s2] sm:$0x3] (!%p5147_p9) }
  0xa1   : > { %s5282_s30 = sshll.u32 %s7715_s28, 3  ;;  %1241 = sbr.rel (%p5147_p9) target bundleno = 171 (0xab), region = 74 }
  0xa2   : > { %s6152_s6 = scalar_lea.vmem %s7682_s1, %s5282_s30  ;;  %v1245_v1 = vshrl.u32 (!%p5147_p9), %v1244_v0, 7 }
  0xa4   : > { %v1246_v3 = vsub.s32 (!%p5147_p9), 0, %v1245_v1  ;;  %v1250_v4 = vsub.s32 (!%p5147_p9), 1, %v1245_v1 }
  0xa6   : > { %v1247_v5 = vrot.slane (!%p5147_p9), %v1242_v2, %v1246_v3  ;;  %v1251_v6 = vrot.slane (!%p5147_p9), %v1242_v2, %v1250_v4 }
  0xa8   : > { %v1258_v7 = vcombine.low %v1247_v5, %v1251_v6 }
  0xaa   : > { %5148 = vst.sshfl [vmem:[#allocation3] sm:$0x33 pattern:$0x76325410] %v1258_v7 }
  0xab PF: > { %v1270_v8 = vld [vmem:[%s6154_s7 + $0x10] sm:$0xff]  ;;  %vm1524_vm0 = vcmask 523264   ;;  %v1268_v9 = vld [vmem:[%s6154_s7] sm:$0xff]  ;;  %v1271_v10 = vld [vmem:[%s6154_s7 + $0x18] sm:$0xff]  ;;  %vm2945_vm1 = vcmask 130112   ;;  %vm2952_vm2 = vcmask 195712  }
  0xac   : > { %v1531_v11 = vsel %vm1524_vm0, %v1270_v8, 0.0  ;;  %v1525_v12 = vsel %vm1524_vm0, %v1268_v9, 0.0  ;;  %v1269_v13 = vld [vmem:[%s6154_s7 + $0x8] sm:$0xff]  ;;  %v1534_v14 = vsel %vm1524_vm0, %v1271_v10, 0.0  ;;  %v1272_v17 = vld [vmem:[%s6154_s7 + $0x20] sm:$0xff]  ;;  %v1275_v20 = vld [vmem:[%s6154_s7 + $0x38] sm:$0xff] }
  0xad   : > { %1532 = vadd.xlane.f32.xlu1 %v1531_v11  ;;  %1526 = vadd.xlane.f32.xlu0 %v1525_v12  ;;  %v1528_v15 = vsel %vm1524_vm0, %v1269_v13, 0.0  ;;  %v1273_v16 = vld [vmem:[%s6154_s7 + $0x28] sm:$0xff]  ;;  %v1537_v19 = vsel %vm1524_vm0, %v1272_v17, 0.0  ;;  %v1274_v21 = vld [vmem:[%s6154_s7 + $0x30] sm:$0xff]  ;;  %v1546_v22 = vsel %vm1524_vm0, %v1275_v20, 0.0  ;;  %v1276_v25 = vld [vmem:[%s6154_s7 + $0x40] sm:$0xff] }
  0xae   : > { %v1540_v18 = vsel %vm1524_vm0, %v1273_v16, 0.0  ;;  %v1543_v23 = vsel %vm1524_vm0, %v1274_v21, 0.0  ;;  %v1277_v24 = vld [vmem:[%s6154_s7 + $0x48] sm:$0xff]  ;;  %v1549_v27 = vsel %vm1524_vm0, %v1276_v25, 0.0  ;;  %v1279_v28 = vld [vmem:[%s6154_s7 + $0x58] sm:$0xff]  ;;  %v1278_v29 = vld [vmem:[%s6154_s7 + $0x50] sm:$0xff] }
  0xaf   : > { %v1552_v26 = vsel %vm1524_vm0, %v1277_v24, 0.0  ;;  %v1558_v30 = vsel %vm1524_vm0, %v1279_v28, 0.0  ;;  %v1555_v31 = vsel %vm1524_vm0, %v1278_v29, 0.0  ;;  %v1281_v32 = vld [vmem:[%s6154_s7 + $0x68] sm:$0xff]  ;;  %v1280_v33 = vld [vmem:[%s6154_s7 + $0x60] sm:$0xff]  ;;  %v1283_v36 = vld [vmem:[%s6154_s7 + $0x78] sm:$0xff] }
  0xb0   : > { %v1564_v34 = vsel %vm1524_vm0, %v1281_v32, 0.0  ;;  %v1561_v35 = vsel %vm1524_vm0, %v1280_v33, 0.0  ;;  %v1282_v37 = vld [vmem:[%s6154_s7 + $0x70] sm:$0xff]  ;;  %v1285_v38 = vld [vmem:[%s6154_s7 + $0x88] sm:$0xff]  ;;  %v1284_v39 = vld [vmem:[%s6154_s7 + $0x80] sm:$0xff]  ;;  %v1570_v40 = vsel %vm1524_vm0, %v1283_v36, 0.0 }
  0xb1   : > { %1535 = vadd.xlane.f32.xlu1 %v1534_v14  ;;  %1529 = vadd.xlane.f32.xlu0 %v1528_v15  ;;  %v1567_v41 = vsel %vm1524_vm0, %v1282_v37, 0.0  ;;  %v1287_v42 = vld [vmem:[%s6154_s7 + $0x98] sm:$0xff]  ;;  %v1286_v43 = vld [vmem:[%s6154_s7 + $0x90] sm:$0xff]  ;;  %v1576_v44 = vsel %vm1524_vm0, %v1285_v38, 0.0  ;;  %v1573_v45 = vsel %vm1524_vm0, %v1284_v39, 0.0  ;;  %v1289_v46 = vld [vmem:[%s6154_s7 + $0xa8] sm:$0xff] }
  0xb2   : > { %v1288_v47 = vld [vmem:[%s6154_s7 + $0xa0] sm:$0xff]  ;;  %v1582_v48 = vsel %vm1524_vm0, %v1287_v42, 0.0  ;;  %v1579_v49 = vsel %vm1524_vm0, %v1286_v43, 0.0  ;;  %v1291_v50 = vld [vmem:[%s6154_s7 + $0xb8] sm:$0xff]  ;;  %v1290_v51 = vld [vmem:[%s6154_s7 + $0xb0] sm:$0xff]  ;;  %v1588_v52 = vsel %vm1524_vm0, %v1289_v46, 0.0 }
  0xb3   : > { %v1585_v53 = vsel %vm1524_vm0, %v1288_v47, 0.0  ;;  %v1293_v54 = vld [vmem:[%s6154_s7 + $0xc8] sm:$0xff]  ;;  %v1292_v55 = vld [vmem:[%s6154_s7 + $0xc0] sm:$0xff]  ;;  %v1594_v56 = vsel %vm1524_vm0, %v1291_v50, 0.0  ;;  %v1591_v57 = vsel %vm1524_vm0, %v1290_v51, 0.0  ;;  %v1295_v58 = vld [vmem:[%s6154_s7 + $0xd8] sm:$0xff] }
  0xb4   : > { %v1294_v59 = vld [vmem:[%s6154_s7 + $0xd0] sm:$0xff]  ;;  %v1600_v60 = vsel %vm1524_vm0, %v1293_v54, 0.0  ;;  %v1597_v61 = vsel %vm1524_vm0, %v1292_v55, 0.0  ;;  %v1297_v62 = vld [vmem:[%s6154_s7 + $0xe8] sm:$0xff]  ;;  %v1296_v63 = vld [vmem:[%s6154_s7 + $0xe0] sm:$0xff]  ;;  %v1606_v0 = vsel %vm1524_vm0, %v1295_v58, 0.0 }
  0xb5   : > { %1541 = vadd.xlane.f32.xlu1 %v1540_v18  ;;  %1538 = vadd.xlane.f32.xlu0 %v1537_v19  ;;  %v1603_v1 = vsel %vm1524_vm0, %v1294_v59, 0.0  ;;  %v1299_v2 = vld [vmem:[%s6154_s7 + $0xf8] sm:$0xff]  ;;  %v1298_v3 = vld [vmem:[%s6154_s7 + $0xf0] sm:$0xff]  ;;  %v1612_v4 = vsel %vm1524_vm0, %v1297_v62, 0.0  ;;  %v1609_v5 = vsel %vm1524_vm0, %v1296_v63, 0.0  ;;  %v1301_v6 = vld [vmem:[%s6154_s7 + $0x108] sm:$0xff] }
  0xb6   : > { %v1300_v7 = vld [vmem:[%s6154_s7 + $0x100] sm:$0xff]  ;;  %v1618_v8 = vsel %vm1524_vm0, %v1299_v2, 0.0  ;;  %v1615_v9 = vsel %vm1524_vm0, %v1298_v3, 0.0  ;;  %v1303_v10 = vld [vmem:[%s6154_s7 + $0x118] sm:$0xff]  ;;  %v1302_v11 = vld [vmem:[%s6154_s7 + $0x110] sm:$0xff]  ;;  %v1624_v12 = vsel %vm1524_vm0, %v1301_v6, 0.0 }
  0xb7   : > { %v1621_v13 = vsel %vm1524_vm0, %v1300_v7, 0.0  ;;  %v1305_v14 = vld [vmem:[%s6154_s7 + $0x128] sm:$0xff]  ;;  %v1304_v15 = vld [vmem:[%s6154_s7 + $0x120] sm:$0xff]  ;;  %v1630_v16 = vsel %vm1524_vm0, %v1303_v10, 0.0  ;;  %v1627_v17 = vsel %vm1524_vm0, %v1302_v11, 0.0  ;;  %v1307_v18 = vld [vmem:[%s6154_s7 + $0x138] sm:$0xff] }
  0xb8   : > { %v1306_v19 = vld [vmem:[%s6154_s7 + $0x130] sm:$0xff]  ;;  %v1636_v20 = vsel %vm1524_vm0, %v1305_v14, 0.0  ;;  %v1633_v21 = vsel %vm1524_vm0, %v1304_v15, 0.0  ;;  %v1642_v24 = vsel %vm1524_vm0, %v1307_v18, 0.0  ;;  %v1311_v28 = vld [vmem:[%s6154_s7 + $0x158] sm:$0xff]  ;;  %v1313_v32 = vld [vmem:[%s6154_s7 + $0x168] sm:$0xff] }
  0xb9   : > { %1547 = vadd.xlane.f32.xlu1 %v1546_v22  ;;  %1544 = vadd.xlane.f32.xlu0 %v1543_v23  ;;  %v1309_v22 = vld [vmem:[%s6154_s7 + $0x148] sm:$0xff]  ;;  %v1308_v23 = vld [vmem:[%s6154_s7 + $0x140] sm:$0xff]  ;;  %v1639_v25 = vsel %vm1524_vm0, %v1306_v19, 0.0  ;;  %v1310_v29 = vld [vmem:[%s6154_s7 + $0x150] sm:$0xff]  ;;  %vm2959_vm3 = vcmask 261312   ;;  %vm2966_vm4 = vcmask 326912  }
  0xba   : > { %v1312_v33 = vld [vmem:[%s6154_s7 + $0x160] sm:$0xff]  ;;  %v1315_v36 = vld [vmem:[%s6154_s7 + $0x178] sm:$0xff]  ;;  %v1314_v37 = vld [vmem:[%s6154_s7 + $0x170] sm:$0xff]  ;;  %vm2973_vm5 = vcmask 392512   ;;  %vm2980_vm6 = vcmask 458112   ;;  %vm2987_vm7 = vcmask 523712  }
  0xbb   : > { %v1666_v38 = vsel %vm1524_vm0, %v1315_v36, 0.0  ;;  %v1663_v39 = vsel %vm1524_vm0, %v1314_v37, 0.0  ;;  %v1396_v36 = vld [vmem:[%s6154_s7 + $0x400] sm:$0xff]  ;;  %vm2994_vm8 = vcmask 589312   ;;  %vm7692_vm9 = vcmask 654912   ;;  %s5572_s10 = smov [#allocation3]  }
  0xbc   : > { %vm3008_vm10 = vcmask 720512   ;;  %vm3015_vm11 = vcmask 786112   ;;  %vm3022_vm12 = vcmask 851712   ;;  %vm3029_vm13 = vcmask 917312   ;;  %s5079_s11 = sshll.u32 %s5572_s10, 4  ;;  %p5297_p10 = scmp.eq.s32.totalorder %s5609_s15, 1  ;;  %s5080_s11 = int_to_ptr.vmem [resolvable:$true] %s5079_s11 }
  0xbd   : > { %1553 = vadd.xlane.f32.xlu1 %v1552_v26  ;;  %1550 = vadd.xlane.f32.xlu0 %v1549_v27  ;;  %v1648_v26 = vsel %vm1524_vm0, %v1309_v22, 0.0  ;;  %v1645_v27 = vsel %vm1524_vm0, %v1308_v23, 0.0  ;;  %v2934_v22 = vlaneseq  ;;  %vm3036_vm14 = vcmask 982912   ;;  %s5517_s12 = scalar_lea.vmem %s5080_s11, 64  ;;  %p5524_p0 = scmp.lt.s32.totalorder %s5080_s11, %s5080_s11 }
  0xbe   : > { %vm3043_vm15 = vcmask 1048512   ;;  %p5518_p11 = scmp.ne.s32.totalorder %s5080_s11, %s5517_s12  ;;  %p5525_p1 = scmp.lt.s32.totalorder %s5517_s12, %s5517_s12 }
  0xc0   : > { %p5519_p12 = pnand %p5518_p11, %p5297_p10  ;;  %p5526_p2 = por %p5525_p1, %p5524_p0 }
  0xc1   : > { %1559 = vadd.xlane.f32.xlu1 %v1558_v30  ;;  %1556 = vadd.xlane.f32.xlu0 %v1555_v31  ;;  %v1654_v30 = vsel %vm1524_vm0, %v1311_v28, 0.0  ;;  %v1651_v31 = vsel %vm1524_vm0, %v1310_v29, 0.0  ;;  %v6308_v28 = vshrl.u32 %v2934_v22, 7 }
  0xc2   : > { %p5520_p13 = pneg %p5519_p12 }
  0xc3   : > { %7693 = vst [vmem:[#allocation6_spill] sm:$0xff] %v6308_v28 }
  0xc4   : > { %p5527_p3 = pnand %p5526_p2, %p5520_p13 }
  0xc5   : > { %1565 = vadd.xlane.f32.xlu1 %v1564_v34  ;;  %1562 = vadd.xlane.f32.xlu0 %v1561_v35  ;;  %v1660_v34 = vsel %vm1524_vm0, %v1313_v32, 0.0  ;;  %v1657_v35 = vsel %vm1524_vm0, %v1312_v33, 0.0 }
  0xc9   : > { %1571 = vadd.xlane.f32.xlu1 %v1570_v40  ;;  %1568 = vadd.xlane.f32.xlu0 %v1567_v41  ;;  %v1317_v40 = vld [vmem:[%s6154_s7 + $0x188] sm:$0xff]  ;;  %v1316_v41 = vld [vmem:[%s6154_s7 + $0x180] sm:$0xff] }
  0xca   : > { %v1672_v42 = vsel %vm1524_vm0, %v1317_v40, 0.0  ;;  %v1669_v43 = vsel %vm1524_vm0, %v1316_v41, 0.0 }
  0xcd   : > { %1577 = vadd.xlane.f32.xlu1 %v1576_v44  ;;  %1574 = vadd.xlane.f32.xlu0 %v1573_v45  ;;  %v1319_v44 = vld [vmem:[%s6154_s7 + $0x198] sm:$0xff]  ;;  %v1318_v45 = vld [vmem:[%s6154_s7 + $0x190] sm:$0xff] }
  0xce   : > { %v1678_v46 = vsel %vm1524_vm0, %v1319_v44, 0.0  ;;  %v1675_v47 = vsel %vm1524_vm0, %v1318_v45, 0.0 }
  0xd1   : > { %1583 = vadd.xlane.f32.xlu1 %v1582_v48  ;;  %1580 = vadd.xlane.f32.xlu0 %v1579_v49  ;;  %v1321_v48 = vld [vmem:[%s6154_s7 + $0x1a8] sm:$0xff]  ;;  %v1320_v49 = vld [vmem:[%s6154_s7 + $0x1a0] sm:$0xff] }
  0xd2   : > { %v1684_v50 = vsel %vm1524_vm0, %v1321_v48, 0.0  ;;  %v1681_v51 = vsel %vm1524_vm0, %v1320_v49, 0.0  ;;  %v1415_v48 = vld [vmem:[%s6154_s7 + $0x498] sm:$0xff]  ;;  %v1414_v49 = vld [vmem:[%s6154_s7 + $0x490] sm:$0xff] }
  0xd5   : > { %1589 = vadd.xlane.f32.xlu1 %v1588_v52  ;;  %1586 = vadd.xlane.f32.xlu0 %v1585_v53  ;;  %v1323_v52 = vld [vmem:[%s6154_s7 + $0x1b8] sm:$0xff]  ;;  %v1322_v53 = vld [vmem:[%s6154_s7 + $0x1b0] sm:$0xff] }
  0xd6   : > { %v1690_v54 = vsel %vm1524_vm0, %v1323_v52, 0.0  ;;  %v1687_v55 = vsel %vm1524_vm0, %v1322_v53, 0.0 }
  0xd9   : > { %1595 = vadd.xlane.f32.xlu1 %v1594_v56  ;;  %1592 = vadd.xlane.f32.xlu0 %v1591_v57  ;;  %v1325_v56 = vld [vmem:[%s6154_s7 + $0x1c8] sm:$0xff]  ;;  %v1324_v57 = vld [vmem:[%s6154_s7 + $0x1c0] sm:$0xff] }
  0xda   : > { %v1696_v58 = vsel %vm1524_vm0, %v1325_v56, 0.0  ;;  %v1693_v59 = vsel %vm1524_vm0, %v1324_v57, 0.0  ;;  %v1461_v57 = vld [vmem:[%s6154_s7 + $0x608] sm:$0xff] }
  0xdd   : > { %1601 = vadd.xlane.f32.xlu1 %v1600_v60  ;;  %1598 = vadd.xlane.f32.xlu0 %v1597_v61  ;;  %v1327_v60 = vld [vmem:[%s6154_s7 + $0x1d8] sm:$0xff]  ;;  %v1326_v61 = vld [vmem:[%s6154_s7 + $0x1d0] sm:$0xff] }
  0xde   : > { %v1702_v62 = vsel %vm1524_vm0, %v1327_v60, 0.0  ;;  %v1699_v63 = vsel %vm1524_vm0, %v1326_v61, 0.0 }
  0xe1   : > { %1607 = vadd.xlane.f32.xlu1 %v1606_v0  ;;  %1604 = vadd.xlane.f32.xlu0 %v1603_v1  ;;  %v1329_v0 = vld [vmem:[%s6154_s7 + $0x1e8] sm:$0xff]  ;;  %v1328_v1 = vld [vmem:[%s6154_s7 + $0x1e0] sm:$0xff] }
  0xe2   : > { %v1708_v2 = vsel %vm1524_vm0, %v1329_v0, 0.0  ;;  %v1705_v3 = vsel %vm1524_vm0, %v1328_v1, 0.0 }
  0xe5   : > { %1613 = vadd.xlane.f32.xlu1 %v1612_v4  ;;  %1610 = vadd.xlane.f32.xlu0 %v1609_v5  ;;  %v1331_v4 = vld [vmem:[%s6154_s7 + $0x1f8] sm:$0xff]  ;;  %v1330_v5 = vld [vmem:[%s6154_s7 + $0x1f0] sm:$0xff] }
  0xe6   : > { %v1714_v6 = vsel %vm1524_vm0, %v1331_v4, 0.0  ;;  %v1711_v7 = vsel %vm1524_vm0, %v1330_v5, 0.0 }
  0xe9   : > { %1619 = vadd.xlane.f32.xlu1 %v1618_v8  ;;  %1616 = vadd.xlane.f32.xlu0 %v1615_v9  ;;  %v1348_v8 = vld [vmem:[%s6154_s7 + $0x280] sm:$0xff] }
  0xea   : > { %v1332_v9 = vld [vmem:[%s6154_s7 + $0x200] sm:$0xff]  ;;  %v1765_v10 = vsel %vm1524_vm0, %v1348_v8, 0.0 }
  0xeb   : > { %v1717_v11 = vsel %vm1524_vm0, %v1332_v9, 0.0 }
  0xed   : > { %1625 = vadd.xlane.f32.xlu1 %v1624_v12  ;;  %1622 = vadd.xlane.f32.xlu0 %v1621_v13  ;;  %v1412_v12 = vld [vmem:[%s6154_s7 + $0x480] sm:$0xff]  ;;  %v1349_v13 = vld [vmem:[%s6154_s7 + $0x288] sm:$0xff] }
  0xee   : > { %v1957_v14 = vsel %vm1524_vm0, %v1412_v12, 0.0  ;;  %v1768_v15 = vsel %vm1524_vm0, %v1349_v13, 0.0  ;;  %v1479_v12 = vld [vmem:[%s6154_s7 + $0x698] sm:$0xff] }
  0xf1   : > { %1631 = vadd.xlane.f32.xlu1 %v1630_v16  ;;  %1628 = vadd.xlane.f32.xlu0 %v1627_v17  ;;  %v1476_v16 = vld [vmem:[%s6154_s7 + $0x680] sm:$0xff]  ;;  %v1413_v17 = vld [vmem:[%s6154_s7 + $0x488] sm:$0xff] }
  0xf2   : > { %v2149_v18 = vsel %vm1524_vm0, %v1476_v16, 0.0  ;;  %v1960_v19 = vsel %vm1524_vm0, %v1413_v17, 0.0 }
  0xf5   : > { %1637 = vadd.xlane.f32.xlu1 %v1636_v20  ;;  %1634 = vadd.xlane.f32.xlu0 %v1633_v21  ;;  %v1333_v20 = vld [vmem:[%s6154_s7 + $0x208] sm:$0xff] }
  0xf6   : > { %v1477_v21 = vld [vmem:[%s6154_s7 + $0x688] sm:$0xff]  ;;  %v1720_v23 = vsel %vm1524_vm0, %v1333_v20, 0.0 }
  0xf9   : > { %1643 = vadd.xlane.f32.xlu1 %v1642_v24  ;;  %1640 = vadd.xlane.f32.xlu0 %v1639_v25  ;;  %v2152_v24 = vsel %vm1524_vm0, %v1477_v21, 0.0  ;;  %v1351_v25 = vld [vmem:[%s6154_s7 + $0x298] sm:$0xff] }
  0xfd   : > { %1649 = vadd.xlane.f32.xlu1 %v1648_v26  ;;  %1646 = vadd.xlane.f32.xlu0 %v1645_v27  ;;  %v1350_v26 = vld [vmem:[%s6154_s7 + $0x290] sm:$0xff]  ;;  %v6306_v27 = vand.u32 127, %v2934_v22 }
  0xfe   : > { %v1771_v32 = vsel %vm1524_vm0, %v1350_v26, 0.0 }
  0xff   : > { %v2947_v33 = vadd.s32 4294967280, %v6306_v27  ;;  %v2954_v37 = vadd.s32 4294967272, %v6306_v27  ;;  %v2975_v52 = vadd.s32 4294967248, %v6306_v27 }
 0x101   : > { %1655 = vadd.xlane.f32.xlu1 %v1654_v30  ;;  %1652 = vadd.xlane.f32.xlu0 %v1651_v31  ;;  %v1774_v31 = vsel %vm1524_vm0, %v1351_v25, 0.0  ;;  %v6325_v44 = vsub.s32 %v2947_v33, %v6308_v28  ;;  %v2158_v25 = vsel %vm1524_vm0, %v1479_v12, 0.0 }
 0x105   : > { %1661 = vadd.xlane.f32.xlu1 %v1660_v34  ;;  %1658 = vadd.xlane.f32.xlu0 %v1657_v35  ;;  %v2940_v34 = vadd.s32 4294967288, %v6306_v27  ;;  %v1397_v35 = vld [vmem:[%s6154_s7 + $0x408] sm:$0xff] }
 0x106   : > { %v1912_v41 = vsel %vm1524_vm0, %v1397_v35, 0.0 }
 0x109   : > { %1667 = vadd.xlane.f32.xlu1 %v1666_v38  ;;  %1664 = vadd.xlane.f32.xlu0 %v1663_v39  ;;  %v6319_v38 = vsub.s32 %v6306_v27, %v6308_v28 }
 0x10d   : > { %1673 = vadd.xlane.f32.xlu1 %v1672_v42  ;;  %1670 = vadd.xlane.f32.xlu0 %v1669_v43  ;;  %v1909_v42 = vsel %vm1524_vm0, %v1396_v36, 0.0  ;;  %v2961_v43 = vadd.s32 4294967264, %v6306_v27 }
 0x10f   : > { %v6340_v60 = vsub.s32 %v2961_v43, %v6308_v28 }
 0x111   : > { %1679 = vadd.xlane.f32.xlu1 %v1678_v46  ;;  %1676 = vadd.xlane.f32.xlu0 %v1675_v47  ;;  %v6328_v46 = vsub.s32 %v2940_v34, %v6308_v28 }
 0x115   : > { %1685 = vadd.xlane.f32.xlu1 %v1684_v50  ;;  %1682 = vadd.xlane.f32.xlu0 %v1681_v51  ;;  %v6333_v50 = vsub.s32 %v2954_v37, %v6308_v28  ;;  %v2968_v51 = vadd.s32 4294967256, %v6306_v27  ;;  %v3003_v37 = vadd.s32 4294967216, %v6306_v27 }
 0x117   : > { %v6349_v4 = vsub.s32 %v2968_v51, %v6308_v28 }
 0x119   : > { %1691 = vadd.xlane.f32.xlu1 %v1690_v54  ;;  %1688 = vadd.xlane.f32.xlu0 %v1687_v55 }
 0x11d   : > { %1697 = vadd.xlane.f32.xlu1 %v1696_v58  ;;  %1694 = vadd.xlane.f32.xlu0 %v1693_v59  ;;  %v1460_v58 = vld [vmem:[%s6154_s7 + $0x600] sm:$0xff] }
 0x121   : > { %1703 = vadd.xlane.f32.xlu1 %v1702_v62  ;;  %1700 = vadd.xlane.f32.xlu0 %v1699_v63  ;;  %v1966_v62 = vsel %vm1524_vm0, %v1415_v48, 0.0  ;;  %v1963_v63 = vsel %vm1524_vm0, %v1414_v49, 0.0 }
 0x125   : > { %1709 = vadd.xlane.f32.xlu1 %v1708_v2  ;;  %1706 = vadd.xlane.f32.xlu0 %v1705_v3  ;;  %v2982_v3 = vadd.s32 4294967240, %v6306_v27 }
 0x127   : > { %v6365_v21 = vsub.s32 %v2982_v3, %v6308_v28 }
 0x129   : > { %1715 = vadd.xlane.f32.xlu1 %v1714_v6  ;;  %1712 = vadd.xlane.f32.xlu0 %v1711_v7  ;;  %v2104_v6 = vsel %vm1524_vm0, %v1461_v57, 0.0  ;;  %v2101_v7 = vsel %vm1524_vm0, %v1460_v58, 0.0  ;;  %7694 = vst [vmem:[#allocation7_spill] sm:$0xff] %v6365_v21  ;;  %v3017_v58 = vadd.s32 4294967200, %v6306_v27 }
 0x12d   : > { %1766 = vadd.xlane.f32.xlu1 %v1765_v10  ;;  %1718 = vadd.xlane.f32.xlu0 %v1717_v11  ;;  %v6356_v10 = vsub.s32 %v2975_v52, %v6308_v28  ;;  %v2989_v11 = vadd.s32 4294967232, %v6306_v27 }
 0x131   : > { %1958 = vadd.xlane.f32.xlu1 %v1957_v14  ;;  %1769 = vadd.xlane.f32.xlu0 %v1768_v15 }
 0x135   : > { %2150 = vadd.xlane.f32.xlu1 %v2149_v18  ;;  %1961 = vadd.xlane.f32.xlu0 %v1960_v19  ;;  %v2996_v18 = vadd.s32 4294967224, %v6306_v27  ;;  %v1478_v19 = vld [vmem:[%s6154_s7 + $0x690] sm:$0xff] }
 0x137   : > { %v6377_v35 = vsub.s32 %v2996_v18, %v6308_v28  ;;  %v3038_v18 = vadd.s32 4294967176, %v6306_v27 }
 0x139   : > { %1721 = vadd.xlane.f32.xlu1 %v1720_v23  ;;  %2153 = vadd.xlane.f32.xlu0 %v2152_v24  ;;  %7696 = vst [vmem:[#allocation9_spill] sm:$0xff] %v6377_v35 }
 0x13a   : > { %v1533_v29 = vpop.xlane.xlu1 %1532  ;;  %v1527_v30 = vpop.xlane.xlu0 %1526 }
 0x13d   : > { %1775 = vadd.xlane.f32.xlu1 %v1774_v31  ;;  %1772 = vadd.xlane.f32.xlu0 %v1771_v32  ;;  %v2155_v31 = vsel %vm1524_vm0, %v1478_v19, 0.0  ;;  %v1335_v32 = vld [vmem:[%s6154_s7 + $0x218] sm:$0xff] }
 0x13e   : > { %v1536_v39 = vpop.xlane.xlu1 %1535  ;;  %v1530_v40 = vpop.xlane.xlu0 %1529  ;;  %v1463_v19 = vld [vmem:[%s6154_s7 + $0x618] sm:$0xff] }
 0x13f   : > { %v2295_v45 = vpack.c.bf16 %v1536_v39, %v1533_v29  ;;  %v2294_v47 = vpack.c.bf16 %v1530_v40, %v1527_v30  ;;  %v6371_v30 = vsub.s32 %v2989_v11, %v6308_v28  ;;  %v3010_v39 = vadd.s32 4294967208, %v6306_v27  ;;  %v1334_v40 = vld [vmem:[%s6154_s7 + $0x210] sm:$0xff] }
 0x140   : > { %v1723_v52 = vsel %vm1524_vm0, %v1334_v40, 0.0  ;;  %v6406_v11 = vsub.s32 %v3017_v58, %v6308_v28  ;;  %v1352_v40 = vld [vmem:[%s6154_s7 + $0x2a0] sm:$0xff] }
 0x141   : > { %v2680_v53 = vunpack.c.l.b16 %v2295_v45  ;;  %v2681_v54 = vunpack.c.h.b16 %v2295_v45  ;;  %v2678_v55 = vunpack.c.l.b16 %v2294_v47  ;;  %v2679_v56 = vunpack.c.h.b16 %v2294_v47  ;;  %1913 = vadd.xlane.f32.xlu1 %v1912_v41  ;;  %1910 = vadd.xlane.f32.xlu0 %v1909_v42  ;;  %7695 = vst [vmem:[#allocation8_spill] sm:$0xff] %v6371_v30 }
 0x142   : > { %v1542_v59 = vpop.xlane.xlu1 %1541  ;;  %v1539_v61 = vpop.xlane.xlu0 %1538  ;;  %v1726_v47 = vsel %vm1524_vm0, %v1335_v32, 0.0 }
 0x143   : > { %v2951_v0 = vrot.slane %v2680_v53, %v6325_v44  ;;  %v2939_v1 = vrot.slane %v2678_v55, %v6319_v38  ;;  %v2944_v2 = vrot.slane %v2679_v56, %v6328_v46  ;;  %v2296_v5 = vpack.c.bf16 %v1542_v59, %v1539_v61  ;;  %v1399_v53 = vld [vmem:[%s6154_s7 + $0x418] sm:$0xff]  ;;  %v1398_v61 = vld [vmem:[%s6154_s7 + $0x410] sm:$0xff] }
 0x144   : > { %v2958_v8 = vrot.slane %v2681_v54, %v6333_v50  ;;  %v6391_v56 = vsub.s32 %v3003_v37, %v6308_v28  ;;  %v3024_v59 = vadd.s32 4294967192, %v6306_v27 }
 0x145   : > { %v2946_v9 = vsel %vm2945_vm1, %v2944_v2, %v2939_v1  ;;  %1967 = vadd.xlane.f32.xlu1 %v1966_v62  ;;  %1964 = vadd.xlane.f32.xlu0 %v1963_v63  ;;  %v2682_v14 = vunpack.c.l.b16 %v2296_v5  ;;  %v2683_v15 = vunpack.c.h.b16 %v2296_v5  ;;  %v1918_v2 = vsel %vm1524_vm0, %v1399_v53, 0.0 }
 0x146   : > { %v2953_v13 = vsel %vm2952_vm2, %v2951_v0, %v2946_v9  ;;  %v1548_v16 = vpop.xlane.xlu1 %1547  ;;  %v1545_v17 = vpop.xlane.xlu0 %1544  ;;  %v6399_v0 = vsub.s32 %v3010_v39, %v6308_v28  ;;  %v6409_v12 = vsub.s32 %v3024_v59, %v6308_v28  ;;  %v1353_v39 = vld [vmem:[%s6154_s7 + $0x2a8] sm:$0xff] }
 0x147   : > { %v2960_v20 = vsel %vm2959_vm3, %v2958_v8, %v2953_v13  ;;  %v2297_v22 = vpack.c.bf16 %v1548_v16, %v1545_v17  ;;  %v2965_v23 = vrot.slane %v2682_v14, %v6340_v60  ;;  %v2972_v24 = vrot.slane %v2683_v15, %v6349_v4 }
 0x148   : > { %v3031_v14 = vadd.s32 4294967184, %v6306_v27  ;;  %v2110_v27 = vsel %vm1524_vm0, %v1463_v19, 0.0 }
 0x149   : > { %v2684_v26 = vunpack.c.l.b16 %v2297_v22  ;;  %v2685_v29 = vunpack.c.h.b16 %v2297_v22  ;;  %2105 = vadd.xlane.f32.xlu1 %v2104_v6  ;;  %2102 = vadd.xlane.f32.xlu0 %v2101_v7  ;;  %v2967_v33 = vsel %vm2966_vm4, %v2965_v23, %v2960_v20  ;;  %v1915_v7 = vsel %vm1524_vm0, %v1398_v61, 0.0  ;;  %v1462_v20 = vld [vmem:[%s6154_s7 + $0x610] sm:$0xff] }
 0x14a   : > { %v1554_v34 = vpop.xlane.xlu1 %1553  ;;  %v1551_v36 = vpop.xlane.xlu0 %1550  ;;  %v2974_v41 = vsel %vm2973_vm5, %v2972_v24, %v2967_v33  ;;  %v2107_v32 = vsel %vm1524_vm0, %v1462_v20, 0.0 }
 0x14b   : > { %v2979_v42 = vrot.slane %v2684_v26, %v6356_v10  ;;  %v2986_v43 = vrot.slane %v2685_v29, %v6365_v21  ;;  %v2298_v45 = vpack.c.bf16 %v1554_v34, %v1551_v36  ;;  %v6420_v29 = vsub.s32 %v3031_v14, %v6308_v28 }
 0x14c   : > { %v6427_v36 = vsub.s32 %v3038_v18, %v6308_v28  ;;  %v1519_v28 = vld [vmem:[%s6154_s7 + $0x7d8] sm:$0xff] }
 0x14d   : > { %v2981_v48 = vsel %vm2980_vm6, %v2979_v42, %v2974_v41  ;;  %v2686_v49 = vunpack.c.l.b16 %v2298_v45  ;;  %v2687_v51 = vunpack.c.h.b16 %v2298_v45  ;;  %2159 = vadd.xlane.f32.xlu1 %v2158_v25  ;;  %2156 = vadd.xlane.f32.xlu0 %v2155_v31 }
 0x14e   : > { %v2988_v54 = vsel %vm2987_vm7, %v2986_v43, %v2981_v48  ;;  %v1560_v55 = vpop.xlane.xlu1 %1559  ;;  %v1557_v57 = vpop.xlane.xlu0 %1556 }
 0x14f   : > { %v2993_v62 = vrot.slane %v2686_v49, %v6371_v30  ;;  %v3000_v63 = vrot.slane %v2687_v51, %v6377_v35  ;;  %v2299_v1 = vpack.c.bf16 %v1560_v55, %v1557_v57  ;;  %v1780_v49 = vsel %vm1524_vm0, %v1353_v39, 0.0  ;;  %v1417_v55 = vld [vmem:[%s6154_s7 + $0x4a8] sm:$0xff]  ;;  %v1416_v57 = vld [vmem:[%s6154_s7 + $0x4a0] sm:$0xff] }
 0x150   : > { %v1777_v51 = vsel %vm1524_vm0, %v1352_v40, 0.0 }
 0x151   : > { %v2995_v3 = vsel %vm2994_vm8, %v2993_v62, %v2988_v54  ;;  %v2688_v5 = vunpack.c.l.b16 %v2299_v1  ;;  %v2689_v6 = vunpack.c.h.b16 %v2299_v1  ;;  %1727 = vadd.xlane.f32.xlu1 %v1726_v47  ;;  %1724 = vadd.xlane.f32.xlu0 %v1723_v52  ;;  %v1969_v1 = vsel %vm1524_vm0, %v1416_v57, 0.0 }
 0x152   : > { %v3002_v8 = vsel %vm7692_vm9, %v3000_v63, %v2995_v3  ;;  %v1566_v9 = vpop.xlane.xlu1 %1565  ;;  %v1563_v13 = vpop.xlane.xlu0 %1562  ;;  %v1972_v63 = vsel %vm1524_vm0, %v1417_v55, 0.0 }
 0x153   : > { %v3007_v15 = vrot.slane %v2688_v5, %v6391_v56  ;;  %v3014_v16 = vrot.slane %v2689_v6, %v6399_v0  ;;  %v2300_v17 = vpack.c.bf16 %v1566_v9, %v1563_v13  ;;  %v1481_v5 = vld [vmem:[%s6154_s7 + $0x6a8] sm:$0xff]  ;;  %v1480_v6 = vld [vmem:[%s6154_s7 + $0x6a0] sm:$0xff] }
 0x154   : > { %v2161_v18 = vsel %vm1524_vm0, %v1480_v6, 0.0 }
 0x155   : > { %v3009_v22 = vsel %vm3008_vm10, %v3007_v15, %v3002_v8  ;;  %v2690_v23 = vunpack.c.l.b16 %v2300_v17  ;;  %v2691_v24 = vunpack.c.h.b16 %v2300_v17  ;;  %1919 = vadd.xlane.f32.xlu1 %v1918_v2  ;;  %1916 = vadd.xlane.f32.xlu0 %v1915_v7  ;;  %v2164_v17 = vsel %vm1524_vm0, %v1481_v5, 0.0 }
 0x156   : > { %v3016_v25 = vsel %vm3015_vm11, %v3014_v16, %v3009_v22  ;;  %v1572_v26 = vpop.xlane.xlu1 %1571  ;;  %v1569_v31 = vpop.xlane.xlu0 %1568 }
 0x157   : > { %v3021_v33 = vrot.slane %v2690_v23, %v6406_v11  ;;  %v3028_v34 = vrot.slane %v2691_v24, %v6409_v12  ;;  %v2301_v37 = vpack.c.bf16 %v1572_v26, %v1569_v31  ;;  %v1337_v23 = vld [vmem:[%s6154_s7 + $0x228] sm:$0xff]  ;;  %v1336_v24 = vld [vmem:[%s6154_s7 + $0x220] sm:$0xff] }
 0x158   : > { %v1729_v39 = vsel %vm1524_vm0, %v1336_v24, 0.0 }
 0x159   : > { %v3023_v41 = vsel %vm3022_vm12, %v3021_v33, %v3016_v25  ;;  %v2692_v42 = vunpack.c.l.b16 %v2301_v37  ;;  %v2693_v43 = vunpack.c.h.b16 %v2301_v37  ;;  %2111 = vadd.xlane.f32.xlu1 %v2110_v27  ;;  %2108 = vadd.xlane.f32.xlu0 %v2107_v32  ;;  %v1732_v37 = vsel %vm1524_vm0, %v1337_v23, 0.0 }
 0x15a   : > { %v3030_v45 = vsel %vm3029_vm13, %v3028_v34, %v3023_v41  ;;  %v1578_v47 = vpop.xlane.xlu1 %1577  ;;  %v1575_v48 = vpop.xlane.xlu0 %1574 }
 0x15b   : > { %v3035_v52 = vrot.slane %v2692_v42, %v6420_v29  ;;  %v3042_v53 = vrot.slane %v2693_v43, %v6427_v36  ;;  %v2302_v54 = vpack.c.bf16 %v1578_v47, %v1575_v48  ;;  %v1401_v43 = vld [vmem:[%s6154_s7 + $0x428] sm:$0xff] }
 0x15d   : > { %v2694_v58 = vunpack.c.l.b16 %v2302_v54  ;;  %v2695_v59 = vunpack.c.h.b16 %v2302_v54  ;;  %1781 = vadd.xlane.f32.xlu1 %v1780_v49  ;;  %1778 = vadd.xlane.f32.xlu0 %v1777_v51  ;;  %v3037_v2 = vsel %vm3036_vm14, %v3035_v52, %v3030_v45  ;;  %v1400_v45 = vld [vmem:[%s6154_s7 + $0x420] sm:$0xff]  ;;  %v1924_v54 = vsel %vm1524_vm0, %v1401_v43, 0.0 }
 0x15e   : > { %v1584_v61 = vpop.xlane.xlu1 %1583  ;;  %v1581_v62 = vpop.xlane.xlu0 %1580  ;;  %v6445_v7 = vsel %vm3043_vm15, %v3042_v53, %v3037_v2  ;;  %v1921_v55 = vsel %vm1524_vm0, %v1400_v45, 0.0 }
 0x15f   : > { %v2303_v3 = vpack.c.bf16 %v1584_v61, %v1581_v62  ;;  %v3048_v8 = vrot.slane %v2694_v58, %v6319_v38  ;;  %v3052_v9 = vrot.slane %v2695_v59, %v6328_v46  ;;  %v1465_v61 = vld [vmem:[%s6154_s7 + $0x628] sm:$0xff]  ;;  %v1464_v62 = vld [vmem:[%s6154_s7 + $0x620] sm:$0xff] }
 0x161   : > { %v2696_v13 = vunpack.c.l.b16 %v2303_v3  ;;  %v2697_v14 = vunpack.c.h.b16 %v2303_v3  ;;  %1973 = vadd.xlane.f32.xlu1 %v1972_v63  ;;  %1970 = vadd.xlane.f32.xlu0 %v1969_v1  ;;  %v3053_v25 = vsel %vm2945_vm1, %v3052_v9, %v3048_v8  ;;  %v2116_v8 = vsel %vm1524_vm0, %v1465_v61, 0.0 }
 0x162   : > { %v1590_v15 = vpop.xlane.xlu1 %1589  ;;  %v1587_v16 = vpop.xlane.xlu0 %1586  ;;  %v2113_v9 = vsel %vm1524_vm0, %v1464_v62, 0.0 }
 0x163   : > { %v3057_v19 = vrot.slane %v2696_v13, %v6325_v44  ;;  %v3062_v20 = vrot.slane %v2697_v14, %v6333_v50  ;;  %v2304_v22 = vpack.c.bf16 %v1590_v15, %v1587_v16  ;;  %v1355_v16 = vld [vmem:[%s6154_s7 + $0x2b8] sm:$0xff] }
 0x165   : > { %v3058_v26 = vsel %vm2952_vm2, %v3057_v19, %v3053_v25  ;;  %v2698_v31 = vunpack.c.l.b16 %v2304_v22  ;;  %v2699_v27 = vunpack.c.h.b16 %v2304_v22  ;;  %2165 = vadd.xlane.f32.xlu1 %v2164_v17  ;;  %2162 = vadd.xlane.f32.xlu0 %v2161_v18  ;;  %v1354_v17 = vld [vmem:[%s6154_s7 + $0x2b0] sm:$0xff]  ;;  %v1786_v25 = vsel %vm1524_vm0, %v1355_v16, 0.0 }
 0x166   : > { %v3063_v32 = vsel %vm2959_vm3, %v3062_v20, %v3058_v26  ;;  %v1596_v33 = vpop.xlane.xlu1 %1595  ;;  %v1593_v34 = vpop.xlane.xlu0 %1592  ;;  %v1783_v26 = vsel %vm1524_vm0, %v1354_v17, 0.0 }
 0x167   : > { %v3067_v40 = vrot.slane %v2698_v31, %v6340_v60  ;;  %v3072_v41 = vrot.slane %v2699_v27, %v6349_v4  ;;  %v2305_v42 = vpack.c.bf16 %v1596_v33, %v1593_v34  ;;  %v1419_v33 = vld [vmem:[%s6154_s7 + $0x4b8] sm:$0xff]  ;;  %v1418_v34 = vld [vmem:[%s6154_s7 + $0x4b0] sm:$0xff] }
 0x168   : > { %v1978_v45 = vsel %vm1524_vm0, %v1419_v33, 0.0 }
 0x169   : > { %v3068_v47 = vsel %vm2966_vm4, %v3067_v40, %v3063_v32  ;;  %v2700_v48 = vunpack.c.l.b16 %v2305_v42  ;;  %v2701_v49 = vunpack.c.h.b16 %v2305_v42  ;;  %1733 = vadd.xlane.f32.xlu1 %v1732_v37  ;;  %1730 = vadd.xlane.f32.xlu0 %v1729_v39 }
 0x16a   : > { %v3073_v51 = vsel %vm2973_vm5, %v3072_v41, %v3068_v47  ;;  %v1602_v52 = vpop.xlane.xlu1 %1601  ;;  %v1599_v53 = vpop.xlane.xlu0 %1598  ;;  %v1975_v47 = vsel %vm1524_vm0, %v1418_v34, 0.0 }
 0x16b   : > { %v3077_v57 = vrot.slane %v2700_v48, %v6356_v10  ;;  %v3082_v58 = vrot.slane %v2701_v49, %v6365_v21  ;;  %v2306_v59 = vpack.c.bf16 %v1602_v52, %v1599_v53  ;;  %v1483_v52 = vld [vmem:[%s6154_s7 + $0x6b8] sm:$0xff]  ;;  %v1482_v53 = vld [vmem:[%s6154_s7 + $0x6b0] sm:$0xff] }
 0x16c   : > { %v2167_v61 = vsel %vm1524_vm0, %v1482_v53, 0.0 }
 0x16d   : > { %v3078_v63 = vsel %vm2980_vm6, %v3077_v57, %v3073_v51  ;;  %v2702_v1 = vunpack.c.l.b16 %v2306_v59  ;;  %v2703_v2 = vunpack.c.h.b16 %v2306_v59  ;;  %1925 = vadd.xlane.f32.xlu1 %v1924_v54  ;;  %1922 = vadd.xlane.f32.xlu0 %v1921_v55  ;;  %v2170_v59 = vsel %vm1524_vm0, %v1483_v52, 0.0 }
 0x16e   : > { %v3083_v3 = vsel %vm2987_vm7, %v3082_v58, %v3078_v63  ;;  %v1608_v5 = vpop.xlane.xlu1 %1607  ;;  %v1605_v6 = vpop.xlane.xlu0 %1604 }
 0x16f   : > { %v3087_v13 = vrot.slane %v2702_v1, %v6371_v30  ;;  %v3092_v14 = vrot.slane %v2703_v2, %v6377_v35  ;;  %v2307_v15 = vpack.c.bf16 %v1608_v5, %v1605_v6  ;;  %v1338_v5 = vld [vmem:[%s6154_s7 + $0x230] sm:$0xff] }
 0x170   : > { %v1735_v16 = vsel %vm1524_vm0, %v1338_v5, 0.0 }
 0x171   : > { %v3088_v18 = vsel %vm2994_vm8, %v3087_v13, %v3083_v3  ;;  %v2704_v19 = vunpack.c.l.b16 %v2307_v15  ;;  %v2705_v20 = vunpack.c.h.b16 %v2307_v15  ;;  %2117 = vadd.xlane.f32.xlu1 %v2116_v8  ;;  %2114 = vadd.xlane.f32.xlu0 %v2113_v9  ;;  %v1339_v3 = vld [vmem:[%s6154_s7 + $0x238] sm:$0xff] }
 0x172   : > { %v3093_v22 = vsel %vm7692_vm9, %v3092_v14, %v3088_v18  ;;  %v1614_v23 = vpop.xlane.xlu1 %1613  ;;  %v1611_v24 = vpop.xlane.xlu0 %1610  ;;  %v1738_v15 = vsel %vm1524_vm0, %v1339_v3, 0.0 }
 0x173   : > { %v3097_v31 = vrot.slane %v2704_v19, %v6391_v56  ;;  %v3102_v27 = vrot.slane %v2705_v20, %v6399_v0  ;;  %v2308_v32 = vpack.c.bf16 %v1614_v23, %v1611_v24  ;;  %v1403_v19 = vld [vmem:[%s6154_s7 + $0x438] sm:$0xff]  ;;  %v1402_v20 = vld [vmem:[%s6154_s7 + $0x430] sm:$0xff] }
 0x174   : > { %v1927_v33 = vsel %vm1524_vm0, %v1402_v20, 0.0 }
 0x175   : > { %v3098_v37 = vsel %vm3008_vm10, %v3097_v31, %v3093_v22  ;;  %v2706_v39 = vunpack.c.l.b16 %v2308_v32  ;;  %v2707_v40 = vunpack.c.h.b16 %v2308_v32  ;;  %1787 = vadd.xlane.f32.xlu1 %v1786_v25  ;;  %1784 = vadd.xlane.f32.xlu0 %v1783_v26  ;;  %v1930_v32 = vsel %vm1524_vm0, %v1403_v19, 0.0 }
 0x176   : > { %v3103_v41 = vsel %vm3015_vm11, %v3102_v27, %v3098_v37  ;;  %v1620_v42 = vpop.xlane.xlu1 %1619  ;;  %v1617_v43 = vpop.xlane.xlu0 %1616 }
 0x177   : > { %v3107_v48 = vrot.slane %v2706_v39, %v6406_v11  ;;  %v3112_v49 = vrot.slane %v2707_v40, %v6409_v12  ;;  %v2309_v51 = vpack.c.bf16 %v1620_v42, %v1617_v43  ;;  %v1467_v40 = vld [vmem:[%s6154_s7 + $0x638] sm:$0xff] }
 0x178   : > { %v2122_v52 = vsel %vm1524_vm0, %v1467_v40, 0.0 }
 0x179   : > { %v2708_v54 = vunpack.c.l.b16 %v2309_v51  ;;  %v2709_v55 = vunpack.c.h.b16 %v2309_v51  ;;  %1979 = vadd.xlane.f32.xlu1 %v1978_v45  ;;  %1976 = vadd.xlane.f32.xlu0 %v1975_v47  ;;  %v3108_v62 = vsel %vm3022_vm12, %v3107_v48, %v3103_v41  ;;  %v1466_v41 = vld [vmem:[%s6154_s7 + $0x630] sm:$0xff] }
 0x17a   : > { %v1626_v57 = vpop.xlane.xlu1 %1625  ;;  %v1623_v58 = vpop.xlane.xlu0 %1622  ;;  %v3113_v6 = vsel %vm3029_vm13, %v3112_v49, %v3108_v62  ;;  %v2119_v53 = vsel %vm1524_vm0, %v1466_v41, 0.0 }
 0x17b   : > { %v3117_v63 = vrot.slane %v2708_v54, %v6420_v29  ;;  %v3122_v1 = vrot.slane %v2709_v55, %v6427_v36  ;;  %v2310_v2 = vpack.c.bf16 %v1626_v57, %v1623_v58  ;;  %v1357_v58 = vld [vmem:[%s6154_s7 + $0x2c8] sm:$0xff] }
 0x17c   : > { %v1792_v5 = vsel %vm1524_vm0, %v1357_v58, 0.0 }
 0x17d   : > { %v2710_v8 = vunpack.c.l.b16 %v2310_v2  ;;  %v2711_v9 = vunpack.c.h.b16 %v2310_v2  ;;  %2171 = vadd.xlane.f32.xlu1 %v2170_v59  ;;  %2168 = vadd.xlane.f32.xlu0 %v2167_v61  ;;  %v3118_v17 = vsel %vm3036_vm14, %v3117_v63, %v3113_v6  ;;  %v1356_v59 = vld [vmem:[%s6154_s7 + $0x2c0] sm:$0xff] }
 0x17e   : > { %v1632_v13 = vpop.xlane.xlu1 %1631  ;;  %v1629_v14 = vpop.xlane.xlu0 %1628  ;;  %v6510_v22 = vsel %vm3043_vm15, %v3122_v1, %v3118_v17  ;;  %v1789_v6 = vsel %vm1524_vm0, %v1356_v59, 0.0 }
 0x17f   : > { %v2311_v18 = vpack.c.bf16 %v1632_v13, %v1629_v14  ;;  %v3127_v23 = vrot.slane %v2710_v8, %v6319_v38  ;;  %v3131_v24 = vrot.slane %v2711_v9, %v6328_v46  ;;  %v1421_v14 = vld [vmem:[%s6154_s7 + $0x4c8] sm:$0xff] }
 0x181   : > { %v2712_v25 = vunpack.c.l.b16 %v2311_v18  ;;  %v2713_v26 = vunpack.c.h.b16 %v2311_v18  ;;  %1739 = vadd.xlane.f32.xlu1 %v1738_v15  ;;  %1736 = vadd.xlane.f32.xlu0 %v1735_v16  ;;  %v3132_v42 = vsel %vm2945_vm1, %v3131_v24, %v3127_v23  ;;  %v1420_v15 = vld [vmem:[%s6154_s7 + $0x4c0] sm:$0xff]  ;;  %v1984_v24 = vsel %vm1524_vm0, %v1421_v14, 0.0 }
 0x182   : > { %v1638_v31 = vpop.xlane.xlu1 %1637  ;;  %v1635_v27 = vpop.xlane.xlu0 %1634 }
 0x183   : > { %v3136_v34 = vrot.slane %v2712_v25, %v6325_v44  ;;  %v3141_v37 = vrot.slane %v2713_v26, %v6333_v50  ;;  %v2312_v39 = vpack.c.bf16 %v1638_v31, %v1635_v27  ;;  %v1981_v25 = vsel %vm1524_vm0, %v1420_v15, 0.0 }
 0x185   : > { %v3137_v43 = vsel %vm2952_vm2, %v3136_v34, %v3132_v42  ;;  %v2714_v45 = vunpack.c.l.b16 %v2312_v39  ;;  %v2715_v47 = vunpack.c.h.b16 %v2312_v39  ;;  %1931 = vadd.xlane.f32.xlu1 %v1930_v32  ;;  %1928 = vadd.xlane.f32.xlu0 %v1927_v33  ;;  %v1485_v32 = vld [vmem:[%s6154_s7 + $0x6c8] sm:$0xff]  ;;  %v1484_v33 = vld [vmem:[%s6154_s7 + $0x6c0] sm:$0xff] }
 0x186   : > { %v3142_v48 = vsel %vm2959_vm3, %v3141_v37, %v3137_v43  ;;  %v1644_v49 = vpop.xlane.xlu1 %1643  ;;  %v1641_v51 = vpop.xlane.xlu0 %1640  ;;  %v2176_v43 = vsel %vm1524_vm0, %v1485_v32, 0.0 }
 0x187   : > { %v3146_v54 = vrot.slane %v2714_v45, %v6340_v60  ;;  %v3151_v55 = vrot.slane %v2715_v47, %v6349_v4  ;;  %v2313_v57 = vpack.c.bf16 %v1644_v49, %v1641_v51  ;;  %v2173_v45 = vsel %vm1524_vm0, %v1484_v33, 0.0  ;;  %v1341_v51 = vld [vmem:[%s6154_s7 + $0x248] sm:$0xff] }
 0x189   : > { %v3147_v61 = vsel %vm2966_vm4, %v3146_v54, %v3142_v48  ;;  %v2716_v62 = vunpack.c.l.b16 %v2313_v57  ;;  %v2717_v63 = vunpack.c.h.b16 %v2313_v57  ;;  %2123 = vadd.xlane.f32.xlu1 %v2122_v52  ;;  %2120 = vadd.xlane.f32.xlu0 %v2119_v53  ;;  %v1340_v52 = vld [vmem:[%s6154_s7 + $0x240] sm:$0xff] }
 0x18a   : > { %v3152_v1 = vsel %vm2973_vm5, %v3151_v55, %v3147_v61  ;;  %v1650_v2 = vpop.xlane.xlu1 %1649  ;;  %v1647_v3 = vpop.xlane.xlu0 %1646  ;;  %v1744_v61 = vsel %vm1524_vm0, %v1341_v51, 0.0 }
 0x18b   : > { %v3156_v8 = vrot.slane %v2716_v62, %v6356_v10  ;;  %v3161_v9 = vrot.slane %v2717_v63, %v6365_v21  ;;  %v2314_v13 = vpack.c.bf16 %v1650_v2, %v1647_v3  ;;  %v1741_v62 = vsel %vm1524_vm0, %v1340_v52, 0.0  ;;  %v1405_v3 = vld [vmem:[%s6154_s7 + $0x448] sm:$0xff] }
 0x18d   : > { %v3157_v16 = vsel %vm2980_vm6, %v3156_v8, %v3152_v1  ;;  %v2718_v17 = vunpack.c.l.b16 %v2314_v13  ;;  %v2719_v18 = vunpack.c.h.b16 %v2314_v13  ;;  %1793 = vadd.xlane.f32.xlu1 %v1792_v5  ;;  %1790 = vadd.xlane.f32.xlu0 %v1789_v6  ;;  %v1404_v5 = vld [vmem:[%s6154_s7 + $0x440] sm:$0xff] }
 0x18e   : > { %v3162_v19 = vsel %vm2987_vm7, %v3161_v9, %v3157_v16  ;;  %v1656_v20 = vpop.xlane.xlu1 %1655  ;;  %v1653_v23 = vpop.xlane.xlu0 %1652  ;;  %v1936_v16 = vsel %vm1524_vm0, %v1405_v3, 0.0 }
 0x18f   : > { %v3166_v26 = vrot.slane %v2718_v17, %v6371_v30  ;;  %v3171_v31 = vrot.slane %v2719_v18, %v6377_v35  ;;  %v2315_v27 = vpack.c.bf16 %v1656_v20, %v1653_v23  ;;  %v1933_v17 = vsel %vm1524_vm0, %v1404_v5, 0.0  ;;  %v1469_v23 = vld [vmem:[%s6154_s7 + $0x648] sm:$0xff] }
 0x190   : > { %v2128_v33 = vsel %vm1524_vm0, %v1469_v23, 0.0 }
 0x191   : > { %v3167_v34 = vsel %vm2994_vm8, %v3166_v26, %v3162_v19  ;;  %v2720_v37 = vunpack.c.l.b16 %v2315_v27  ;;  %v2721_v39 = vunpack.c.h.b16 %v2315_v27  ;;  %1985 = vadd.xlane.f32.xlu1 %v1984_v24  ;;  %1982 = vadd.xlane.f32.xlu0 %v1981_v25  ;;  %v1468_v24 = vld [vmem:[%s6154_s7 + $0x640] sm:$0xff] }
 0x192   : > { %v3172_v40 = vsel %vm7692_vm9, %v3171_v31, %v3167_v34  ;;  %v1662_v41 = vpop.xlane.xlu1 %1661  ;;  %v1659_v42 = vpop.xlane.xlu0 %1658  ;;  %v2125_v34 = vsel %vm1524_vm0, %v1468_v24, 0.0 }
 0x193   : > { %v3176_v47 = vrot.slane %v2720_v37, %v6391_v56  ;;  %v3181_v48 = vrot.slane %v2721_v39, %v6399_v0  ;;  %v2316_v49 = vpack.c.bf16 %v1662_v41, %v1659_v42  ;;  %v1358_v41 = vld [vmem:[%s6154_s7 + $0x2d0] sm:$0xff] }
 0x194   : > { %v1795_v52 = vsel %vm1524_vm0, %v1358_v41, 0.0 }
 0x195   : > { %v3177_v53 = vsel %vm3008_vm10, %v3176_v47, %v3172_v40  ;;  %v2722_v54 = vunpack.c.l.b16 %v2316_v49  ;;  %v2723_v55 = vunpack.c.h.b16 %v2316_v49  ;;  %2177 = vadd.xlane.f32.xlu1 %v2176_v43  ;;  %2174 = vadd.xlane.f32.xlu0 %v2173_v45  ;;  %v1359_v40 = vld [vmem:[%s6154_s7 + $0x2d8] sm:$0xff] }
 0x196   : > { %v3182_v57 = vsel %vm3015_vm11, %v3181_v48, %v3177_v53  ;;  %v1668_v58 = vpop.xlane.xlu1 %1667  ;;  %v1665_v59 = vpop.xlane.xlu0 %1664  ;;  %v1798_v51 = vsel %vm1524_vm0, %v1359_v40, 0.0 }
 0x197   : > { %v3186_v63 = vrot.slane %v2722_v54, %v6406_v11  ;;  %v3191_v1 = vrot.slane %v2723_v55, %v6409_v12  ;;  %v2317_v2 = vpack.c.bf16 %v1668_v58, %v1665_v59  ;;  %v1422_v58 = vld [vmem:[%s6154_s7 + $0x4d0] sm:$0xff] }
 0x199   : > { %v3187_v6 = vsel %vm3022_vm12, %v3186_v63, %v3182_v57  ;;  %v2724_v8 = vunpack.c.l.b16 %v2317_v2  ;;  %v2725_v9 = vunpack.c.h.b16 %v2317_v2  ;;  %1745 = vadd.xlane.f32.xlu1 %v1744_v61  ;;  %1742 = vadd.xlane.f32.xlu0 %v1741_v62  ;;  %v1423_v57 = vld [vmem:[%s6154_s7 + $0x4d8] sm:$0xff] }
 0x19a   : > { %v3192_v13 = vsel %vm3029_vm13, %v3191_v1, %v3187_v6  ;;  %v1674_v14 = vpop.xlane.xlu1 %1673  ;;  %v1671_v15 = vpop.xlane.xlu0 %1670  ;;  %v1990_v5 = vsel %vm1524_vm0, %v1423_v57, 0.0  ;;  %v1987_v6 = vsel %vm1524_vm0, %v1422_v58, 0.0 }
 0x19b   : > { %v3196_v18 = vrot.slane %v2724_v8, %v6420_v29  ;;  %v3201_v19 = vrot.slane %v2725_v9, %v6427_v36  ;;  %v2318_v20 = vpack.c.bf16 %v1674_v14, %v1671_v15  ;;  %v1487_v14 = vld [vmem:[%s6154_s7 + $0x6d8] sm:$0xff]  ;;  %v1486_v15 = vld [vmem:[%s6154_s7 + $0x6d0] sm:$0xff] }
 0x19c   : > { %v2182_v24 = vsel %vm1524_vm0, %v1487_v14, 0.0 }
 0x19d   : > { %v3197_v25 = vsel %vm3036_vm14, %v3196_v18, %v3192_v13  ;;  %v2726_v26 = vunpack.c.l.b16 %v2318_v20  ;;  %v2727_v31 = vunpack.c.h.b16 %v2318_v20  ;;  %1937 = vadd.xlane.f32.xlu1 %v1936_v16  ;;  %1934 = vadd.xlane.f32.xlu0 %v1933_v17 }
 0x19e   : > { %v1680_v27 = vpop.xlane.xlu1 %1679  ;;  %v1677_v32 = vpop.xlane.xlu0 %1676  ;;  %v6573_v37 = vsel %vm3043_vm15, %v3201_v19, %v3197_v25  ;;  %v2179_v25 = vsel %vm1524_vm0, %v1486_v15, 0.0 }
 0x19f   : > { %7697 = vst [vmem:[#allocation10_spill] sm:$0xff] %v6573_v37  ;;  %v2319_v39 = vpack.c.bf16 %v1680_v27, %v1677_v32  ;;  %v3206_v42 = vrot.slane %v2726_v26, %v6319_v38  ;;  %v3210_v43 = vrot.slane %v2727_v31, %v6328_v46  ;;  %v1343_v32 = vld [vmem:[%s6154_s7 + $0x258] sm:$0xff]  ;;  %v1518_v37 = vld [vmem:[%s6154_s7 + $0x7d0] sm:$0xff] }
 0x1a1   : > { %v2728_v45 = vunpack.c.l.b16 %v2319_v39  ;;  %v2729_v47 = vunpack.c.h.b16 %v2319_v39  ;;  %2129 = vadd.xlane.f32.xlu1 %v2128_v33  ;;  %2126 = vadd.xlane.f32.xlu0 %v2125_v34  ;;  %v3211_v59 = vsel %vm2945_vm1, %v3210_v43, %v3206_v42  ;;  %v1342_v33 = vld [vmem:[%s6154_s7 + $0x250] sm:$0xff] }
 0x1a2   : > { %v1686_v48 = vpop.xlane.xlu1 %1685  ;;  %v1683_v49 = vpop.xlane.xlu0 %1682 }
 0x1a3   : > { %v3215_v53 = vrot.slane %v2728_v45, %v6325_v44  ;;  %v3220_v54 = vrot.slane %v2729_v47, %v6333_v50  ;;  %v2320_v55 = vpack.c.bf16 %v1686_v48, %v1683_v49  ;;  %v1750_v45 = vsel %vm1524_vm0, %v1343_v32, 0.0 }
 0x1a4   : > { %v1747_v47 = vsel %vm1524_vm0, %v1342_v33, 0.0 }
 0x1a5   : > { %v3216_v61 = vsel %vm2952_vm2, %v3215_v53, %v3211_v59  ;;  %v2730_v62 = vunpack.c.l.b16 %v2320_v55  ;;  %v2731_v63 = vunpack.c.h.b16 %v2320_v55  ;;  %1799 = vadd.xlane.f32.xlu1 %v1798_v51  ;;  %1796 = vadd.xlane.f32.xlu0 %v1795_v52  ;;  %v1407_v52 = vld [vmem:[%s6154_s7 + $0x458] sm:$0xff]  ;;  %v1406_v53 = vld [vmem:[%s6154_s7 + $0x450] sm:$0xff] }
 0x1a6   : > { %v3221_v1 = vsel %vm2959_vm3, %v3220_v54, %v3216_v61  ;;  %v1692_v2 = vpop.xlane.xlu1 %1691  ;;  %v1689_v3 = vpop.xlane.xlu0 %1688 }
 0x1a7   : > { %v3225_v8 = vrot.slane %v2730_v62, %v6340_v60  ;;  %v3230_v9 = vrot.slane %v2731_v63, %v6349_v4  ;;  %v2321_v13 = vpack.c.bf16 %v1692_v2, %v1689_v3  ;;  %v1942_v62 = vsel %vm1524_vm0, %v1407_v52, 0.0 }
 0x1a8   : > { %v1939_v63 = vsel %vm1524_vm0, %v1406_v53, 0.0 }
 0x1a9   : > { %v3226_v16 = vsel %vm2966_vm4, %v3225_v8, %v3221_v1  ;;  %v2732_v17 = vunpack.c.l.b16 %v2321_v13  ;;  %v2733_v18 = vunpack.c.h.b16 %v2321_v13  ;;  %1991 = vadd.xlane.f32.xlu1 %v1990_v5  ;;  %1988 = vadd.xlane.f32.xlu0 %v1987_v6  ;;  %v1471_v5 = vld [vmem:[%s6154_s7 + $0x658] sm:$0xff]  ;;  %v1470_v6 = vld [vmem:[%s6154_s7 + $0x650] sm:$0xff] }
 0x1aa   : > { %v3231_v19 = vsel %vm2973_vm5, %v3230_v9, %v3226_v16  ;;  %v1698_v20 = vpop.xlane.xlu1 %1697  ;;  %v1695_v23 = vpop.xlane.xlu0 %1694 }
 0x1ab   : > { %v3235_v26 = vrot.slane %v2732_v17, %v6356_v10  ;;  %v3240_v31 = vrot.slane %v2733_v18, %v6365_v21  ;;  %v2322_v27 = vpack.c.bf16 %v1698_v20, %v1695_v23  ;;  %v2134_v17 = vsel %vm1524_vm0, %v1471_v5, 0.0  ;;  %v1345_v5 = vld [vmem:[%s6154_s7 + $0x268] sm:$0xff] }
 0x1ac   : > { %v2131_v18 = vsel %vm1524_vm0, %v1470_v6, 0.0  ;;  %v5332_v6 = vld [vmem:[%s6152_s6 + $0x10] ss:$8 sps:$4 sm:$0xff]  }
 0x1ad   : > { %v3236_v34 = vsel %vm2980_vm6, %v3235_v26, %v3231_v19  ;;  %v2734_v39 = vunpack.c.l.b16 %v2322_v27  ;;  %v2735_v40 = vunpack.c.h.b16 %v2322_v27  ;;  %2183 = vadd.xlane.f32.xlu1 %v2182_v24  ;;  %2180 = vadd.xlane.f32.xlu0 %v2179_v25  ;;  %v1361_v24 = vld [vmem:[%s6154_s7 + $0x2e8] sm:$0xff]  ;;  %v1360_v25 = vld [vmem:[%s6154_s7 + $0x2e0] sm:$0xff] }
 0x1ae   : > { %v3241_v41 = vsel %vm2987_vm7, %v3240_v31, %v3236_v34  ;;  %v1704_v42 = vpop.xlane.xlu1 %1703  ;;  %v1701_v43 = vpop.xlane.xlu0 %1700 }
 0x1af   : > { %v3245_v48 = vrot.slane %v2734_v39, %v6371_v30  ;;  %v3250_v49 = vrot.slane %v2735_v40, %v6377_v35  ;;  %v2323_v51 = vpack.c.bf16 %v1704_v42, %v1701_v43  ;;  %v1804_v39 = vsel %vm1524_vm0, %v1361_v24, 0.0  ;;  %v1425_v43 = vld [vmem:[%s6154_s7 + $0x4e8] sm:$0xff]  ;;  %v5339_v24 = vld [vmem:[%s6152_s6 + $0x210] ss:$8 sps:$4 sm:$0xff]  }
 0x1b0   : > { %v1801_v40 = vsel %vm1524_vm0, %v1360_v25, 0.0  ;;  %v1996_v52 = vsel %vm1524_vm0, %v1425_v43, 0.0  ;;  %v1473_v43 = vld [vmem:[%s6154_s7 + $0x668] sm:$0xff] }
 0x1b1   : > { %v3246_v54 = vsel %vm2994_vm8, %v3245_v48, %v3241_v41  ;;  %v2736_v55 = vunpack.c.l.b16 %v2323_v51  ;;  %v2737_v57 = vunpack.c.h.b16 %v2323_v51  ;;  %1751 = vadd.xlane.f32.xlu1 %v1750_v45  ;;  %1748 = vadd.xlane.f32.xlu0 %v1747_v47  ;;  %v1424_v45 = vld [vmem:[%s6154_s7 + $0x4e0] sm:$0xff] }
 0x1b2   : > { %v3251_v58 = vsel %vm7692_vm9, %v3250_v49, %v3246_v54  ;;  %v1710_v59 = vpop.xlane.xlu1 %1709  ;;  %v1707_v61 = vpop.xlane.xlu0 %1706  ;;  %v5325_v47 = vld [vmem:[%s6152_s6 + $0x4] ss:$8 sps:$4 sm:$0xff]   ;;  %v1993_v53 = vsel %vm1524_vm0, %v1424_v45, 0.0  ;;  %v5344_v45 = vld [vmem:[%s6152_s6 + $0x30] ss:$8 sps:$4 sm:$0xff]  }
 0x1b3   : > { %v3255_v1 = vrot.slane %v2736_v55, %v6391_v56  ;;  %v3260_v2 = vrot.slane %v2737_v57, %v6399_v0  ;;  %v2324_v3 = vpack.c.bf16 %v1710_v59, %v1707_v61  ;;  %v1489_v54 = vld [vmem:[%s6154_s7 + $0x6e8] sm:$0xff]  ;;  %v1488_v59 = vld [vmem:[%s6154_s7 + $0x6e0] sm:$0xff]  ;;  %4895 = vmatprep.subr.bf16.mxu1 %v5325_v47 }
 0x1b4   : > { %v5327_v55 = vld [vmem:[%s6152_s6] ss:$8 sps:$4 sm:$0xff]   ;;  %v2188_v61 = vsel %vm1524_vm0, %v1489_v54, 0.0 }
 0x1b5   : > { %v3256_v8 = vsel %vm3008_vm10, %v3255_v1, %v3251_v58  ;;  %v2738_v9 = vunpack.c.l.b16 %v2324_v3  ;;  %v2739_v13 = vunpack.c.h.b16 %v2324_v3  ;;  %1943 = vadd.xlane.f32.xlu1 %v1942_v62  ;;  %1940 = vadd.xlane.f32.xlu0 %v1939_v63  ;;  %v5328_v62 = vld [vmem:[%s6152_s6 + $0x14] ss:$8 sps:$4 sm:$0xff]   ;;  %v5330_v63 = vld [vmem:[%s6152_s6 + $0x204] ss:$8 sps:$4 sm:$0xff]   ;;  %v2185_v3 = vsel %vm1524_vm0, %v1488_v59, 0.0 }
 0x1b6   : > { %v3261_v14 = vsel %vm3015_vm11, %v3260_v2, %v3256_v8  ;;  %v1716_v15 = vpop.xlane.xlu1 %1715  ;;  %v1713_v16 = vpop.xlane.xlu0 %1712  ;;  %4896 = vmatpush1.bf16.msra.mxu1 %v5327_v55  ;;  %v5333_v8 = vld [vmem:[%s6152_s6 + $0x200] ss:$8 sps:$4 sm:$0xff]   ;;  %4977 = vmatprep.subr.bf16.mxu0 %v5330_v63  ;;  %v2140_v55 = vsel %vm1524_vm0, %v1473_v43, 0.0  ;;  %v5348_v59 = vld [vmem:[%s6152_s6 + $0x234] ss:$8 sps:$4 sm:$0xff]  }
 0x1b7   : > { %v3265_v19 = vrot.slane %v2738_v9, %v6406_v11  ;;  %v3270_v20 = vrot.slane %v2739_v13, %v6409_v12  ;;  %v2325_v23 = vpack.c.bf16 %v1716_v15, %v1713_v16  ;;  %v1344_v13 = vld [vmem:[%s6154_s7 + $0x260] sm:$0xff]  ;;  %4897 = vmatprep.subr.bf16.mxu1 %v5328_v62  ;;  %4978 = vmatpush1.bf16.msra.mxu0 %v5333_v8  ;;  %v5336_v16 = vld [vmem:[%s6152_s6 + $0x214] ss:$8 sps:$4 sm:$0xff]  }
 0x1b8   : > { %v5334_v15 = vld [vmem:[%s6152_s6 + $0x24] ss:$8 sps:$4 sm:$0xff]   ;;  %4979 = vmatprep.subr.bf16.mxu0 %v5336_v16  ;;  %v5345_v47 = vld [vmem:[%s6152_s6 + $0x220] ss:$8 sps:$4 sm:$0xff]  }
 0x1b9   : > { %v3266_v26 = vsel %vm3022_vm12, %v3265_v19, %v3261_v14  ;;  %v2740_v31 = vunpack.c.l.b16 %v2325_v23  ;;  %v2741_v27 = vunpack.c.h.b16 %v2325_v23  ;;  %2135 = vadd.xlane.f32.xlu1 %v2134_v17  ;;  %2132 = vadd.xlane.f32.xlu0 %v2131_v18  ;;  %v1756_v14 = vsel %vm1524_vm0, %v1345_v5, 0.0  ;;  %v5338_v23 = vld [vmem:[%s6152_s6 + $0x20] ss:$8 sps:$4 sm:$0xff]  }
 0x1ba   : > { %v3271_v32 = vsel %vm3029_vm13, %v3270_v20, %v3266_v26  ;;  %v1767_v33 = vpop.xlane.xlu1 %1766  ;;  %v1719_v34 = vpop.xlane.xlu0 %1718  ;;  %4898 = vmatpush1.bf16.msra.mxu1 %v5332_v6  ;;  %v1753_v19 = vsel %vm1524_vm0, %v1344_v13, 0.0  ;;  %v1409_v20 = vld [vmem:[%s6154_s7 + $0x468] sm:$0xff]  ;;  %v1362_v13 = vld [vmem:[%s6154_s7 + $0x2f0] sm:$0xff] }
 0x1bb   : > { %v3275_v41 = vrot.slane %v2740_v31, %v6420_v29  ;;  %v3280_v42 = vrot.slane %v2741_v27, %v6427_v36  ;;  %v1408_v31 = vld [vmem:[%s6154_s7 + $0x460] sm:$0xff]  ;;  %4899 = vmatprep.subr.bf16.mxu1 %v5334_v15  ;;  %4980 = vmatpush1.bf16.msra.mxu0 %v5339_v24 }
 0x1bd   : > { %1805 = vadd.xlane.f32.xlu1 %v1804_v39  ;;  %1802 = vadd.xlane.f32.xlu0 %v1801_v40  ;;  %v3276_v48 = vsel %vm3036_vm14, %v3275_v41, %v3271_v32  ;;  %v5340_v39 = vld [vmem:[%s6152_s6 + $0x34] ss:$8 sps:$4 sm:$0xff]   ;;  %v5342_v40 = vld [vmem:[%s6152_s6 + $0x224] ss:$8 sps:$4 sm:$0xff]  }
 0x1be   : > { %v1959_v49 = vpop.xlane.xlu1 %1958  ;;  %v1770_v51 = vpop.xlane.xlu0 %1769  ;;  %v6641_v57 = vsel %vm3043_vm15, %v3280_v42, %v3276_v48  ;;  %4900 = vmatpush1.bf16.msra.mxu1 %v5338_v23  ;;  %v1945_v42 = vsel %vm1524_vm0, %v1408_v31, 0.0  ;;  %4981 = vmatprep.subr.bf16.mxu0 %v5342_v40  ;;  %v1426_v40 = vld [vmem:[%s6154_s7 + $0x4f0] sm:$0xff] }
 0x1bf   : > { %7698 = vst [vmem:[#allocation11_spill] sm:$0xff] %v6641_v57  ;;  %v2334_v58 = vpack.c.bf16 %v1770_v51, %v1767_v33  ;;  %v1948_v33 = vsel %vm1524_vm0, %v1409_v20, 0.0  ;;  %4901 = vmatprep.subr.bf16.mxu1 %v5340_v39  ;;  %4982 = vmatpush1.bf16.msra.mxu0 %v5345_v47  ;;  %v5354_v20 = vld [vmem:[%s6152_s6 + $0x244] ss:$8 sps:$4 sm:$0xff]   ;;  %v1375_v57 = vld [vmem:[%s6154_s7 + $0x358] sm:$0xff] }
 0x1c0   : > { %4983 = vmatprep.subr.bf16.mxu0 %v5348_v59  ;;  %v5358_v47 = vld [vmem:[%s6152_s6 + $0x64] ss:$8 sps:$4 sm:$0xff]  }
 0x1c1   : > { %1997 = vadd.xlane.f32.xlu1 %v1996_v52  ;;  %1994 = vadd.xlane.f32.xlu0 %v1993_v53  ;;  %v2758_v27 = vunpack.c.l.b16 %v2334_v58  ;;  %v2759_v32 = vunpack.c.h.b16 %v2334_v58  ;;  %v5346_v58 = vld [vmem:[%s6152_s6 + $0x44] ss:$8 sps:$4 sm:$0xff]  }
 0x1c2   : > { %v2151_v1 = vpop.xlane.xlu1 %2150  ;;  %v1962_v2 = vpop.xlane.xlu0 %1961  ;;  %4902 = vmatpush1.bf16.msra.mxu1 %v5344_v45 }
 0x1c3   : > { %v6651_v9 = vpack.c.bf16 %v1962_v2, %v1959_v49  ;;  %v1472_v49 = vld [vmem:[%s6154_s7 + $0x660] sm:$0xff]  ;;  %v3364_v51 = vrot.slane %v2758_v27, %v6319_v38  ;;  %v3368_v52 = vrot.slane %v2759_v32, %v6328_v46  ;;  %4903 = vmatprep.subr.bf16.mxu1 %v5346_v58  ;;  %v1807_v27 = vsel %vm1524_vm0, %v1362_v13, 0.0  ;;  %v1427_v32 = vld [vmem:[%s6154_s7 + $0x4f8] sm:$0xff] }
 0x1c4   : > { %v2137_v63 = vsel %vm1524_vm0, %v1472_v49, 0.0  ;;  %v5350_v2 = vld [vmem:[%s6152_s6 + $0x40] ss:$8 sps:$4 sm:$0xff]   ;;  %v2002_v45 = vsel %vm1524_vm0, %v1427_v32, 0.0  ;;  %v5366_v13 = vld [vmem:[%s6152_s6 + $0x264] ss:$8 sps:$4 sm:$0xff]  }
 0x1c5   : > { %2189 = vadd.xlane.f32.xlu1 %v2188_v61  ;;  %2186 = vadd.xlane.f32.xlu0 %v2185_v3  ;;  %v5351_v3 = vld [vmem:[%s6152_s6 + $0x230] ss:$8 sps:$4 sm:$0xff]   ;;  %v2822_v15 = vunpack.c.l.b16 %v6651_v9  ;;  %v2823_v16 = vunpack.c.h.b16 %v6651_v9 }
 0x1c6   : > { %v1722_v17 = vpop.xlane.xlu1 %1721  ;;  %v2154_v18 = vpop.xlane.xlu0 %2153  ;;  %4904 = vmatpush1.bf16.msra.mxu1 %v5350_v2  ;;  %4984 = vmatpush1.bf16.msra.mxu0 %v5351_v3  ;;  %v5356_v9 = vld [vmem:[%s6152_s6 + $0x50] ss:$8 sps:$4 sm:$0xff]  }
 0x1c7   : > { %v6661_v25 = vpack.c.bf16 %v1722_v17, %v1719_v34  ;;  %v6663_v26 = vpack.c.bf16 %v2154_v18, %v2151_v1  ;;  %v1363_v1 = vld [vmem:[%s6154_s7 + $0x2f8] sm:$0xff]  ;;  %4985 = vmatprep.subr.bf16.mxu0 %v5354_v20  ;;  %v5369_v20 = vld [vmem:[%s6152_s6 + $0x260] ss:$8 sps:$4 sm:$0xff]  }
 0x1c8   : > { %v1810_v18 = vsel %vm1524_vm0, %v1363_v1, 0.0 }
 0x1c9   : > { %1757 = vadd.xlane.f32.xlu1 %v1756_v14  ;;  %1754 = vadd.xlane.f32.xlu0 %v1753_v19  ;;  %v3369_v14 = vsel %vm2945_vm1, %v3368_v52, %v3364_v51  ;;  %v5352_v19 = vld [vmem:[%s6152_s6 + $0x54] ss:$8 sps:$4 sm:$0xff]   ;;  %v1999_v52 = vsel %vm1524_vm0, %v1426_v40, 0.0  ;;  %v2886_v1 = vunpack.c.l.b16 %v6663_v26  ;;  %v2887_v2 = vunpack.c.h.b16 %v6663_v26 }
 0x1ca   : > { %v1776_v34 = vpop.xlane.xlu1 %1775  ;;  %v1773_v41 = vpop.xlane.xlu0 %1772  ;;  %4905 = vmatprep.subr.bf16.mxu1 %v5352_v19  ;;  %v5368_v19 = vld [vmem:[%s6152_s6 + $0x70] ss:$8 sps:$4 sm:$0xff]   ;;  %v5372_v40 = vld [vmem:[%s6152_s6 + $0x274] ss:$8 sps:$4 sm:$0xff]  }
 0x1cb   : > { %v2335_v48 = vpack.c.bf16 %v1776_v34, %v1773_v41  ;;  %v3680_v34 = vrot.slane %v2822_v15, %v6319_v38  ;;  %v3684_v41 = vrot.slane %v2823_v16, %v6328_v46  ;;  %4906 = vmatpush1.bf16.msra.mxu1 %v5356_v9  ;;  %v2743_v15 = vunpack.c.h.b16 %v6661_v25 }
 0x1cc   : > { %4907 = vmatprep.subr.bf16.mxu1 %v5358_v47  ;;  %v3996_v32 = vrot.slane %v2886_v1, %v6319_v38 }
 0x1cd   : > { %v2760_v53 = vunpack.c.l.b16 %v2335_v48  ;;  %v2761_v54 = vunpack.c.h.b16 %v2335_v48  ;;  %1949 = vadd.xlane.f32.xlu1 %v1948_v33  ;;  %1946 = vadd.xlane.f32.xlu0 %v1945_v42  ;;  %v5357_v33 = vld [vmem:[%s6152_s6 + $0x240] ss:$8 sps:$4 sm:$0xff]   ;;  %v5360_v48 = vld [vmem:[%s6152_s6 + $0x254] ss:$8 sps:$4 sm:$0xff]  }
 0x1ce   : > { %v1914_v61 = vpop.xlane.xlu1 %1913  ;;  %v1911_v62 = vpop.xlane.xlu0 %1910  ;;  %4986 = vmatpush1.bf16.msra.mxu0 %v5357_v33 }
 0x1cf   : > { %v3373_v5 = vrot.slane %v2760_v53, %v6325_v44  ;;  %v3378_v6 = vrot.slane %v2761_v54, %v6333_v50  ;;  %v6685_v8 = vpack.c.bf16 %v1914_v61, %v1911_v62  ;;  %v1491_v53 = vld [vmem:[%s6154_s7 + $0x6f8] sm:$0xff]  ;;  %v5362_v54 = vld [vmem:[%s6152_s6 + $0x60] ss:$8 sps:$4 sm:$0xff]   ;;  %v1490_v62 = vld [vmem:[%s6154_s7 + $0x6f0] sm:$0xff]  ;;  %4987 = vmatprep.subr.bf16.mxu0 %v5360_v48 }
 0x1d0   : > { %4908 = vmatpush1.bf16.msra.mxu1 %v5362_v54  ;;  %v5374_v48 = vld [vmem:[%s6152_s6 + $0x80] ss:$8 sps:$4 sm:$0xff]   ;;  %v1411_v54 = vld [vmem:[%s6154_s7 + $0x478] sm:$0xff] }
 0x1d1   : > { %v3374_v17 = vsel %vm2952_vm2, %v3373_v5, %v3369_v14  ;;  %2141 = vadd.xlane.f32.xlu1 %v2140_v55  ;;  %2138 = vadd.xlane.f32.xlu0 %v2137_v63  ;;  %v5363_v55 = vld [vmem:[%s6152_s6 + $0x250] ss:$8 sps:$4 sm:$0xff]   ;;  %v3685_v63 = vsel %vm2945_vm1, %v3684_v41, %v3680_v34  ;;  %v2194_v5 = vsel %vm1524_vm0, %v1491_v53, 0.0  ;;  %v2742_v14 = vunpack.c.l.b16 %v6661_v25 }
 0x1d2   : > { %v6696_v23 = vsel %vm2959_vm3, %v3378_v6, %v3374_v17  ;;  %v1968_v24 = vpop.xlane.xlu1 %1967  ;;  %v1965_v31 = vpop.xlane.xlu0 %1964  ;;  %v5364_v6 = vld [vmem:[%s6152_s6 + $0x74] ss:$8 sps:$4 sm:$0xff]   ;;  %4988 = vmatpush1.bf16.msra.mxu0 %v5363_v55  ;;  %v4000_v25 = vrot.slane %v2887_v2, %v6328_v46  ;;  %v3289_v41 = vrot.slane %v2743_v15, %v6328_v46  ;;  %v1954_v15 = vsel %vm1524_vm0, %v1411_v54, 0.0 }
 0x1d3   : > { %v2367_v39 = vpack.c.bf16 %v1968_v24, %v1965_v31  ;;  %v1347_v31 = vld [vmem:[%s6154_s7 + $0x278] sm:$0xff]  ;;  %4909 = vmatprep.subr.bf16.mxu1 %v5364_v6  ;;  %4989 = vmatprep.subr.bf16.mxu0 %v5366_v13  ;;  %v3285_v34 = vrot.slane %v2742_v14, %v6319_v38  ;;  %v1410_v55 = vld [vmem:[%s6154_s7 + $0x470] sm:$0xff] }
 0x1d4   : > { %4910 = vmatpush1.bf16.msra.mxu1 %v5368_v19 }
 0x1d5   : > { %v2824_v42 = vunpack.c.l.b16 %v2367_v39  ;;  %v2825_v43 = vunpack.c.h.b16 %v2367_v39  ;;  %1811 = vadd.xlane.f32.xlu1 %v1810_v18  ;;  %1808 = vadd.xlane.f32.xlu0 %v1807_v27  ;;  %v2191_v18 = vsel %vm1524_vm0, %v1490_v62, 0.0  ;;  %v1346_v27 = vld [vmem:[%s6154_s7 + $0x270] sm:$0xff]  ;;  %v5370_v39 = vld [vmem:[%s6152_s6 + $0x84] ss:$8 sps:$4 sm:$0xff]   ;;  %v2807_v62 = vunpack.c.h.b16 %v6685_v8 }
 0x1d6   : > { %v2106_v49 = vpop.xlane.xlu1 %2105  ;;  %v2103_v51 = vpop.xlane.xlu0 %2102  ;;  %v1759_v47 = vsel %vm1524_vm0, %v1346_v27, 0.0  ;;  %4990 = vmatpush1.bf16.msra.mxu0 %v5369_v20  ;;  %4911 = vmatprep.subr.bf16.mxu1 %v5370_v39  ;;  %v3290_v6 = vsel %vm2945_vm1, %v3289_v41, %v3285_v34  ;;  %v1474_v27 = vld [vmem:[%s6154_s7 + $0x670] sm:$0xff]  ;;  %v5382_v41 = vld [vmem:[%s6152_s6 + $0xa4] ss:$8 sps:$4 sm:$0xff]  }
 0x1d7   : > { %v3689_v58 = vrot.slane %v2824_v42, %v6325_v44  ;;  %v3694_v59 = vrot.slane %v2825_v43, %v6333_v50  ;;  %v6714_v61 = vpack.c.bf16 %v2106_v49, %v2103_v51  ;;  %v5375_v49 = vld [vmem:[%s6152_s6 + $0x270] ss:$8 sps:$4 sm:$0xff]   ;;  %4991 = vmatprep.subr.bf16.mxu0 %v5372_v40 }
 0x1d8   : > { %4912 = vmatpush1.bf16.msra.mxu1 %v5374_v48 }
 0x1d9   : > { %v3690_v3 = vsel %vm2952_vm2, %v3689_v58, %v3685_v63  ;;  %2003 = vadd.xlane.f32.xlu1 %v2002_v45  ;;  %2000 = vadd.xlane.f32.xlu0 %v1999_v52  ;;  %v1762_v45 = vsel %vm1524_vm0, %v1347_v31, 0.0  ;;  %v4001_v58 = vsel %vm2945_vm1, %v4000_v25, %v3996_v32  ;;  %v1475_v31 = vld [vmem:[%s6154_s7 + $0x678] sm:$0xff]  ;;  %v3605_v25 = vrot.slane %v2807_v62, %v6328_v46 }
 0x1da   : > { %v6727_v16 = vsel %vm2959_vm3, %v3694_v59, %v3690_v3  ;;  %v2160_v26 = vpop.xlane.xlu1 %2159  ;;  %v2157_v17 = vpop.xlane.xlu0 %2156  ;;  %v2806_v59 = vunpack.c.l.b16 %v6685_v8  ;;  %v5376_v3 = vld [vmem:[%s6152_s6 + $0x94] ss:$8 sps:$4 sm:$0xff]   ;;  %4992 = vmatpush1.bf16.msra.mxu0 %v5375_v49  ;;  %v2146_v48 = vsel %vm1524_vm0, %v1475_v31, 0.0  ;;  %v5386_v49 = vld [vmem:[%s6152_s6 + $0xa0] ss:$8 sps:$4 sm:$0xff]  }
 0x1db   : > { %v2399_v24 = vpack.c.bf16 %v2160_v26, %v2157_v17  ;;  %v1951_v26 = vsel %vm1524_vm0, %v1410_v55, 0.0  ;;  %v5380_v17 = vld [vmem:[%s6152_s6 + $0x90] ss:$8 sps:$4 sm:$0xff]   ;;  %4913 = vmatprep.subr.bf16.mxu1 %v5376_v3  ;;  %v1381_v55 = vld [vmem:[%s6154_s7 + $0x388] sm:$0xff] }
 0x1dc   : > { %v3601_v32 = vrot.slane %v2806_v59, %v6319_v38  ;;  %4914 = vmatpush1.bf16.msra.mxu1 %v5380_v17 }
 0x1dd   : > { %v2888_v9 = vunpack.c.l.b16 %v2399_v24  ;;  %v2889_v33 = vunpack.c.h.b16 %v2399_v24  ;;  %2195 = vadd.xlane.f32.xlu1 %v2194_v5  ;;  %2192 = vadd.xlane.f32.xlu0 %v2191_v18  ;;  %v5378_v5 = vld [vmem:[%s6152_s6 + $0x284] ss:$8 sps:$4 sm:$0xff]   ;;  %v5381_v18 = vld [vmem:[%s6152_s6 + $0x280] ss:$8 sps:$4 sm:$0xff]  }
 0x1de   : > { %v1728_v42 = vpop.xlane.xlu1 %1727  ;;  %v1725_v43 = vpop.xlane.xlu0 %1724  ;;  %4993 = vmatprep.subr.bf16.mxu0 %v5378_v5  ;;  %4915 = vmatprep.subr.bf16.mxu1 %v5382_v41  ;;  %v3606_v59 = vsel %vm2945_vm1, %v3605_v25, %v3601_v32  ;;  %v5388_v5 = vld [vmem:[%s6152_s6 + $0xb4] ss:$8 sps:$4 sm:$0xff]   ;;  %v1444_v32 = vld [vmem:[%s6154_s7 + $0x580] sm:$0xff] }
 0x1df   : > { %v4005_v51 = vrot.slane %v2888_v9, %v6325_v44  ;;  %v4010_v52 = vrot.slane %v2889_v33, %v6333_v50  ;;  %v2327_v53 = vpack.c.bf16 %v1728_v42, %v1725_v43  ;;  %v2870_v9 = vunpack.c.l.b16 %v6714_v61  ;;  %v5384_v42 = vld [vmem:[%s6152_s6 + $0x294] ss:$8 sps:$4 sm:$0xff]   ;;  %4994 = vmatpush1.bf16.msra.mxu0 %v5381_v18  ;;  %v5392_v18 = vld [vmem:[%s6152_s6 + $0xb0] ss:$8 sps:$4 sm:$0xff]  }
 0x1e0   : > { %v2871_v33 = vunpack.c.h.b16 %v6714_v61  ;;  %v2143_v61 = vsel %vm1524_vm0, %v1474_v27, 0.0  ;;  %4995 = vmatprep.subr.bf16.mxu0 %v5384_v42  ;;  %4916 = vmatpush1.bf16.msra.mxu1 %v5386_v49  ;;  %v1445_v27 = vld [vmem:[%s6154_s7 + $0x588] sm:$0xff]  ;;  %v5399_v49 = vld [vmem:[%s6152_s6 + $0x2b0] ss:$8 sps:$4 sm:$0xff]  }
 0x1e1   : > { %v4006_v63 = vsel %vm2952_vm2, %v4005_v51, %v4001_v58  ;;  %v2744_v1 = vunpack.c.l.b16 %v2327_v53  ;;  %v2745_v2 = vunpack.c.h.b16 %v2327_v53  ;;  %1763 = vadd.xlane.f32.xlu1 %v1762_v45  ;;  %1760 = vadd.xlane.f32.xlu0 %v1759_v47  ;;  %v5387_v51 = vld [vmem:[%s6152_s6 + $0x290] ss:$8 sps:$4 sm:$0xff]   ;;  %v1380_v58 = vld [vmem:[%s6154_s7 + $0x380] sm:$0xff]  ;;  %v3917_v62 = vrot.slane %v2870_v9, %v6319_v38 }
 0x1e2   : > { %v6756_v13 = vsel %vm2959_vm3, %v4010_v52, %v4006_v63  ;;  %v1920_v14 = vpop.xlane.xlu1 %1919  ;;  %v1917_v8 = vpop.xlane.xlu0 %1916  ;;  %v3921_v63 = vrot.slane %v2871_v33, %v6328_v46  ;;  %v1861_v17 = vsel %vm1524_vm0, %v1380_v58, 0.0  ;;  %4917 = vmatprep.subr.bf16.mxu1 %v5388_v5 }
 0x1e3   : > { %v3294_v19 = vrot.slane %v2744_v1, %v6325_v44  ;;  %v3299_v20 = vrot.slane %v2745_v2, %v6333_v50  ;;  %v2359_v24 = vpack.c.bf16 %v1920_v14, %v1917_v8  ;;  %4996 = vmatpush1.bf16.msra.mxu0 %v5387_v51 }
 0x1e4   : > { %v3922_v25 = vsel %vm2945_vm1, %v3921_v63, %v3917_v62  ;;  %4918 = vmatpush1.bf16.msra.mxu1 %v5392_v18  ;;  %v5400_v63 = vld [vmem:[%s6152_s6 + $0xd4] ss:$8 sps:$4 sm:$0xff]  }
 0x1e5   : > { %v3295_v39 = vsel %vm2952_vm2, %v3294_v19, %v3290_v6  ;;  %v2808_v40 = vunpack.c.l.b16 %v2359_v24  ;;  %v2809_v34 = vunpack.c.h.b16 %v2359_v24  ;;  %1955 = vadd.xlane.f32.xlu1 %v1954_v15  ;;  %1952 = vadd.xlane.f32.xlu0 %v1951_v26  ;;  %v5390_v6 = vld [vmem:[%s6152_s6 + $0x2a4] ss:$8 sps:$4 sm:$0xff]   ;;  %v1864_v26 = vsel %vm1524_vm0, %v1381_v55, 0.0  ;;  %v5393_v19 = vld [vmem:[%s6152_s6 + $0x2a0] ss:$8 sps:$4 sm:$0xff]  }
 0x1e6   : > { %v6774_v43 = vsel %vm2959_vm3, %v3299_v20, %v3295_v39  ;;  %v2112_v45 = vpop.xlane.xlu1 %2111  ;;  %v2109_v47 = vpop.xlane.xlu0 %2108  ;;  %4997 = vmatprep.subr.bf16.mxu0 %v5390_v6  ;;  %v1508_v55 = vld [vmem:[%s6154_s7 + $0x780] sm:$0xff] }
 0x1e7   : > { %v3610_v52 = vrot.slane %v2808_v40, %v6325_v44  ;;  %v3615_v53 = vrot.slane %v2809_v34, %v6333_v50  ;;  %v2391_v54 = vpack.c.bf16 %v2112_v45, %v2109_v47  ;;  %v5394_v40 = vld [vmem:[%s6152_s6 + $0xc4] ss:$8 sps:$4 sm:$0xff]   ;;  %v5396_v34 = vld [vmem:[%s6152_s6 + $0x2b4] ss:$8 sps:$4 sm:$0xff]   ;;  %v2056_v47 = vsel %vm1524_vm0, %v1445_v27, 0.0  ;;  %4998 = vmatpush1.bf16.msra.mxu0 %v5393_v19 }
 0x1e8   : > { %4919 = vmatprep.subr.bf16.mxu1 %v5394_v40  ;;  %4999 = vmatprep.subr.bf16.mxu0 %v5396_v34  ;;  %v1365_v19 = vld [vmem:[%s6154_s7 + $0x308] sm:$0xff] }
 0x1e9   : > { %v3611_v1 = vsel %vm2952_vm2, %v3610_v52, %v3606_v59  ;;  %v2872_v2 = vunpack.c.l.b16 %v2391_v54  ;;  %v2873_v3 = vunpack.c.h.b16 %v2391_v54  ;;  %2147 = vadd.xlane.f32.xlu1 %v2146_v48  ;;  %2144 = vadd.xlane.f32.xlu0 %v2143_v61  ;;  %v2053_v48 = vsel %vm1524_vm0, %v1444_v32, 0.0  ;;  %v5398_v61 = vld [vmem:[%s6152_s6 + $0xc0] ss:$8 sps:$4 sm:$0xff]   ;;  %v5406_v32 = vld [vmem:[%s6152_s6 + $0xe4] ss:$8 sps:$4 sm:$0xff]  }
 0x1ea   : > { %v6791_v14 = vsel %vm2959_vm3, %v3615_v53, %v3611_v1  ;;  %v1782_v8 = vpop.xlane.xlu1 %1781  ;;  %v1779_v15 = vpop.xlane.xlu0 %1778  ;;  %v1509_v54 = vld [vmem:[%s6154_s7 + $0x788] sm:$0xff]  ;;  %4920 = vmatpush1.bf16.msra.mxu1 %v5398_v61  ;;  %v1816_v40 = vsel %vm1524_vm0, %v1365_v19, 0.0  ;;  %v1383_v61 = vld [vmem:[%s6154_s7 + $0x398] sm:$0xff] }
 0x1eb   : > { %v3926_v20 = vrot.slane %v2872_v2, %v6325_v44  ;;  %v3931_v24 = vrot.slane %v2873_v3, %v6333_v50  ;;  %v2336_v31 = vpack.c.bf16 %v1782_v8, %v1779_v15  ;;  %v5402_v1 = vld [vmem:[%s6152_s6 + $0x2c4] ss:$8 sps:$4 sm:$0xff]   ;;  %v2248_v6 = vsel %vm1524_vm0, %v1509_v54, 0.0  ;;  %5000 = vmatpush1.bf16.msra.mxu0 %v5399_v49  ;;  %v5405_v15 = vld [vmem:[%s6152_s6 + $0x2c0] ss:$8 sps:$4 sm:$0xff]   ;;  %4921 = vmatprep.subr.bf16.mxu1 %v5400_v63  ;;  %v1382_v49 = vld [vmem:[%s6154_s7 + $0x390] sm:$0xff] }
 0x1ec   : > { %v2245_v8 = vsel %vm1524_vm0, %v1508_v55, 0.0  ;;  %5001 = vmatprep.subr.bf16.mxu0 %v5402_v1  ;;  %v5412_v54 = vld [vmem:[%s6152_s6 + $0xf4] ss:$8 sps:$4 sm:$0xff]   ;;  %v5414_v55 = vld [vmem:[%s6152_s6 + $0x2e4] ss:$8 sps:$4 sm:$0xff]   ;;  %v1870_v63 = vsel %vm1524_vm0, %v1383_v61, 0.0 }
 0x1ed   : > { %v3927_v9 = vsel %vm2952_vm2, %v3926_v20, %v3922_v25  ;;  %v2762_v33 = vunpack.c.l.b16 %v2336_v31  ;;  %v2763_v39 = vunpack.c.h.b16 %v2336_v31  ;;  %1865 = vadd.xlane.f32.xlu1 %v1864_v26  ;;  %1862 = vadd.xlane.f32.xlu0 %v1861_v17  ;;  %v1364_v20 = vld [vmem:[%s6154_s7 + $0x300] sm:$0xff]  ;;  %v5408_v25 = vld [vmem:[%s6152_s6 + $0x2d4] ss:$8 sps:$4 sm:$0xff]   ;;  %v1867_v1 = vsel %vm1524_vm0, %v1382_v49, 0.0 }
 0x1ee   : > { %v6806_v41 = vsel %vm2959_vm3, %v3931_v24, %v3927_v9  ;;  %v1974_v42 = vpop.xlane.xlu1 %1973  ;;  %v1971_v45 = vpop.xlane.xlu0 %1970  ;;  %v1813_v34 = vsel %vm1524_vm0, %v1364_v20, 0.0  ;;  %v5418_v19 = vld [vmem:[%s6152_s6 + $0x2f4] ss:$8 sps:$4 sm:$0xff]  }
 0x1ef   : > { %v3383_v51 = vrot.slane %v2762_v33, %v6340_v60  ;;  %v3388_v52 = vrot.slane %v2763_v39, %v6349_v4  ;;  %v2368_v53 = vpack.c.bf16 %v1974_v42, %v1971_v45  ;;  %5002 = vmatpush1.bf16.msra.mxu0 %v5405_v15  ;;  %v5411_v42 = vld [vmem:[%s6152_s6 + $0x2d0] ss:$8 sps:$4 sm:$0xff]   ;;  %v1428_v15 = vld [vmem:[%s6154_s7 + $0x500] sm:$0xff] }
 0x1f0   : > { %5003 = vmatprep.subr.bf16.mxu0 %v5408_v25  ;;  %v5420_v25 = vld [vmem:[%s6152_s6 + $0x2f0] ss:$8 sps:$4 sm:$0xff]  }
 0x1f1   : > { %v3384_v58 = vsel %vm2966_vm4, %v3383_v51, %v6696_v23  ;;  %v2826_v59 = vunpack.c.l.b16 %v2368_v53  ;;  %v2827_v62 = vunpack.c.h.b16 %v2368_v53  ;;  %2057 = vadd.xlane.f32.xlu1 %v2056_v47  ;;  %2054 = vadd.xlane.f32.xlu0 %v2053_v48  ;;  %v5404_v23 = vld [vmem:[%s6152_s6 + $0xd0] ss:$8 sps:$4 sm:$0xff]  }
 0x1f2   : > { %v6821_v2 = vsel %vm2973_vm5, %v3388_v52, %v3384_v58  ;;  %v2166_v3 = vpop.xlane.xlu1 %2165  ;;  %v2163_v5 = vpop.xlane.xlu0 %2162  ;;  %4922 = vmatpush1.bf16.msra.mxu1 %v5404_v23  ;;  %v1429_v23 = vld [vmem:[%s6154_s7 + $0x508] sm:$0xff] }
 0x1f3   : > { %v3699_v26 = vrot.slane %v2826_v59, %v6340_v60  ;;  %v3704_v17 = vrot.slane %v2827_v62, %v6349_v4  ;;  %v2400_v18 = vpack.c.bf16 %v2166_v3, %v2163_v5  ;;  %4923 = vmatprep.subr.bf16.mxu1 %v5406_v32  ;;  %5004 = vmatpush1.bf16.msra.mxu0 %v5411_v42  ;;  %v5417_v3 = vld [vmem:[%s6152_s6 + $0x2e0] ss:$8 sps:$4 sm:$0xff]   ;;  %v2005_v32 = vsel %vm1524_vm0, %v1428_v15, 0.0 }
 0x1f4   : > { %5005 = vmatprep.subr.bf16.mxu0 %v5414_v55  ;;  %v1492_v55 = vld [vmem:[%s6154_s7 + $0x700] sm:$0xff] }
 0x1f5   : > { %v3700_v24 = vsel %vm2966_vm4, %v3699_v26, %v6727_v16  ;;  %v2890_v31 = vunpack.c.l.b16 %v2400_v18  ;;  %v2891_v27 = vunpack.c.h.b16 %v2400_v18  ;;  %2249 = vadd.xlane.f32.xlu1 %v2248_v6  ;;  %2246 = vadd.xlane.f32.xlu0 %v2245_v8  ;;  %v5410_v16 = vld [vmem:[%s6152_s6 + $0xe0] ss:$8 sps:$4 sm:$0xff]  }
 0x1f6   : > { %v6836_v9 = vsel %vm2973_vm5, %v3704_v17, %v3700_v24  ;;  %v1734_v33 = vpop.xlane.xlu1 %1733  ;;  %v1731_v39 = vpop.xlane.xlu0 %1730  ;;  %4924 = vmatpush1.bf16.msra.mxu1 %v5410_v16 }
 0x1f7   : > { %v4015_v45 = vrot.slane %v2890_v31, %v6340_v60  ;;  %v4020_v47 = vrot.slane %v2891_v27, %v6349_v4  ;;  %v2328_v48 = vpack.c.bf16 %v1734_v33, %v1731_v39  ;;  %4925 = vmatprep.subr.bf16.mxu1 %v5412_v54  ;;  %v2008_v27 = vsel %vm1524_vm0, %v1429_v23, 0.0  ;;  %5006 = vmatpush1.bf16.msra.mxu0 %v5417_v3 }
 0x1f8   : > { %5007 = vmatprep.subr.bf16.mxu0 %v5418_v19 }
 0x1f9   : > { %v4016_v51 = vsel %vm2966_vm4, %v4015_v45, %v6756_v13  ;;  %v2746_v52 = vunpack.c.l.b16 %v2328_v48  ;;  %v2747_v53 = vunpack.c.h.b16 %v2328_v48  ;;  %1817 = vadd.xlane.f32.xlu1 %v1816_v40  ;;  %1814 = vadd.xlane.f32.xlu0 %v1813_v34  ;;  %v5416_v13 = vld [vmem:[%s6152_s6 + $0xf0] ss:$8 sps:$4 sm:$0xff]  }
 0x1fa   : > { %v6851_v58 = vsel %vm2973_vm5, %v4020_v47, %v4016_v51  ;;  %v1926_v59 = vpop.xlane.xlu1 %1925  ;;  %v1923_v62 = vpop.xlane.xlu0 %1922  ;;  %4926 = vmatpush1.bf16.msra.mxu1 %v5416_v13  ;;  %v1447_v40 = vld [vmem:[%s6154_s7 + $0x598] sm:$0xff]  ;;  %v1446_v34 = vld [vmem:[%s6154_s7 + $0x590] sm:$0xff] }
 0x1fb   : > { %v3304_v5 = vrot.slane %v2746_v52, %v6340_v60  ;;  %v3309_v6 = vrot.slane %v2747_v53, %v6349_v4  ;;  %v2360_v8 = vpack.c.bf16 %v1926_v59, %v1923_v62  ;;  %v2062_v49 = vsel %vm1524_vm0, %v1447_v40, 0.0  ;;  %5008 = vmatpush1.bf16.msra.mxu0 %v5420_v25  ;;  %v1366_v40 = vld [vmem:[%s6154_s7 + $0x310] sm:$0xff] }
 0x1fc   : > { %v2059_v51 = vsel %vm1524_vm0, %v1446_v34, 0.0 }
 0x1fd   : > { %v3305_v26 = vsel %vm2966_vm4, %v3304_v5, %v6774_v43  ;;  %v2810_v17 = vunpack.c.l.b16 %v2360_v8  ;;  %v2811_v18 = vunpack.c.h.b16 %v2360_v8  ;;  %1871 = vadd.xlane.f32.xlu1 %v1870_v63  ;;  %1868 = vadd.xlane.f32.xlu0 %v1867_v1 }
 0x1fe   : > { %v6865_v20 = vsel %vm2973_vm5, %v3309_v6, %v3305_v26  ;;  %v2118_v24 = vpop.xlane.xlu1 %2117  ;;  %v2115_v31 = vpop.xlane.xlu0 %2114  ;;  %v2197_v6 = vsel %vm1524_vm0, %v1492_v55, 0.0  ;;  %v1510_v26 = vld [vmem:[%s6154_s7 + $0x790] sm:$0xff] }
 0x1ff   : > { %v3620_v43 = vrot.slane %v2810_v17, %v6340_v60  ;;  %v3625_v33 = vrot.slane %v2811_v18, %v6349_v4  ;;  %v2392_v39 = vpack.c.bf16 %v2118_v24, %v2115_v31  ;;  %v2251_v25 = vsel %vm1524_vm0, %v1510_v26, 0.0 }
 0x201   : > { %v3621_v16 = vsel %vm2966_vm4, %v3620_v43, %v6791_v14  ;;  %v2874_v42 = vunpack.c.l.b16 %v2392_v39  ;;  %v2875_v45 = vunpack.c.h.b16 %v2392_v39  ;;  %2009 = vadd.xlane.f32.xlu1 %v2008_v27  ;;  %2006 = vadd.xlane.f32.xlu0 %v2005_v32  ;;  %v1493_v14 = vld [vmem:[%s6154_s7 + $0x708] sm:$0xff] }
 0x202   : > { %v6877_v47 = vsel %vm2973_vm5, %v3625_v33, %v3621_v16  ;;  %v1788_v48 = vpop.xlane.xlu1 %1787  ;;  %v1785_v61 = vpop.xlane.xlu0 %1784  ;;  %v2200_v5 = vsel %vm1524_vm0, %v1493_v14, 0.0  ;;  %v1430_v14 = vld [vmem:[%s6154_s7 + $0x510] sm:$0xff] }
 0x203   : > { %v3936_v52 = vrot.slane %v2874_v42, %v6340_v60  ;;  %v3941_v53 = vrot.slane %v2875_v45, %v6349_v4  ;;  %v2337_v54 = vpack.c.bf16 %v1788_v48, %v1785_v61 }
 0x205   : > { %v3937_v59 = vsel %vm2966_vm4, %v3936_v52, %v6806_v41  ;;  %v2764_v62 = vunpack.c.l.b16 %v2337_v54  ;;  %v2765_v63 = vunpack.c.h.b16 %v2337_v54  ;;  %2063 = vadd.xlane.f32.xlu1 %v2062_v49  ;;  %2060 = vadd.xlane.f32.xlu0 %v2059_v51  ;;  %v1511_v41 = vld [vmem:[%s6154_s7 + $0x798] sm:$0xff]  ;;  %v1819_v51 = vsel %vm1524_vm0, %v1366_v40, 0.0 }
 0x206   : > { %v6888_v1 = vsel %vm2973_vm5, %v3941_v53, %v3937_v59  ;;  %v1980_v13 = vpop.xlane.xlu1 %1979  ;;  %v1977_v3 = vpop.xlane.xlu0 %1976  ;;  %v2254_v32 = vsel %vm1524_vm0, %v1511_v41, 0.0  ;;  %v1494_v41 = vld [vmem:[%s6154_s7 + $0x710] sm:$0xff] }
 0x207   : > { %v3393_v8 = vrot.slane %v2764_v62, %v6356_v10  ;;  %v3398_v23 = vrot.slane %v2765_v63, %v6365_v21  ;;  %v2369_v15 = vpack.c.bf16 %v1980_v13, %v1977_v3 }
 0x209   : > { %v3394_v17 = vsel %vm2980_vm6, %v3393_v8, %v6821_v2  ;;  %v2828_v18 = vunpack.c.l.b16 %v2369_v15  ;;  %v2829_v19 = vunpack.c.h.b16 %v2369_v15  ;;  %2201 = vadd.xlane.f32.xlu1 %v2200_v5  ;;  %2198 = vadd.xlane.f32.xlu0 %v2197_v6  ;;  %v1367_v2 = vld [vmem:[%s6154_s7 + $0x318] sm:$0xff]  ;;  %v2011_v6 = vsel %vm1524_vm0, %v1430_v14, 0.0 }
 0x20a   : > { %v6899_v24 = vsel %vm2987_vm7, %v3398_v23, %v3394_v17  ;;  %v2172_v31 = vpop.xlane.xlu1 %2171  ;;  %v2169_v27 = vpop.xlane.xlu0 %2168  ;;  %v1822_v49 = vsel %vm1524_vm0, %v1367_v2, 0.0  ;;  %v1384_v2 = vld [vmem:[%s6154_s7 + $0x3a0] sm:$0xff] }
 0x20b   : > { %v3709_v43 = vrot.slane %v2828_v18, %v6356_v10  ;;  %v3714_v33 = vrot.slane %v2829_v19, %v6365_v21  ;;  %v2401_v39 = vpack.c.bf16 %v2172_v31, %v2169_v27 }
 0x20d   : > { %v3710_v34 = vsel %vm2980_vm6, %v3709_v43, %v6836_v9  ;;  %v2892_v16 = vunpack.c.l.b16 %v2401_v39  ;;  %v2893_v42 = vunpack.c.h.b16 %v2401_v39  ;;  %2255 = vadd.xlane.f32.xlu1 %v2254_v32  ;;  %2252 = vadd.xlane.f32.xlu0 %v2251_v25  ;;  %v1431_v9 = vld [vmem:[%s6154_s7 + $0x518] sm:$0xff]  ;;  %v2203_v25 = vsel %vm1524_vm0, %v1494_v41, 0.0 }
 0x20e   : > { %v6910_v45 = vsel %vm2987_vm7, %v3714_v33, %v3710_v34  ;;  %v1740_v48 = vpop.xlane.xlu1 %1739  ;;  %v1737_v61 = vpop.xlane.xlu0 %1736  ;;  %v2014_v5 = vsel %vm1524_vm0, %v1431_v9, 0.0  ;;  %v1448_v9 = vld [vmem:[%s6154_s7 + $0x5a0] sm:$0xff] }
 0x20f   : > { %v4025_v52 = vrot.slane %v2892_v16, %v6356_v10  ;;  %v4030_v53 = vrot.slane %v2893_v42, %v6365_v21  ;;  %v2329_v54 = vpack.c.bf16 %v1740_v48, %v1737_v61 }
 0x211   : > { %v4026_v55 = vsel %vm2980_vm6, %v4025_v52, %v6851_v58  ;;  %v2748_v59 = vunpack.c.l.b16 %v2329_v54  ;;  %v2749_v62 = vunpack.c.h.b16 %v2329_v54  ;;  %1823 = vadd.xlane.f32.xlu1 %v1822_v49  ;;  %1820 = vadd.xlane.f32.xlu0 %v1819_v51  ;;  %v1495_v58 = vld [vmem:[%s6154_s7 + $0x718] sm:$0xff]  ;;  %v1873_v51 = vsel %vm1524_vm0, %v1384_v2, 0.0 }
 0x212   : > { %v6921_v63 = vsel %vm2987_vm7, %v4030_v53, %v4026_v55  ;;  %v1932_v13 = vpop.xlane.xlu1 %1931  ;;  %v1929_v3 = vpop.xlane.xlu0 %1928  ;;  %v2206_v32 = vsel %vm1524_vm0, %v1495_v58, 0.0  ;;  %v1512_v58 = vld [vmem:[%s6154_s7 + $0x7a0] sm:$0xff] }
 0x213   : > { %v3314_v8 = vrot.slane %v2748_v59, %v6356_v10  ;;  %v3319_v23 = vrot.slane %v2749_v62, %v6365_v21  ;;  %v2361_v15 = vpack.c.bf16 %v1932_v13, %v1929_v3 }
 0x215   : > { %v3315_v26 = vsel %vm2980_vm6, %v3314_v8, %v6865_v20  ;;  %v2812_v17 = vunpack.c.l.b16 %v2361_v15  ;;  %v2813_v18 = vunpack.c.h.b16 %v2361_v15  ;;  %2015 = vadd.xlane.f32.xlu1 %v2014_v5  ;;  %2012 = vadd.xlane.f32.xlu0 %v2011_v6  ;;  %v1385_v20 = vld [vmem:[%s6154_s7 + $0x3a8] sm:$0xff]  ;;  %v2065_v6 = vsel %vm1524_vm0, %v1448_v9, 0.0 }
 0x216   : > { %v6932_v19 = vsel %vm2987_vm7, %v3319_v23, %v3315_v26  ;;  %v2124_v31 = vpop.xlane.xlu1 %2123  ;;  %v2121_v27 = vpop.xlane.xlu0 %2120  ;;  %v1876_v49 = vsel %vm1524_vm0, %v1385_v20, 0.0  ;;  %v1368_v20 = vld [vmem:[%s6154_s7 + $0x320] sm:$0xff] }
 0x217   : > { %v3630_v43 = vrot.slane %v2812_v17, %v6356_v10  ;;  %v3635_v33 = vrot.slane %v2813_v18, %v6365_v21  ;;  %v2393_v39 = vpack.c.bf16 %v2124_v31, %v2121_v27 }
 0x219   : > { %v3631_v40 = vsel %vm2980_vm6, %v3630_v43, %v6877_v47  ;;  %v2876_v34 = vunpack.c.l.b16 %v2393_v39  ;;  %v2877_v16 = vunpack.c.h.b16 %v2393_v39  ;;  %2207 = vadd.xlane.f32.xlu1 %v2206_v32  ;;  %2204 = vadd.xlane.f32.xlu0 %v2203_v25  ;;  %v1449_v47 = vld [vmem:[%s6154_s7 + $0x5a8] sm:$0xff]  ;;  %v2257_v25 = vsel %vm1524_vm0, %v1512_v58, 0.0 }
 0x21a   : > { %v6943_v42 = vsel %vm2987_vm7, %v3635_v33, %v3631_v40  ;;  %v1794_v48 = vpop.xlane.xlu1 %1793  ;;  %v1791_v61 = vpop.xlane.xlu0 %1790  ;;  %v2068_v5 = vsel %vm1524_vm0, %v1449_v47, 0.0  ;;  %v1432_v47 = vld [vmem:[%s6154_s7 + $0x520] sm:$0xff] }
 0x21b   : > { %v3946_v52 = vrot.slane %v2876_v34, %v6356_v10  ;;  %v3951_v53 = vrot.slane %v2877_v16, %v6365_v21  ;;  %v2338_v54 = vpack.c.bf16 %v1794_v48, %v1791_v61 }
 0x21d   : > { %v3947_v14 = vsel %vm2980_vm6, %v3946_v52, %v6888_v1  ;;  %v2766_v55 = vunpack.c.l.b16 %v2338_v54  ;;  %v2767_v59 = vunpack.c.h.b16 %v2338_v54  ;;  %1877 = vadd.xlane.f32.xlu1 %v1876_v49  ;;  %1874 = vadd.xlane.f32.xlu0 %v1873_v51  ;;  %v1513_v1 = vld [vmem:[%s6154_s7 + $0x7a8] sm:$0xff]  ;;  %v1825_v51 = vsel %vm1524_vm0, %v1368_v20, 0.0 }
 0x21e   : > { %v6954_v62 = vsel %vm2987_vm7, %v3951_v53, %v3947_v14  ;;  %v1986_v13 = vpop.xlane.xlu1 %1985  ;;  %v1983_v3 = vpop.xlane.xlu0 %1982  ;;  %v2260_v32 = vsel %vm1524_vm0, %v1513_v1, 0.0  ;;  %v1496_v1 = vld [vmem:[%s6154_s7 + $0x720] sm:$0xff] }
 0x21f   : > { %v3403_v8 = vrot.slane %v2766_v55, %v6371_v30  ;;  %v3408_v23 = vrot.slane %v2767_v59, %v6377_v35  ;;  %v2370_v15 = vpack.c.bf16 %v1986_v13, %v1983_v3 }
 0x221   : > { %v3404_v41 = vsel %vm2994_vm8, %v3403_v8, %v6899_v24  ;;  %v2830_v26 = vunpack.c.l.b16 %v2370_v15  ;;  %v2831_v17 = vunpack.c.h.b16 %v2370_v15  ;;  %2069 = vadd.xlane.f32.xlu1 %v2068_v5  ;;  %2066 = vadd.xlane.f32.xlu0 %v2065_v6  ;;  %v1369_v24 = vld [vmem:[%s6154_s7 + $0x328] sm:$0xff]  ;;  %v2017_v6 = vsel %vm1524_vm0, %v1432_v47, 0.0 }
 0x222   : > { %v6965_v18 = vsel %vm7692_vm9, %v3408_v23, %v3404_v41  ;;  %v2178_v31 = vpop.xlane.xlu1 %2177  ;;  %v2175_v27 = vpop.xlane.xlu0 %2174  ;;  %v1828_v49 = vsel %vm1524_vm0, %v1369_v24, 0.0  ;;  %v1386_v24 = vld [vmem:[%s6154_s7 + $0x3b0] sm:$0xff] }
 0x223   : > { %v3719_v43 = vrot.slane %v2830_v26, %v6371_v30  ;;  %v3724_v33 = vrot.slane %v2831_v17, %v6377_v35  ;;  %v2402_v39 = vpack.c.bf16 %v2178_v31, %v2175_v27 }
 0x225   : > { %v3720_v2 = vsel %vm2994_vm8, %v3719_v43, %v6910_v45  ;;  %v2894_v40 = vunpack.c.l.b16 %v2402_v39  ;;  %v2895_v34 = vunpack.c.h.b16 %v2402_v39  ;;  %2261 = vadd.xlane.f32.xlu1 %v2260_v32  ;;  %2258 = vadd.xlane.f32.xlu0 %v2257_v25  ;;  %v1433_v45 = vld [vmem:[%s6154_s7 + $0x528] sm:$0xff]  ;;  %v2209_v25 = vsel %vm1524_vm0, %v1496_v1, 0.0 }
 0x226   : > { %v6976_v16 = vsel %vm7692_vm9, %v3724_v33, %v3720_v2  ;;  %v1746_v48 = vpop.xlane.xlu1 %1745  ;;  %v1743_v61 = vpop.xlane.xlu0 %1742  ;;  %v2020_v5 = vsel %vm1524_vm0, %v1433_v45, 0.0 }
 0x227   : > { %v4035_v52 = vrot.slane %v2894_v40, %v6371_v30  ;;  %v4040_v53 = vrot.slane %v2895_v34, %v6377_v35  ;;  %v2330_v54 = vpack.c.bf16 %v1746_v48, %v1743_v61 }
 0x229   : > { %v4036_v9 = vsel %vm2994_vm8, %v4035_v52, %v6921_v63  ;;  %v2750_v14 = vunpack.c.l.b16 %v2330_v54  ;;  %v2751_v55 = vunpack.c.h.b16 %v2330_v54  ;;  %1829 = vadd.xlane.f32.xlu1 %v1828_v49  ;;  %1826 = vadd.xlane.f32.xlu0 %v1825_v51  ;;  %v1497_v63 = vld [vmem:[%s6154_s7 + $0x728] sm:$0xff]  ;;  %v1879_v51 = vsel %vm1524_vm0, %v1386_v24, 0.0  ;;  %v1450_v54 = vld [vmem:[%s6154_s7 + $0x5b0] sm:$0xff] }
 0x22a   : > { %v6987_v59 = vsel %vm7692_vm9, %v4040_v53, %v4036_v9  ;;  %v1938_v13 = vpop.xlane.xlu1 %1937  ;;  %v1935_v3 = vpop.xlane.xlu0 %1934  ;;  %v2212_v32 = vsel %vm1524_vm0, %v1497_v63, 0.0  ;;  %v1451_v53 = vld [vmem:[%s6154_s7 + $0x5b8] sm:$0xff]  ;;  %v1370_v63 = vld [vmem:[%s6154_s7 + $0x330] sm:$0xff] }
 0x22b   : > { %v3324_v8 = vrot.slane %v2750_v14, %v6371_v30  ;;  %v3329_v23 = vrot.slane %v2751_v55, %v6377_v35  ;;  %v2362_v15 = vpack.c.bf16 %v1938_v13, %v1935_v3  ;;  %v2074_v55 = vsel %vm1524_vm0, %v1451_v53, 0.0  ;;  %v1515_v3 = vld [vmem:[%s6154_s7 + $0x7b8] sm:$0xff] }
 0x22c   : > { %v2071_v13 = vsel %vm1524_vm0, %v1450_v54, 0.0 }
 0x22d   : > { %v3325_v58 = vsel %vm2994_vm8, %v3324_v8, %v6932_v19  ;;  %v2814_v41 = vunpack.c.l.b16 %v2362_v15  ;;  %v2815_v26 = vunpack.c.h.b16 %v2362_v15  ;;  %2021 = vadd.xlane.f32.xlu1 %v2020_v5  ;;  %2018 = vadd.xlane.f32.xlu0 %v2017_v6  ;;  %v1387_v19 = vld [vmem:[%s6154_s7 + $0x3b8] sm:$0xff]  ;;  %v1514_v5 = vld [vmem:[%s6154_s7 + $0x7b0] sm:$0xff]  ;;  %v2266_v8 = vsel %vm1524_vm0, %v1515_v3, 0.0 }
 0x22e   : > { %v6998_v17 = vsel %vm7692_vm9, %v3329_v23, %v3325_v58  ;;  %v2130_v31 = vpop.xlane.xlu1 %2129  ;;  %v2127_v27 = vpop.xlane.xlu0 %2126  ;;  %v1882_v49 = vsel %vm1524_vm0, %v1387_v19, 0.0  ;;  %v2263_v23 = vsel %vm1524_vm0, %v1514_v5, 0.0  ;;  %v1371_v15 = vld [vmem:[%s6154_s7 + $0x338] sm:$0xff]  ;;  %v1498_v19 = vld [vmem:[%s6154_s7 + $0x730] sm:$0xff] }
 0x22f   : > { %v3640_v43 = vrot.slane %v2814_v41, %v6371_v30  ;;  %v3645_v33 = vrot.slane %v2815_v26, %v6377_v35  ;;  %v2394_v39 = vpack.c.bf16 %v2130_v31, %v2127_v27  ;;  %v1834_v41 = vsel %vm1524_vm0, %v1371_v15, 0.0  ;;  %v1435_v31 = vld [vmem:[%s6154_s7 + $0x538] sm:$0xff]  ;;  %v1434_v27 = vld [vmem:[%s6154_s7 + $0x530] sm:$0xff]  ;;  %v1516_v15 = vld [vmem:[%s6154_s7 + $0x7c0] sm:$0xff] }
 0x230   : > { %v1831_v26 = vsel %vm1524_vm0, %v1370_v63, 0.0 }
 0x231   : > { %v3641_v20 = vsel %vm2994_vm8, %v3640_v43, %v6943_v42  ;;  %v2878_v2 = vunpack.c.l.b16 %v2394_v39  ;;  %v2879_v40 = vunpack.c.h.b16 %v2394_v39  ;;  %2213 = vadd.xlane.f32.xlu1 %v2212_v32  ;;  %2210 = vadd.xlane.f32.xlu0 %v2209_v25  ;;  %v2026_v43 = vsel %vm1524_vm0, %v1435_v31, 0.0  ;;  %v1499_v39 = vld [vmem:[%s6154_s7 + $0x738] sm:$0xff] }
 0x232   : > { %v7009_v34 = vsel %vm7692_vm9, %v3645_v33, %v3641_v20  ;;  %v7011_v48 = vpop.xlane.xlu1 %1799  ;;  %v7013_v61 = vpop.xlane.xlu0 %1796  ;;  %v2023_v33 = vsel %vm1524_vm0, %v1434_v27, 0.0  ;;  %v2269_v31 = vsel %vm1524_vm0, %v1516_v15, 0.0 }
 0x233   : > { %v3956_v52 = vrot.slane %v2878_v2, %v6371_v30  ;;  %v3961_v42 = vrot.slane %v2879_v40, %v6377_v35  ;;  %v2218_v2 = vsel %vm1524_vm0, %v1499_v39, 0.0  ;;  %v2215_v40 = vsel %vm1524_vm0, %v1498_v19, 0.0 }
 0x234   : > { %v2339_v27 = vpack.c.bf16 %v7011_v48, %v7013_v61 }
 0x235   : > { %v3957_v45 = vsel %vm2994_vm8, %v3956_v52, %v6954_v62  ;;  %1883 = vadd.xlane.f32.xlu1 %v1882_v49  ;;  %1880 = vadd.xlane.f32.xlu0 %v1879_v51  ;;  %v1389_v49 = vld [vmem:[%s6154_s7 + $0x3c8] sm:$0xff]  ;;  %v1388_v51 = vld [vmem:[%s6154_s7 + $0x3c0] sm:$0xff] }
 0x236   : > { %v7024_v47 = vsel %vm7692_vm9, %v3961_v42, %v3957_v45  ;;  %v7026_v9 = vpop.xlane.xlu1 %1991  ;;  %v1989_v14 = vpop.xlane.xlu0 %1988  ;;  %v1888_v53 = vsel %vm1524_vm0, %v1389_v49, 0.0  ;;  %v1885_v54 = vsel %vm1524_vm0, %v1388_v51, 0.0  ;;  %v1453_v45 = vld [vmem:[%s6154_s7 + $0x5c8] sm:$0xff]  ;;  %vm4230_vm9 = vcmask 1041409  }
 0x237   : > { %v2080_v5 = vsel %vm1524_vm0, %v1453_v45, 0.0  ;;  %v2371_v39 = vpack.c.bf16 %v7026_v9, %v1989_v14  ;;  %v1437_v51 = vld [vmem:[%s6154_s7 + $0x548] sm:$0xff]  ;;  %v2768_v9 = vunpack.c.l.b16 %v2339_v27  ;;  %v1500_v14 = vld [vmem:[%s6154_s7 + $0x740] sm:$0xff] }
 0x239   : > { %2075 = vadd.xlane.f32.xlu1 %v2074_v55  ;;  %2072 = vadd.xlane.f32.xlu0 %v2071_v13  ;;  %v1452_v55 = vld [vmem:[%s6154_s7 + $0x5c0] sm:$0xff]  ;;  %v2832_v45 = vunpack.c.l.b16 %v2371_v39  ;;  %v2833_v35 = vunpack.c.h.b16 %v2371_v39 }
 0x23a   : > { %v2184_v62 = vpop.xlane.xlu1 %2183  ;;  %v2181_v6 = vpop.xlane.xlu0 %2180 }
 0x23b   : > { %v7075_v19 = vpack.c.bf16 %v2184_v62, %v2181_v6  ;;  %v1391_v62 = vld [vmem:[%s6154_s7 + $0x3d8] sm:$0xff]  ;;  %v1390_v6 = vld [vmem:[%s6154_s7 + $0x3d0] sm:$0xff]  ;;  %v3729_v30 = vrot.slane %v2832_v45, %v6391_v56 }
 0x23d   : > { %2267 = vadd.xlane.f32.xlu1 %v2266_v8  ;;  %2264 = vadd.xlane.f32.xlu0 %v2263_v23  ;;  %v2077_v8 = vsel %vm1524_vm0, %v1452_v55, 0.0  ;;  %v1517_v23 = vld [vmem:[%s6154_s7 + $0x7c8] sm:$0xff]  ;;  %v1455_v55 = vld [vmem:[%s6154_s7 + $0x5d8] sm:$0xff] }
 0x23e   : > { %v1752_v1 = vpop.xlane.xlu1 %1751  ;;  %v1749_v58 = vpop.xlane.xlu0 %1748 }
 0x241   : > { %1835 = vadd.xlane.f32.xlu1 %v1834_v41  ;;  %1832 = vadd.xlane.f32.xlu0 %v1831_v26  ;;  %v2272_v26 = vsel %vm1524_vm0, %v1517_v23, 0.0  ;;  %v1454_v23 = vld [vmem:[%s6154_s7 + $0x5d0] sm:$0xff] }
 0x242   : > { %v7040_v32 = vpop.xlane.xlu1 %1943  ;;  %v7042_v25 = vpop.xlane.xlu0 %1940 }
 0x245   : > { %2027 = vadd.xlane.f32.xlu1 %v2026_v43  ;;  %2024 = vadd.xlane.f32.xlu0 %v2023_v33  ;;  %v1373_v43 = vld [vmem:[%s6154_s7 + $0x348] sm:$0xff]  ;;  %v1372_v33 = vld [vmem:[%s6154_s7 + $0x340] sm:$0xff] }
 0x246   : > { %v7048_v24 = vpop.xlane.xlu1 %2135  ;;  %v7050_v20 = vpop.xlane.xlu0 %2132  ;;  %v1840_v48 = vsel %vm1524_vm0, %v1373_v43, 0.0  ;;  %v1837_v61 = vsel %vm1524_vm0, %v1372_v33, 0.0  ;;  %v2221_v43 = vsel %vm1524_vm0, %v1500_v14, 0.0  ;;  %v1894_v33 = vsel %vm1524_vm0, %v1391_v62, 0.0  ;;  %v1374_v62 = vld [vmem:[%s6154_s7 + $0x350] sm:$0xff] }
 0x247   : > { %v7114_v14 = vsel %vm1524_vm0, %v1454_v23, 0.0 }
 0x249   : > { %2219 = vadd.xlane.f32.xlu1 %v2218_v2  ;;  %2216 = vadd.xlane.f32.xlu0 %v2215_v40  ;;  %v7077_v2 = vpack.c.bf16 %v1752_v1, %v1749_v58  ;;  %v2896_v1 = vunpack.c.l.b16 %v7075_v19  ;;  %v2032_v58 = vsel %vm1524_vm0, %v1437_v51, 0.0  ;;  %v3413_v51 = vrot.slane %v2768_v9, %v6391_v56 }
 0x24a   : > { %v1806_v52 = vpop.xlane.xlu1 %1805  ;;  %v1803_v42 = vpop.xlane.xlu0 %1802 }
 0x24b   : > { %v2752_v15 = vunpack.c.l.b16 %v7077_v2 }
 0x24d   : > { %1889 = vadd.xlane.f32.xlu1 %v1888_v53  ;;  %1886 = vadd.xlane.f32.xlu0 %v1885_v54  ;;  %v1436_v53 = vld [vmem:[%s6154_s7 + $0x540] sm:$0xff]  ;;  %v1501_v54 = vld [vmem:[%s6154_s7 + $0x748] sm:$0xff]  ;;  %v3334_v39 = vrot.slane %v2752_v15, %v6391_v56 }
 0x24e   : > { %v1998_v13 = vpop.xlane.xlu1 %1997  ;;  %v1995_v3 = vpop.xlane.xlu0 %1994 }
 0x24f   : > { %v2372_v21 = vpack.c.bf16 %v1998_v13, %v1995_v3  ;;  %v7128_v3 = vsel %vm1524_vm0, %v1519_v28, 0.0  ;;  %v3734_v28 = vrot.slane %v2833_v35, %v6399_v0 }
 0x251   : > { %2081 = vadd.xlane.f32.xlu1 %v2080_v5  ;;  %2078 = vadd.xlane.f32.xlu0 %v2077_v8  ;;  %v2029_v5 = vsel %vm1524_vm0, %v1436_v53, 0.0  ;;  %v2224_v8 = vsel %vm1524_vm0, %v1501_v54, 0.0  ;;  %v2340_v53 = vpack.c.bf16 %v1806_v52, %v1803_v42  ;;  %v7107_v54 = vsel %vm1524_vm0, %v1455_v55, 0.0 }
 0x252   : > { %v7064_v63 = vpop.xlane.xlu1 %2189  ;;  %v7066_v41 = vpop.xlane.xlu0 %2186  ;;  %v2753_v52 = vunpack.c.h.b16 %v7077_v2  ;;  %v2363_v42 = vpack.c.bf16 %v7040_v32, %v7042_v25  ;;  %v7134_v2 = vsel %vm1524_vm0, %v1375_v57, 0.0  ;;  %v3414_v32 = vsel %vm3008_vm10, %v3413_v51, %v6965_v18  ;;  %v1438_v51 = vld [vmem:[%s6154_s7 + $0x550] sm:$0xff] }
 0x253   : > { %v2770_v45 = vunpack.c.l.b16 %v2340_v53  ;;  %v7140_v55 = vsel %vm1524_vm0, %v1374_v62, 0.0  ;;  %v2404_v57 = vpack.c.bf16 %v7064_v63, %v7066_v41  ;;  %v2771_v63 = vunpack.c.h.b16 %v2340_v53 }
 0x254   : > { %v3339_v23 = vrot.slane %v2753_v52, %v6399_v0  ;;  %v2816_v15 = vunpack.c.l.b16 %v2363_v42  ;;  %v2817_v35 = vunpack.c.h.b16 %v2363_v42  ;;  %v2835_v62 = vunpack.c.h.b16 %v2372_v21 }
 0x255   : > { %2273 = vadd.xlane.f32.xlu1 %v2272_v26  ;;  %2270 = vadd.xlane.f32.xlu0 %v2269_v31  ;;  %v2898_v52 = vunpack.c.l.b16 %v2404_v57 }
 0x256   : > { %v7079_v40 = vpop.xlane.xlu1 %1757  ;;  %v7081_v49 = vpop.xlane.xlu0 %1754  ;;  %v3650_v53 = vrot.slane %v2816_v15, %v6391_v56  ;;  %v3655_v42 = vrot.slane %v2817_v35, %v6399_v0 }
 0x258   : > { %v3651_v15 = vsel %vm3008_vm10, %v3650_v53, %v7009_v34 }
 0x259   : > { %1841 = vadd.xlane.f32.xlu1 %v1840_v48  ;;  %1838 = vadd.xlane.f32.xlu0 %v1837_v61  ;;  %v1891_v48 = vsel %vm1524_vm0, %v1390_v6, 0.0  ;;  %v2769_v61 = vunpack.c.h.b16 %v2339_v27  ;;  %v2897_v6 = vunpack.c.h.b16 %v7075_v19  ;;  %v4045_v27 = vrot.slane %v2896_v1, %v6391_v56 }
 0x25a   : > { %v7098_v26 = vpop.xlane.xlu1 %1949  ;;  %v7100_v31 = vpop.xlane.xlu0 %1946  ;;  %v7131_v19 = vsel %vm1524_vm0, %v1518_v37, 0.0  ;;  %v3730_v1 = vsel %vm3008_vm10, %v3729_v30, %v6976_v16  ;;  %v2834_v37 = vunpack.c.l.b16 %v2372_v21  ;;  %v3335_v30 = vsel %vm3008_vm10, %v3334_v39, %v6998_v17 }
 0x25b   : > { %v3418_v25 = vrot.slane %v2769_v61, %v6399_v0  ;;  %v4046_v18 = vsel %vm3008_vm10, %v4045_v27, %v6987_v59  ;;  %v7156_v16 = vpack.c.bf16 %v7048_v24, %v7050_v20  ;;  %v3423_v59 = vrot.slane %v2770_v45, %v6406_v11 }
 0x25c   : > { %v3735_v17 = vsel %vm3015_vm11, %v3734_v28, %v3730_v1  ;;  %v7168_v20 = vsel %vm3015_vm11, %v3339_v23, %v3335_v30  ;;  %v7172_v21 = vsel %vm1524_vm0, %v1438_v51, 0.0  ;;  %v3744_v28 = vrot.slane %v2835_v62, %v6409_v12 }
 0x25d   : > { %2033 = vadd.xlane.f32.xlu1 %v2032_v58  ;;  %2030 = vadd.xlane.f32.xlu0 %v2029_v5  ;;  %v1439_v58 = vld [vmem:[%s6154_s7 + $0x558] sm:$0xff]  ;;  %v4050_v5 = vrot.slane %v2897_v6, %v6399_v0  ;;  %v2880_v39 = vunpack.c.l.b16 %v7156_v16  ;;  %v2881_v30 = vunpack.c.h.b16 %v7156_v16 }
 0x25e   : > { %v7123_v9 = vpop.xlane.xlu1 %2141  ;;  %v7125_v13 = vpop.xlane.xlu0 %2138  ;;  %v7161_v27 = vsel %vm1524_vm0, %v1439_v58, 0.0 }
 0x25f   : > { %v4051_v24 = vsel %vm3015_vm11, %v4050_v5, %v4046_v18  ;;  %v7184_v5 = vpack.c.bf16 %v7098_v26, %v7100_v31 }
 0x261   : > { %2225 = vadd.xlane.f32.xlu1 %v2224_v8  ;;  %2222 = vadd.xlane.f32.xlu0 %v2221_v43  ;;  %v3419_v8 = vsel %vm3015_vm11, %v3418_v25, %v3414_v32  ;;  %v3739_v43 = vrot.slane %v2834_v37, %v6406_v11  ;;  %v3428_v32 = vrot.slane %v2771_v63, %v6409_v12  ;;  %v2899_v37 = vunpack.c.h.b16 %v2404_v57 }
 0x262   : > { %v1812_v41 = vpop.xlane.xlu1 %1811  ;;  %v1809_v61 = vpop.xlane.xlu0 %1808  ;;  %v3424_v18 = vsel %vm3022_vm12, %v3423_v59, %v3419_v8  ;;  %v3966_v63 = vrot.slane %v2880_v39, %v6391_v56 }
 0x263   : > { %v2341_v6 = vpack.c.bf16 %v1812_v41, %v1809_v61  ;;  %v3740_v23 = vsel %vm3022_vm12, %v3739_v43, %v3735_v17  ;;  %v3429_v41 = vsel %vm3029_vm13, %v3428_v32, %v3424_v18 }
 0x264   : > { %v3745_v51 = vsel %vm3029_vm13, %v3744_v28, %v3740_v23 }
 0x265   : > { %1895 = vadd.xlane.f32.xlu1 %v1894_v33  ;;  %1892 = vadd.xlane.f32.xlu0 %v1891_v48  ;;  %v2772_v25 = vunpack.c.l.b16 %v2341_v6  ;;  %v4055_v33 = vrot.slane %v2898_v52, %v6406_v11  ;;  %v2332_v48 = vpack.c.bf16 %v7079_v40, %v7081_v49  ;;  %v2773_v40 = vunpack.c.h.b16 %v2341_v6 }
 0x266   : > { %v2004_v45 = vpop.xlane.xlu1 %2003  ;;  %v2001_v1 = vpop.xlane.xlu0 %2000  ;;  %v7203_v6 = vpack.c.bf16 %v7123_v9, %v7125_v13 }
 0x267   : > { %v2373_v58 = vpack.c.bf16 %v2004_v45, %v2001_v1  ;;  %v3433_v49 = vrot.slane %v2772_v25, %v6420_v29  ;;  %v2754_v59 = vunpack.c.l.b16 %v2332_v48  ;;  %v4056_v62 = vsel %vm3022_vm12, %v4055_v33, %v4051_v24 }
 0x268   : > { %v2755_v52 = vunpack.c.h.b16 %v2332_v48  ;;  %v3438_v53 = vrot.slane %v2773_v40, %v6427_v36  ;;  %v2819_v1 = vunpack.c.h.b16 %v7184_v5  ;;  %v2882_v33 = vunpack.c.l.b16 %v7203_v6 }
 0x269   : > { %v2836_v57 = vunpack.c.l.b16 %v2373_v58  ;;  %v2837_v35 = vunpack.c.h.b16 %v2373_v58  ;;  %2087 = vadd.xlane.f32.xlu1 %v7107_v54  ;;  %2084 = vadd.xlane.f32.xlu0 %v7114_v14  ;;  %v4060_v54 = vrot.slane %v2899_v37, %v6409_v12  ;;  %v2818_v14 = vunpack.c.l.b16 %v7184_v5 }
 0x26a   : > { %v2196_v26 = vpop.xlane.xlu1 %2195  ;;  %v2193_v31 = vpop.xlane.xlu0 %2192  ;;  %v3434_v24 = vsel %vm3036_vm14, %v3433_v49, %v3429_v41  ;;  %v3656_v58 = vsel %vm3015_vm11, %v3655_v42, %v3651_v15  ;;  %v3971_v48 = vrot.slane %v2881_v30, %v6399_v0  ;;  %v1503_v49 = vld [vmem:[%s6154_s7 + $0x758] sm:$0xff]  ;;  %v2883_v41 = vunpack.c.h.b16 %v7203_v6 }
 0x26b   : > { %v3749_v61 = vrot.slane %v2836_v57, %v6420_v29  ;;  %v3754_v34 = vrot.slane %v2837_v35, %v6427_v36  ;;  %v2405_v16 = vpack.c.bf16 %v2196_v26, %v2193_v31  ;;  %v4061_v37 = vsel %vm3029_vm13, %v4060_v54, %v4056_v62  ;;  %v1502_v26 = vld [vmem:[%s6154_s7 + $0x750] sm:$0xff] }
 0x26c   : > { %v3660_v18 = vrot.slane %v2818_v14, %v6406_v11  ;;  %v3439_v42 = vsel %vm3043_vm15, %v3438_v53, %v3434_v24  ;;  %v3967_v35 = vsel %vm3008_vm10, %v3966_v63, %v7024_v47  ;;  %v3665_v31 = vrot.slane %v2819_v1, %v6409_v12 }
 0x26d   : > { %v2900_v8 = vunpack.c.l.b16 %v2405_v16  ;;  %v2901_v17 = vunpack.c.h.b16 %v2405_v16  ;;  %2279 = vadd.xlane.f32.xlu1 %v7128_v3  ;;  %2276 = vadd.xlane.f32.xlu0 %v7131_v19  ;;  %v3750_v43 = vsel %vm3036_vm14, %v3749_v61, %v3745_v51  ;;  %v3344_v19 = vrot.slane %v2754_v59, %v6406_v11 }
 0x26e   : > { %v1764_v39 = vpop.xlane.xlu1 %1763  ;;  %v1761_v32 = vpop.xlane.xlu0 %1760  ;;  %v3755_v25 = vsel %vm3043_vm15, %v3754_v34, %v3750_v43  ;;  %v1393_v34 = vld [vmem:[%s6154_s7 + $0x3e8] sm:$0xff]  ;;  %v3661_v16 = vsel %vm3022_vm12, %v3660_v18, %v3656_v58  ;;  %v3976_v47 = vrot.slane %v2882_v33, %v6406_v11  ;;  %v2230_v62 = vsel %vm1524_vm0, %v1503_v49, 0.0 }
 0x26f   : > { %v4065_v9 = vrot.slane %v2900_v8, %v6420_v29  ;;  %v4070_v13 = vrot.slane %v2901_v17, %v6427_v36  ;;  %v2333_v45 = vpack.c.bf16 %v1764_v39, %v1761_v32  ;;  %v4232_v3 = vsel %vm4230_vm9, %v3755_v25, %v6510_v22 }
 0x270   : > { %v4240_v28 = vpack.c.b16 %v4232_v3, %v4232_v3  ;;  %v3345_v30 = vsel %vm3022_vm12, %v3344_v19, %v7168_v20  ;;  %v2227_v6 = vsel %vm1524_vm0, %v1502_v26, 0.0  ;;  %v3666_v39 = vsel %vm3029_vm13, %v3665_v31, %v3661_v16  ;;  %v1521_v26 = vld [vmem:[%s6154_s7 + $0x7e8] sm:$0xff] }
 0x271   : > { %1847 = vadd.xlane.f32.xlu1 %v7134_v2  ;;  %1844 = vadd.xlane.f32.xlu0 %v7140_v55  ;;  %v4066_v22 = vsel %vm3036_vm14, %v4065_v9, %v4061_v37  ;;  %v2756_v5 = vunpack.c.l.b16 %v2333_v45  ;;  %v3349_v2 = vrot.slane %v2755_v52, %v6409_v12  ;;  %v2757_v54 = vunpack.c.h.b16 %v2333_v45 }
 0x272   : > { %v1956_v23 = vpop.xlane.xlu1 %1955  ;;  %4927 = vmatprep.mubr.bf16.mxu1 %v4240_v28  ;;  %v1953_v57 = vpop.xlane.xlu0 %1952  ;;  %v4071_v15 = vsel %vm3043_vm15, %v4070_v13, %v4066_v22  ;;  %v1900_v52 = vsel %vm1524_vm0, %v1393_v34, 0.0  ;;  %v3981_v32 = vrot.slane %v2883_v41, %v6409_v12  ;;  %v2284_v16 = vsel %vm1524_vm0, %v1521_v26, 0.0  ;;  %v1395_v26 = vld [vmem:[%s6154_s7 + $0x3f8] sm:$0xff] }
 0x273   : > { %v2365_v40 = vpack.c.bf16 %v1956_v23, %v1953_v57  ;;  %v4236_v55 = vsel %vm4230_vm9, %v4071_v15, %v3439_v42  ;;  %v3354_v20 = vrot.slane %v2756_v5, %v6420_v29  ;;  %v3350_v53 = vsel %vm3029_vm13, %v3349_v2, %v3345_v30  ;;  %v1456_v5 = vld [vmem:[%s6154_s7 + $0x5e0] sm:$0xff] }
 0x274   : > { %v4244_v61 = vpack.c.b16 %v4236_v55, %v4236_v55  ;;  %v3359_v45 = vrot.slane %v2757_v54, %v6427_v36  ;;  %v5423_v15 = vld [vmem:[%s6152_s6 + $0x104] ss:$8 sps:$4 sm:$0xff]   ;;  %v5421_v30 = vld [vmem:[%s6152_s6 + $0x100] ss:$8 sps:$4 sm:$0xff]  }
 0x275   : > { %v2820_v63 = vunpack.c.l.b16 %v2365_v40  ;;  %v2821_v51 = vunpack.c.h.b16 %v2365_v40  ;;  %2039 = vadd.xlane.f32.xlu1 %v7161_v27  ;;  %2036 = vadd.xlane.f32.xlu0 %v7172_v21  ;;  %v1392_v27 = vld [vmem:[%s6154_s7 + $0x3e0] sm:$0xff]  ;;  %v3972_v21 = vsel %vm3015_vm11, %v3971_v48, %v3967_v35  ;;  %v3355_v37 = vsel %vm3036_vm14, %v3354_v20, %v3350_v53  ;;  %v1457_v48 = vld [vmem:[%s6154_s7 + $0x5e8] sm:$0xff] }
 0x276   : > { %v2148_v59 = vpop.xlane.xlu1 %2147  ;;  %5009 = vmatprep.mubr.bf16.mxu0 %v4244_v61  ;;  %v2145_v14 = vpop.xlane.xlu0 %2144  ;;  %v3977_v25 = vsel %vm3022_vm12, %v3976_v47, %v3972_v21  ;;  %v1897_v1 = vsel %vm1524_vm0, %v1392_v27, 0.0  ;;  %v2092_v40 = vsel %vm1524_vm0, %v1457_v48, 0.0  ;;  %v3360_v55 = vsel %vm3043_vm15, %v3359_v45, %v3355_v37  ;;  %v1520_v61 = vld [vmem:[%s6154_s7 + $0x7e0] sm:$0xff]  ;;  %4936 = vmatprep.subr.bf16.mxu1 %v5423_v15 }
 0x277   : > { %v3670_v8 = vrot.slane %v2820_v63, %v6420_v29  ;;  %v3675_v17 = vrot.slane %v2821_v51, %v6427_v36  ;;  %v2397_v43 = vpack.c.bf16 %v2148_v59, %v2145_v14  ;;  %v3982_v23 = vsel %vm3029_vm13, %v3981_v32, %v3977_v25  ;;  %v5426_v47 = vld [vmem:[%s6152_s6 + $0x304] ss:$8 sps:$4 sm:$0xff]   ;;  %v5429_v63 = vld [vmem:[%s6152_s6 + $0x114] ss:$8 sps:$4 sm:$0xff]   ;;  %v5424_v14 = vld [vmem:[%s6152_s6 + $0x300] ss:$8 sps:$4 sm:$0xff]  }
 0x278   : > { %v2281_v20 = vsel %vm1524_vm0, %v1520_v61, 0.0  ;;  %v1377_v59 = vld [vmem:[%s6154_s7 + $0x368] sm:$0xff]  ;;  %5018 = vmatprep.subr.bf16.mxu0 %v5426_v47  ;;  %v5433_v25 = vld [vmem:[%s6152_s6 + $0x310] ss:$8 sps:$4 sm:$0xff]  }
 0x279   : > { %v2884_v24 = vunpack.c.l.b16 %v2397_v43  ;;  %v2885_v9 = vunpack.c.h.b16 %v2397_v43  ;;  %2231 = vadd.xlane.f32.xlu1 %v2230_v62  ;;  %2228 = vadd.xlane.f32.xlu0 %v2227_v6  ;;  %v3671_v13 = vsel %vm3036_vm14, %v3670_v8, %v3666_v39  ;;  %v5427_v62 = vld [vmem:[%s6152_s6 + $0x110] ss:$8 sps:$4 sm:$0xff]   ;;  %v1376_v8 = vld [vmem:[%s6154_s7 + $0x360] sm:$0xff]  ;;  %v1441_v39 = vld [vmem:[%s6154_s7 + $0x568] sm:$0xff] }
 0x27a   : > { %v1866_v3 = vpop.xlane.xlu1 %1865  ;;  %v1863_v19 = vpop.xlane.xlu0 %1862  ;;  %v3676_v28 = vsel %vm3043_vm15, %v3675_v17, %v3671_v13  ;;  %v1852_v17 = vsel %vm1524_vm0, %v1377_v59, 0.0  ;;  %v5432_v43 = vld [vmem:[%s6152_s6 + $0x124] ss:$8 sps:$4 sm:$0xff]   ;;  %v1849_v53 = vsel %vm1524_vm0, %v1376_v8, 0.0  ;;  %v5430_v32 = vld [vmem:[%s6152_s6 + $0x120] ss:$8 sps:$4 sm:$0xff]  }
 0x27b   : > { %v3986_v58 = vrot.slane %v2884_v24, %v6420_v29  ;;  %v3991_v18 = vrot.slane %v2885_v9, %v6427_v36  ;;  %v7261_v33 = vpack.c.bf16 %v1866_v3, %v1863_v19  ;;  %v4231_v22 = vsel %vm4230_vm9, %v3676_v28, %v6445_v7  ;;  %v1440_v9 = vld [vmem:[%s6154_s7 + $0x560] sm:$0xff]  ;;  %v5438_v19 = vld [vmem:[%s6152_s6 + $0x134] ss:$8 sps:$4 sm:$0xff]  }
 0x27c   : > { %v4239_v57 = vpack.c.b16 %v4231_v22, %v4231_v22  ;;  %v2089_v7 = vsel %vm1524_vm0, %v1456_v5, 0.0  ;;  %v2044_v3 = vsel %vm1524_vm0, %v1441_v39, 0.0  ;;  %v5436_v22 = vld [vmem:[%s6152_s6 + $0x130] ss:$8 sps:$4 sm:$0xff]   ;;  %v5439_v48 = vld [vmem:[%s6152_s6 + $0x320] ss:$8 sps:$4 sm:$0xff]  }
 0x27d   : > { %1901 = vadd.xlane.f32.xlu1 %v1900_v52  ;;  %1898 = vadd.xlane.f32.xlu0 %v1897_v1  ;;  %v3987_v42 = vsel %vm3036_vm14, %v3986_v58, %v3982_v23  ;;  %v5435_v52 = vld [vmem:[%s6152_s6 + $0x314] ss:$8 sps:$4 sm:$0xff]   ;;  %v2790_v13 = vunpack.c.l.b16 %v7261_v33  ;;  %v2791_v45 = vunpack.c.h.b16 %v7261_v33  ;;  %v5441_v1 = vld [vmem:[%s6152_s6 + $0x324] ss:$8 sps:$4 sm:$0xff]   ;;  %v2041_v58 = vsel %vm1524_vm0, %v1440_v9, 0.0 }
 0x27e   : > { %v2058_v35 = vpop.xlane.xlu1 %2057  ;;  %4928 = vmatmul.mubr.bf16.vlgmr.msra.gmra.mrb[0].mxu1 %v4239_v57  ;;  %v2055_v2 = vpop.xlane.xlu0 %2054  ;;  %v3992_v49 = vsel %vm3043_vm15, %v3991_v18, %v3987_v42  ;;  %v1505_v18 = vld [vmem:[%s6154_s7 + $0x768] sm:$0xff]  ;;  %v1504_v23 = vld [vmem:[%s6154_s7 + $0x760] sm:$0xff]  ;;  %v1394_v47 = vld [vmem:[%s6154_s7 + $0x3f0] sm:$0xff]  ;;  %v1906_v59 = vsel %vm1524_vm0, %v1395_v26, 0.0 }
 0x27f   : > { %v7276_v31 = vpack.c.bf16 %v2058_v35, %v2055_v2  ;;  %v4235_v41 = vsel %vm4230_vm9, %v3992_v49, %v3360_v55  ;;  %4937 = vmatpush1.bf16.msra.mxu1 %v5421_v30  ;;  %v3522_v33 = vrot.slane %v2790_v13, %v6319_v38  ;;  %v3526_v57 = vrot.slane %v2791_v45, %v6328_v46  ;;  %v5444_v2 = vld [vmem:[%s6152_s6 + $0x144] ss:$8 sps:$4 sm:$0xff]   ;;  %v5442_v30 = vld [vmem:[%s6152_s6 + $0x140] ss:$8 sps:$4 sm:$0xff]   ;;  %v1458_v39 = vld [vmem:[%s6154_s7 + $0x5f0] sm:$0xff] }
 0x280   : > { %v4243_v34 = vpack.c.b16 %v4235_v41, %v4235_v41  ;;  %4938 = vmatprep.subr.bf16.mxu1 %v5429_v63  ;;  %v2236_v35 = vsel %vm1524_vm0, %v1505_v18, 0.0  ;;  %v2233_v49 = vsel %vm1524_vm0, %v1504_v23, 0.0  ;;  %v5445_v41 = vld [vmem:[%s6152_s6 + $0x330] ss:$8 sps:$4 sm:$0xff]   ;;  %v5454_v18 = vld [vmem:[%s6152_s6 + $0x160] ss:$8 sps:$4 sm:$0xff]  }
 0x281   : > { %2093 = vadd.xlane.f32.xlu1 %v2092_v40  ;;  %2090 = vadd.xlane.f32.xlu0 %v2089_v7  ;;  %v5447_v40 = vld [vmem:[%s6152_s6 + $0x334] ss:$8 sps:$4 sm:$0xff]   ;;  %v3527_v63 = vsel %vm2945_vm1, %v3526_v57, %v3522_v33 }
 0x282   : > { %v2250_v51 = vpop.xlane.xlu1 %2249  ;;  %5010 = vmatmul.mubr.bf16.vlgmr.msra.gmra.mrb[0].mxu0 %v4243_v34  ;;  %v2247_v54 = vpop.xlane.xlu0 %2246  ;;  %v1522_v33 = vld [vmem:[%s6154_s7 + $0x7f0] sm:$0xff] }
 0x283   : > { %v7287_v6 = vpack.c.bf16 %v2250_v51, %v2247_v54  ;;  %4939 = vmatpush1.bf16.msra.mxu1 %v5427_v62  ;;  %5019 = vmatpush1.bf16.msra.mxu0 %v5424_v14  ;;  %v2854_v51 = vunpack.c.l.b16 %v7276_v31  ;;  %v2855_v54 = vunpack.c.h.b16 %v7276_v31  ;;  %v5450_v14 = vld [vmem:[%s6152_s6 + $0x154] ss:$8 sps:$4 sm:$0xff]   ;;  %v5453_v62 = vld [vmem:[%s6152_s6 + $0x344] ss:$8 sps:$4 sm:$0xff]   ;;  %v5448_v31 = vld [vmem:[%s6152_s6 + $0x150] ss:$8 sps:$4 sm:$0xff]  }
 0x284   : > { %4940 = vmatprep.subr.bf16.mxu1 %v5432_v43  ;;  %5020 = vmatprep.subr.bf16.mxu0 %v5435_v52  ;;  %v1903_v52 = vsel %vm1524_vm0, %v1394_v47, 0.0 }
 0x285   : > { %2285 = vadd.xlane.f32.xlu1 %v2284_v16  ;;  %2282 = vadd.xlane.f32.xlu0 %v2281_v20 }
 0x286   : > { %v1818_v27 = vpop.xlane.xlu1 %1817  ;;  %v1815_v21 = vpop.xlane.xlu0 %1814 }
 0x287   : > { %v7297_v24 = vpack.c.bf16 %v1818_v27, %v1815_v21  ;;  %4941 = vmatpush1.bf16.msra.mxu1 %v5430_v32  ;;  %5021 = vmatpush1.bf16.msra.mxu0 %v5433_v25  ;;  %v1459_v27 = vld [vmem:[%s6154_s7 + $0x5f8] sm:$0xff]  ;;  %v5451_v21 = vld [vmem:[%s6152_s6 + $0x340] ss:$8 sps:$4 sm:$0xff]   ;;  %v3838_v32 = vrot.slane %v2854_v51, %v6319_v38  ;;  %v3842_v25 = vrot.slane %v2855_v54, %v6328_v46  ;;  %v1378_v51 = vld [vmem:[%s6154_s7 + $0x370] sm:$0xff] }
 0x288   : > { %4942 = vmatprep.subr.bf16.mxu1 %v5438_v19  ;;  %5022 = vmatprep.subr.bf16.mxu0 %v5441_v1  ;;  %v2098_v45 = vsel %vm1524_vm0, %v1459_v27, 0.0  ;;  %v5459_v19 = vld [vmem:[%s6152_s6 + $0x354] ss:$8 sps:$4 sm:$0xff]  }
 0x289   : > { %1853 = vadd.xlane.f32.xlu1 %v1852_v17  ;;  %1850 = vadd.xlane.f32.xlu0 %v1849_v53  ;;  %v3843_v57 = vsel %vm2945_vm1, %v3842_v25, %v3838_v32 }
 0x28a   : > { %v1872_v28 = vpop.xlane.xlu1 %1871  ;;  %v1869_v37 = vpop.xlane.xlu0 %1868 }
 0x28b   : > { %v2351_v5 = vpack.c.bf16 %v1872_v28, %v1869_v37  ;;  %4943 = vmatpush1.bf16.msra.mxu1 %v5436_v22  ;;  %5023 = vmatpush1.bf16.msra.mxu0 %v5439_v48  ;;  %v2095_v37 = vsel %vm1524_vm0, %v1458_v39, 0.0  ;;  %v5457_v22 = vld [vmem:[%s6152_s6 + $0x350] ss:$8 sps:$4 sm:$0xff]  }
 0x28c   : > { %4944 = vmatprep.subr.bf16.mxu1 %v5444_v2  ;;  %5024 = vmatprep.subr.bf16.mxu0 %v5447_v40  ;;  %v5462_v40 = vld [vmem:[%s6152_s6 + $0x174] ss:$8 sps:$4 sm:$0xff]   ;;  %v5469_v39 = vld [vmem:[%s6152_s6 + $0x370] ss:$8 sps:$4 sm:$0xff]  }
 0x28d   : > { %v2792_v42 = vunpack.c.l.b16 %v2351_v5  ;;  %v2793_v15 = vunpack.c.h.b16 %v2351_v5  ;;  %2045 = vadd.xlane.f32.xlu1 %v2044_v3  ;;  %2042 = vadd.xlane.f32.xlu0 %v2041_v58  ;;  %v5456_v3 = vld [vmem:[%s6152_s6 + $0x164] ss:$8 sps:$4 sm:$0xff]   ;;  %v1523_v58 = vld [vmem:[%s6154_s7 + $0x7f8] sm:$0xff] }
 0x28e   : > { %v2010_v7 = vpop.xlane.xlu1 %2009  ;;  %v2007_v55 = vpop.xlane.xlu0 %2006  ;;  %v2290_v2 = vsel %vm1524_vm0, %v1523_v58, 0.0 }
 0x28f   : > { %v3531_v61 = vrot.slane %v2792_v42, %v6325_v44  ;;  %v3536_v34 = vrot.slane %v2793_v15, %v6333_v50  ;;  %v7321_v16 = vpack.c.bf16 %v2010_v7, %v2007_v55  ;;  %4945 = vmatpush1.bf16.msra.mxu1 %v5442_v30  ;;  %5025 = vmatpush1.bf16.msra.mxu0 %v5445_v41  ;;  %v2918_v42 = vunpack.c.l.b16 %v7287_v6  ;;  %v5465_v7 = vld [vmem:[%s6152_s6 + $0x364] ss:$8 sps:$4 sm:$0xff]  }
 0x290   : > { %4946 = vmatprep.subr.bf16.mxu1 %v5450_v14  ;;  %5026 = vmatprep.subr.bf16.mxu0 %v5453_v62  ;;  %v2919_v15 = vunpack.c.h.b16 %v7287_v6  ;;  %v2774_v55 = vunpack.c.l.b16 %v7297_v24  ;;  %v2287_v41 = vsel %vm1524_vm0, %v1522_v33, 0.0  ;;  %v5468_v14 = vld [vmem:[%s6152_s6 + $0x184] ss:$8 sps:$4 sm:$0xff]   ;;  %v5471_v62 = vld [vmem:[%s6152_s6 + $0x374] ss:$8 sps:$4 sm:$0xff]  }
 0x291   : > { %v3532_v20 = vsel %vm2952_vm2, %v3531_v61, %v3527_v63  ;;  %2237 = vadd.xlane.f32.xlu1 %v2236_v35  ;;  %2234 = vadd.xlane.f32.xlu0 %v2233_v49  ;;  %v2775_v49 = vunpack.c.h.b16 %v7297_v24  ;;  %v5460_v61 = vld [vmem:[%s6152_s6 + $0x170] ss:$8 sps:$4 sm:$0xff]   ;;  %v4154_v54 = vrot.slane %v2918_v42, %v6319_v38 }
 0x292   : > { %v7332_v8 = vsel %vm2959_vm3, %v3536_v34, %v3532_v20  ;;  %v2064_v17 = vpop.xlane.xlu1 %2063  ;;  %v2061_v43 = vpop.xlane.xlu0 %2060  ;;  %v5463_v34 = vld [vmem:[%s6152_s6 + $0x360] ss:$8 sps:$4 sm:$0xff]   ;;  %v1379_v63 = vld [vmem:[%s6154_s7 + $0x378] sm:$0xff]  ;;  %v4158_v24 = vrot.slane %v2919_v15, %v6328_v46 }
 0x293   : > { %v2383_v53 = vpack.c.bf16 %v2064_v17, %v2061_v43  ;;  %4947 = vmatpush1.bf16.msra.mxu1 %v5448_v31  ;;  %5027 = vmatpush1.bf16.msra.mxu0 %v5451_v21  ;;  %v3443_v17 = vrot.slane %v2774_v55, %v6319_v38  ;;  %v3447_v43 = vrot.slane %v2775_v49, %v6328_v46  ;;  %v1858_v31 = vsel %vm1524_vm0, %v1379_v63, 0.0  ;;  %v5472_v15 = vld [vmem:[%s6152_s6 + $0x190] ss:$8 sps:$4 sm:$0xff]  }
 0x294   : > { %4948 = vmatprep.subr.bf16.mxu1 %v5456_v3  ;;  %5028 = vmatprep.subr.bf16.mxu0 %v5459_v19  ;;  %v1855_v21 = vsel %vm1524_vm0, %v1378_v51, 0.0  ;;  %v4159_v3 = vsel %vm2945_vm1, %v4158_v24, %v4154_v54  ;;  %v2838_v19 = vunpack.c.l.b16 %v7321_v16  ;;  %v1507_v55 = vld [vmem:[%s6154_s7 + $0x778] sm:$0xff]  ;;  %v1506_v49 = vld [vmem:[%s6154_s7 + $0x770] sm:$0xff]  ;;  %v5480_v51 = vld [vmem:[%s6152_s6 + $0x1a4] ss:$8 sps:$4 sm:$0xff]  }
 0x295   : > { %v2856_v9 = vunpack.c.l.b16 %v2383_v53  ;;  %v2857_v13 = vunpack.c.h.b16 %v2383_v53  ;;  %1907 = vadd.xlane.f32.xlu1 %v1906_v59  ;;  %1904 = vadd.xlane.f32.xlu0 %v1903_v52  ;;  %v5466_v53 = vld [vmem:[%s6152_s6 + $0x180] ss:$8 sps:$4 sm:$0xff]   ;;  %v5483_v54 = vld [vmem:[%s6152_s6 + $0x394] ss:$8 sps:$4 sm:$0xff]  }
 0x296   : > { %v2202_v1 = vpop.xlane.xlu1 %2201  ;;  %v2199_v28 = vpop.xlane.xlu0 %2198 }
 0x297   : > { %v3847_v48 = vrot.slane %v2856_v9, %v6325_v44  ;;  %v3852_v5 = vrot.slane %v2857_v13, %v6333_v50  ;;  %v7350_v23 = vpack.c.bf16 %v2202_v1, %v2199_v28  ;;  %4949 = vmatpush1.bf16.msra.mxu1 %v5454_v18  ;;  %5029 = vmatpush1.bf16.msra.mxu0 %v5457_v22  ;;  %v1443_v13 = vld [vmem:[%s6154_s7 + $0x578] sm:$0xff]  ;;  %v2839_v1 = vunpack.c.h.b16 %v7321_v16  ;;  %v5477_v22 = vld [vmem:[%s6152_s6 + $0x384] ss:$8 sps:$4 sm:$0xff]  }
 0x298   : > { %4950 = vmatprep.subr.bf16.mxu1 %v5462_v40  ;;  %5030 = vmatprep.subr.bf16.mxu0 %v5465_v7  ;;  %v5474_v18 = vld [vmem:[%s6152_s6 + $0x194] ss:$8 sps:$4 sm:$0xff]  }
 0x299   : > { %v3848_v35 = vsel %vm2952_vm2, %v3847_v48, %v3843_v57  ;;  %2099 = vadd.xlane.f32.xlu1 %v2098_v45  ;;  %2096 = vadd.xlane.f32.xlu0 %v2095_v37  ;;  %v1442_v45 = vld [vmem:[%s6154_s7 + $0x570] sm:$0xff]  ;;  %v3448_v48 = vsel %vm2945_vm1, %v3447_v43, %v3443_v17  ;;  %v2050_v57 = vsel %vm1524_vm0, %v1443_v13, 0.0  ;;  %v5489_v13 = vld [vmem:[%s6152_s6 + $0x3a4] ss:$8 sps:$4 sm:$0xff]  }
 0x29a   : > { %v7363_v26 = vsel %vm2959_vm3, %v3852_v5, %v3848_v35  ;;  %v2256_v6 = vpop.xlane.xlu1 %2255  ;;  %v2253_v30 = vpop.xlane.xlu0 %2252  ;;  %v2047_v42 = vsel %vm1524_vm0, %v1442_v45, 0.0  ;;  %v5475_v35 = vld [vmem:[%s6152_s6 + $0x380] ss:$8 sps:$4 sm:$0xff]   ;;  %v5481_v17 = vld [vmem:[%s6152_s6 + $0x390] ss:$8 sps:$4 sm:$0xff]  }
 0x29b   : > { %v2415_v47 = vpack.c.bf16 %v2256_v6, %v2253_v30  ;;  %4951 = vmatpush1.bf16.msra.mxu1 %v5460_v61  ;;  %5031 = vmatpush1.bf16.msra.mxu0 %v5463_v34  ;;  %v3759_v6 = vrot.slane %v2838_v19, %v6319_v38  ;;  %v3763_v30 = vrot.slane %v2839_v1, %v6328_v46  ;;  %v2903_v61 = vunpack.c.h.b16 %v7350_v23  ;;  %v5487_v1 = vld [vmem:[%s6152_s6 + $0x3a0] ss:$8 sps:$4 sm:$0xff]  }
 0x29c   : > { %4952 = vmatprep.subr.bf16.mxu1 %v5468_v14  ;;  %5032 = vmatprep.subr.bf16.mxu0 %v5471_v62  ;;  %v2242_v14 = vsel %vm1524_vm0, %v1507_v55, 0.0  ;;  %v5478_v62 = vld [vmem:[%s6152_s6 + $0x1a0] ss:$8 sps:$4 sm:$0xff]  }
 0x29d   : > { %v2920_v20 = vunpack.c.l.b16 %v2415_v47  ;;  %v2921_v59 = vunpack.c.h.b16 %v2415_v47  ;;  %2291 = vadd.xlane.f32.xlu1 %v2290_v2  ;;  %2288 = vadd.xlane.f32.xlu0 %v2287_v41  ;;  %v2902_v41 = vunpack.c.l.b16 %v7350_v23  ;;  %v2239_v23 = vsel %vm1524_vm0, %v1506_v49, 0.0 }
 0x29e   : > { %v1824_v52 = vpop.xlane.xlu1 %1823  ;;  %v1821_v27 = vpop.xlane.xlu0 %1820  ;;  %vm7702_vm0 = vcmask 654912  }
 0x29f   : > { %v4163_v32 = vrot.slane %v2920_v20, %v6325_v44  ;;  %v4168_v25 = vrot.slane %v2921_v59, %v6333_v50  ;;  %v2343_v9 = vpack.c.bf16 %v1824_v52, %v1821_v27  ;;  %4953 = vmatpush1.bf16.msra.mxu1 %v5466_v53  ;;  %5033 = vmatpush1.bf16.msra.mxu0 %v5469_v39 }
 0x2a0   : > { %4954 = vmatprep.subr.bf16.mxu1 %v5474_v18  ;;  %5034 = vmatprep.subr.bf16.mxu0 %v5477_v22  ;;  %v4079_v53 = vrot.slane %v2903_v61, %v6328_v46 }
 0x2a1   : > { %v4164_v28 = vsel %vm2952_vm2, %v4163_v32, %v4159_v3  ;;  %v2776_v37 = vunpack.c.l.b16 %v2343_v9  ;;  %v2777_v58 = vunpack.c.h.b16 %v2343_v9  ;;  %1859 = vadd.xlane.f32.xlu1 %v1858_v31  ;;  %1856 = vadd.xlane.f32.xlu0 %v1855_v21  ;;  %v3764_v31 = vsel %vm2945_vm1, %v3763_v30, %v3759_v6  ;;  %v5486_v9 = vld [vmem:[%s6152_s6 + $0x1b4] ss:$8 sps:$4 sm:$0xff]   ;;  %v5501_v30 = vld [vmem:[%s6152_s6 + $0x3c4] ss:$8 sps:$4 sm:$0xff]  }
 0x2a2   : > { %v7392_v5 = vsel %vm2959_vm3, %v4168_v25, %v4164_v28  ;;  %v2016_v16 = vpop.xlane.xlu1 %2015  ;;  %v2013_v33 = vpop.xlane.xlu0 %2012  ;;  %v4075_v21 = vrot.slane %v2902_v41, %v6319_v38  ;;  %v5484_v38 = vld [vmem:[%s6152_s6 + $0x1b0] ss:$8 sps:$4 sm:$0xff]   ;;  %v5498_v6 = vld [vmem:[%s6152_s6 + $0x1d4] ss:$8 sps:$4 sm:$0xff]  }
 0x2a3   : > { %v3452_v2 = vrot.slane %v2776_v37, %v6325_v44  ;;  %v3457_v40 = vrot.slane %v2777_v58, %v6333_v50  ;;  %v2375_v7 = vpack.c.bf16 %v2016_v16, %v2013_v33  ;;  %4955 = vmatpush1.bf16.msra.mxu1 %v5472_v15  ;;  %5035 = vmatpush1.bf16.msra.mxu0 %v5475_v35  ;;  %v5492_v16 = vld [vmem:[%s6152_s6 + $0x1c4] ss:$8 sps:$4 sm:$0xff]   ;;  %v5495_v33 = vld [vmem:[%s6152_s6 + $0x3b4] ss:$8 sps:$4 sm:$0xff]   ;;  %v5493_v15 = vld [vmem:[%s6152_s6 + $0x3b0] ss:$8 sps:$4 sm:$0xff]  }
 0x2a4   : > { %4956 = vmatprep.subr.bf16.mxu1 %v5480_v51  ;;  %5036 = vmatprep.subr.bf16.mxu0 %v5483_v54  ;;  %v4080_v58 = vsel %vm2945_vm1, %v4079_v53, %v4075_v21  ;;  %vm7703_vm1 = vmmov %vm7702_vm0 }
 0x2a5   : > { %v3453_v34 = vsel %vm2952_vm2, %v3452_v2, %v3448_v48  ;;  %v2840_v47 = vunpack.c.l.b16 %v2375_v7  ;;  %v2841_v63 = vunpack.c.h.b16 %v2375_v7  ;;  %2051 = vadd.xlane.f32.xlu1 %v2050_v57  ;;  %2048 = vadd.xlane.f32.xlu0 %v2047_v42  ;;  %v5490_v42 = vld [vmem:[%s6152_s6 + $0x1c0] ss:$8 sps:$4 sm:$0xff]  }
 0x2a6   : > { %v7410_v24 = vsel %vm2959_vm3, %v3457_v40, %v3453_v34  ;;  %v2208_v20 = vpop.xlane.xlu1 %2207  ;;  %v2205_v59 = vpop.xlane.xlu0 %2204 }
 0x2a7   : > { %v3768_v43 = vrot.slane %v2840_v47, %v6325_v44  ;;  %v3773_v52 = vrot.slane %v2841_v63, %v6333_v50  ;;  %v2407_v27 = vpack.c.bf16 %v2208_v20, %v2205_v59  ;;  %4957 = vmatpush1.bf16.msra.mxu1 %v5478_v62  ;;  %5037 = vmatpush1.bf16.msra.mxu0 %v5481_v17  ;;  %v5496_v47 = vld [vmem:[%s6152_s6 + $0x1d0] ss:$8 sps:$4 sm:$0xff]   ;;  %v5499_v63 = vld [vmem:[%s6152_s6 + $0x3c0] ss:$8 sps:$4 sm:$0xff]   ;;  %v5507_v62 = vld [vmem:[%s6152_s6 + $0x3d4] ss:$8 sps:$4 sm:$0xff]  }
 0x2a8   : > { %4958 = vmatprep.subr.bf16.mxu1 %v5486_v9  ;;  %5038 = vmatprep.subr.bf16.mxu0 %v5489_v13  ;;  %v5510_v9 = vld [vmem:[%s6152_s6 + $0x1f4] ss:$8 sps:$4 sm:$0xff]   ;;  %v5513_v13 = vld [vmem:[%s6152_s6 + $0x3e4] ss:$8 sps:$4 sm:$0xff]  }
 0x2a9   : > { %v3769_v39 = vsel %vm2952_vm2, %v3768_v43, %v3764_v31  ;;  %v2904_v32 = vunpack.c.l.b16 %v2407_v27  ;;  %v2905_v25 = vunpack.c.h.b16 %v2407_v27  ;;  %2243 = vadd.xlane.f32.xlu1 %v2242_v14  ;;  %2240 = vadd.xlane.f32.xlu0 %v2239_v23  ;;  %v5504_v23 = vld [vmem:[%s6152_s6 + $0x1e4] ss:$8 sps:$4 sm:$0xff]   ;;  %v5502_v27 = vld [vmem:[%s6152_s6 + $0x1e0] ss:$8 sps:$4 sm:$0xff]   ;;  %v5505_v31 = vld [vmem:[%s6152_s6 + $0x3d0] ss:$8 sps:$4 sm:$0xff]  }
 0x2aa   : > { %v7425_v45 = vsel %vm2959_vm3, %v3773_v52, %v3769_v39  ;;  %v1878_v3 = vpop.xlane.xlu1 %1877  ;;  %v1875_v19 = vpop.xlane.xlu0 %1874 }
 0x2ab   : > { %v4084_v46 = vrot.slane %v2904_v32, %v6325_v44  ;;  %v4089_v28 = vrot.slane %v2905_v25, %v6333_v50  ;;  %v2352_v37 = vpack.c.bf16 %v1878_v3, %v1875_v19  ;;  %4959 = vmatpush1.bf16.msra.mxu1 %v5484_v38  ;;  %5039 = vmatpush1.bf16.msra.mxu0 %v5487_v1  ;;  %v5508_v1 = vld [vmem:[%s6152_s6 + $0x1f0] ss:$8 sps:$4 sm:$0xff]  }
 0x2ac   : > { %4960 = vmatprep.subr.bf16.mxu1 %v5492_v16  ;;  %5040 = vmatprep.subr.bf16.mxu0 %v5495_v33 }
 0x2ad   : > { %v4085_v18 = vsel %vm2952_vm2, %v4084_v46, %v4080_v58  ;;  %v2794_v22 = vunpack.c.l.b16 %v2352_v37  ;;  %v2795_v48 = vunpack.c.h.b16 %v2352_v37  ;;  %v5511_v46 = vld [vmem:[%s6152_s6 + $0x3e0] ss:$8 sps:$4 sm:$0xff]   ;;  %vm7704_vm2 = vmmov %vm7702_vm0 }
 0x2ae   : > { %v7436_v44 = vsel %vm2959_vm3, %v4089_v28, %v4085_v18  ;;  %v2070_v50 = vpop.xlane.xlu1 %2069  ;;  %v2067_v57 = vpop.xlane.xlu0 %2066  ;;  %vm7705_vm3 = vmmov %vm7702_vm0 }
 0x2af   : > { %v3541_v35 = vrot.slane %v2794_v22, %v6340_v60  ;;  %v3546_v2 = vrot.slane %v2795_v48, %v6349_v4  ;;  %v2384_v40 = vpack.c.bf16 %v2070_v50, %v2067_v57  ;;  %4961 = vmatpush1.bf16.msra.mxu1 %v5490_v42  ;;  %5041 = vmatpush1.bf16.msra.mxu0 %v5493_v15  ;;  %v5516_v48 = vld [vmem:[%s6152_s6 + $0x3f4] ss:$8 sps:$4 sm:$0xff]   ;;  %v5514_v57 = vld [vmem:[%s6152_s6 + $0x3f0] ss:$8 sps:$4 sm:$0xff]  }
 0x2b0   : > { %4962 = vmatprep.subr.bf16.mxu1 %v5498_v6  ;;  %5042 = vmatprep.subr.bf16.mxu0 %v5501_v30 }
 0x2b1   : > { %v3542_v7 = vsel %vm2966_vm4, %v3541_v35, %v7332_v8  ;;  %v2858_v55 = vunpack.c.l.b16 %v2384_v40  ;;  %v2859_v49 = vunpack.c.h.b16 %v2384_v40 }
 0x2b2   : > { %v7447_v41 = vsel %vm2973_vm5, %v3546_v2, %v3542_v7  ;;  %v2262_v61 = vpop.xlane.xlu1 %2261  ;;  %v2259_v34 = vpop.xlane.xlu0 %2258 }
 0x2b3   : > { %v3857_v51 = vrot.slane %v2858_v55, %v6340_v60  ;;  %v3862_v54 = vrot.slane %v2859_v49, %v6349_v4  ;;  %v2416_v8 = vpack.c.bf16 %v2262_v61, %v2259_v34  ;;  %4963 = vmatpush1.bf16.msra.mxu1 %v5496_v47  ;;  %5043 = vmatpush1.bf16.msra.mxu0 %v5499_v63 }
 0x2b4   : > { %4964 = vmatprep.subr.bf16.mxu1 %v5504_v23  ;;  %5044 = vmatprep.subr.bf16.mxu0 %v5507_v62 }
 0x2b5   : > { %v3858_v20 = vsel %vm2966_vm4, %v3857_v51, %v7363_v26  ;;  %v2922_v59 = vunpack.c.l.b16 %v2416_v8  ;;  %v2923_v14 = vunpack.c.h.b16 %v2416_v8 }
 0x2b6   : > { %v7458_v17 = vsel %vm2973_vm5, %v3862_v54, %v3858_v20  ;;  %v1830_v43 = vpop.xlane.xlu1 %1829  ;;  %v1827_v52 = vpop.xlane.xlu0 %1826  ;;  %v7699_v20 = vld [vmem:[#allocation7_spill] sm:$0xff] }
 0x2b7   : > { %v4173_v21 = vrot.slane %v2922_v59, %v6340_v60  ;;  %v4178_v53 = vrot.slane %v2923_v14, %v6349_v4  ;;  %v2344_v26 = vpack.c.bf16 %v1830_v43, %v1827_v52  ;;  %4965 = vmatpush1.bf16.msra.mxu1 %v5502_v27  ;;  %5045 = vmatpush1.bf16.msra.mxu0 %v5505_v31 }
 0x2b8   : > { %4966 = vmatprep.subr.bf16.mxu1 %v5510_v9  ;;  %5046 = vmatprep.subr.bf16.mxu0 %v5513_v13 }
 0x2b9   : > { %v4174_v39 = vsel %vm2966_vm4, %v4173_v21, %v7392_v5  ;;  %v2778_v32 = vunpack.c.l.b16 %v2344_v26  ;;  %v2779_v25 = vunpack.c.h.b16 %v2344_v26 }
 0x2ba   : > { %v4179_v3 = vsel %vm2973_vm5, %v4178_v53, %v4174_v39  ;;  %v2022_v19 = vpop.xlane.xlu1 %2021  ;;  %v2019_v38 = vpop.xlane.xlu0 %2018 }
 0x2bb   : > { %v3462_v28 = vrot.slane %v2778_v32, %v6340_v60  ;;  %v3467_v37 = vrot.slane %v2779_v25, %v6349_v4  ;;  %v2376_v58 = vpack.c.bf16 %v2022_v19, %v2019_v38  ;;  %4967 = vmatpush1.bf16.msra.mxu1 %v5508_v1  ;;  %5047 = vmatpush1.bf16.msra.mxu0 %v5511_v46 }
 0x2bc   : > { %5048 = vmatprep.subr.bf16.mxu0 %v5516_v48 }
 0x2bd   : > { %v3463_v5 = vsel %vm2966_vm4, %v3462_v28, %v7410_v24  ;;  %v2842_v18 = vunpack.c.l.b16 %v2376_v58  ;;  %v2843_v22 = vunpack.c.h.b16 %v2376_v58 }
 0x2be   : > { %v3468_v16 = vsel %vm2973_vm5, %v3467_v37, %v3463_v5  ;;  %v2214_v33 = vpop.xlane.xlu1 %2213  ;;  %v2211_v50 = vpop.xlane.xlu0 %2210 }
 0x2bf   : > { %v3778_v42 = vrot.slane %v2842_v18, %v6340_v60  ;;  %v3783_v15 = vrot.slane %v2843_v22, %v6349_v4  ;;  %v2408_v35 = vpack.c.bf16 %v2214_v33, %v2211_v50  ;;  %5049 = vmatpush1.bf16.msra.mxu0 %v5514_v57 }
 0x2c1   : > { %v3779_v2 = vsel %vm2966_vm4, %v3778_v42, %v7425_v45  ;;  %v2906_v40 = vunpack.c.l.b16 %v2408_v35  ;;  %v2907_v24 = vunpack.c.h.b16 %v2408_v35 }
 0x2c2   : > { %v3784_v7 = vsel %vm2973_vm5, %v3783_v15, %v3779_v2  ;;  %v1884_v55 = vpop.xlane.xlu1 %1883  ;;  %v1881_v49 = vpop.xlane.xlu0 %1880 }
 0x2c3   : > { %v4094_v6 = vrot.slane %v2906_v40, %v6340_v60  ;;  %v4099_v30 = vrot.slane %v2907_v24, %v6349_v4  ;;  %v2353_v61 = vpack.c.bf16 %v1884_v55, %v1881_v49 }
 0x2c5   : > { %v4095_v34 = vsel %vm2966_vm4, %v4094_v6, %v7436_v44  ;;  %v2796_v47 = vunpack.c.l.b16 %v2353_v61  ;;  %v2797_v63 = vunpack.c.h.b16 %v2353_v61  ;;  %vm7706_vm4 = vmmov %vm7702_vm0 }
 0x2c6   : > { %v4100_v51 = vsel %vm2973_vm5, %v4099_v30, %v4095_v34  ;;  %v2076_v54 = vpop.xlane.xlu1 %2075  ;;  %v2073_v45 = vpop.xlane.xlu0 %2072  ;;  %vm7707_vm5 = vmmov %vm7702_vm0 }
 0x2c7   : > { %v3551_v8 = vrot.slane %v2796_v47, %v6356_v10  ;;  %v3556_v59 = vrot.slane %v2797_v63, %v7699_v20  ;;  %v2385_v14 = vpack.c.bf16 %v2076_v54, %v2073_v45 }
 0x2c9   : > { %v3552_v60 = vsel %vm2980_vm6, %v3551_v8, %v7447_v41  ;;  %v2860_v23 = vunpack.c.l.b16 %v2385_v14  ;;  %v2861_v4 = vunpack.c.h.b16 %v2385_v14 }
 0x2ca   : > { %v3557_v62 = vsel %vm2987_vm7, %v3556_v59, %v3552_v60  ;;  %v2268_v43 = vpop.xlane.xlu1 %2267  ;;  %v2265_v44 = vpop.xlane.xlu0 %2264  ;;  %v7701_v59 = vld [vmem:[#allocation9_spill] sm:$0xff] }
 0x2cb   : > { %v3867_v52 = vrot.slane %v2860_v23, %v6356_v10  ;;  %v3872_v27 = vrot.slane %v2861_v4, %v7699_v20  ;;  %v2417_v31 = vpack.c.bf16 %v2268_v43, %v2265_v44 }
 0x2cd   : > { %v3868_v21 = vsel %vm2980_vm6, %v3867_v52, %v7458_v17  ;;  %v2924_v53 = vunpack.c.l.b16 %v2417_v31  ;;  %v2925_v26 = vunpack.c.h.b16 %v2417_v31 }
 0x2ce   : > { %v3873_v39 = vsel %vm2987_vm7, %v3872_v27, %v3868_v21  ;;  %v1836_v32 = vpop.xlane.xlu1 %1835  ;;  %v1833_v41 = vpop.xlane.xlu0 %1832 }
 0x2cf   : > { %v4183_v25 = vrot.slane %v2924_v53, %v6356_v10  ;;  %v4188_v9 = vrot.slane %v2925_v26, %v7699_v20  ;;  %v2345_v13 = vpack.c.bf16 %v1836_v32, %v1833_v41 }
 0x2d1   : > { %v4184_v19 = vsel %vm2980_vm6, %v4183_v25, %v4179_v3  ;;  %v2780_v38 = vunpack.c.l.b16 %v2345_v13  ;;  %v2781_v1 = vunpack.c.h.b16 %v2345_v13 }
 0x2d2   : > { %v4189_v46 = vsel %vm2987_vm7, %v4188_v9, %v4184_v19  ;;  %v2028_v28 = vpop.xlane.xlu1 %2027  ;;  %v2025_v37 = vpop.xlane.xlu0 %2024 }
 0x2d3   : > { %v3472_v17 = vrot.slane %v2780_v38, %v6356_v10  ;;  %v3477_v58 = vrot.slane %v2781_v1, %v7699_v20  ;;  %v2377_v5 = vpack.c.bf16 %v2028_v28, %v2025_v37 }
 0x2d5   : > { %v3473_v18 = vsel %vm2980_vm6, %v3472_v17, %v3468_v16  ;;  %v2844_v22 = vunpack.c.l.b16 %v2377_v5  ;;  %v2845_v48 = vunpack.c.h.b16 %v2377_v5 }
 0x2d6   : > { %v3478_v33 = vsel %vm2987_vm7, %v3477_v58, %v3473_v18  ;;  %v2220_v50 = vpop.xlane.xlu1 %2219  ;;  %v2217_v57 = vpop.xlane.xlu0 %2216 }
 0x2d7   : > { %v3788_v3 = vrot.slane %v2844_v22, %v6356_v10  ;;  %v3793_v42 = vrot.slane %v2845_v48, %v7699_v20  ;;  %v2409_v15 = vpack.c.bf16 %v2220_v50, %v2217_v57 }
 0x2d9   : > { %v3789_v35 = vsel %vm2980_vm6, %v3788_v3, %v3784_v7  ;;  %v2908_v2 = vunpack.c.l.b16 %v2409_v15  ;;  %v2909_v40 = vunpack.c.h.b16 %v2409_v15  ;;  %v7700_v7 = vld [vmem:[#allocation8_spill] sm:$0xff] }
 0x2da   : > { %v3794_v24 = vsel %vm2987_vm7, %v3793_v42, %v3789_v35  ;;  %v1890_v55 = vpop.xlane.xlu1 %1889  ;;  %v1887_v49 = vpop.xlane.xlu0 %1886 }
 0x2db   : > { %v4104_v16 = vrot.slane %v2908_v2, %v6356_v10  ;;  %v4109_v6 = vrot.slane %v2909_v40, %v7699_v20  ;;  %v2354_v30 = vpack.c.bf16 %v1890_v55, %v1887_v49 }
 0x2dd   : > { %v4105_v61 = vsel %vm2980_vm6, %v4104_v16, %v4100_v51  ;;  %v2798_v34 = vunpack.c.l.b16 %v2354_v30  ;;  %v2799_v47 = vunpack.c.h.b16 %v2354_v30 }
 0x2de   : > { %v4110_v63 = vsel %vm2987_vm7, %v4109_v6, %v4105_v61  ;;  %v2082_v54 = vpop.xlane.xlu1 %2081  ;;  %v2079_v45 = vpop.xlane.xlu0 %2078 }
 0x2df   : > { %v3561_v8 = vrot.slane %v2798_v34, %v7700_v7  ;;  %v3566_v14 = vrot.slane %v2799_v47, %v7701_v59  ;;  %v2386_v60 = vpack.c.bf16 %v2082_v54, %v2079_v45 }
 0x2e1   : > { %v3562_v23 = vsel %vm2994_vm8, %v3561_v8, %v3557_v62  ;;  %v2862_v4 = vunpack.c.l.b16 %v2386_v60  ;;  %v2863_v10 = vunpack.c.h.b16 %v2386_v60 }
 0x2e2   : > { %v7518_v20 = vsel %vm7702_vm0, %v3566_v14, %v3562_v23  ;;  %v2274_v43 = vpop.xlane.xlu1 %2273  ;;  %v2271_v51 = vpop.xlane.xlu0 %2270 }
 0x2e3   : > { %v3877_v44 = vrot.slane %v2862_v4, %v7700_v7  ;;  %v3882_v52 = vrot.slane %v2863_v10, %v7701_v59  ;;  %v2418_v27 = vpack.c.bf16 %v2274_v43, %v2271_v51 }
 0x2e5   : > { %v3878_v31 = vsel %vm2994_vm8, %v3877_v44, %v3873_v39  ;;  %v2926_v21 = vunpack.c.l.b16 %v2418_v27  ;;  %v2927_v53 = vunpack.c.h.b16 %v2418_v27 }
 0x2e6   : > { %v7524_v26 = vsel %vm7703_vm1, %v3882_v52, %v3878_v31  ;;  %v1842_v62 = vpop.xlane.xlu1 %1841  ;;  %v1839_v32 = vpop.xlane.xlu0 %1838 }
 0x2e7   : > { %v4193_v41 = vrot.slane %v2926_v21, %v7700_v7  ;;  %v4198_v25 = vrot.slane %v2927_v53, %v7701_v59  ;;  %v2346_v9 = vpack.c.bf16 %v1842_v62, %v1839_v32 }
 0x2e9   : > { %v4194_v13 = vsel %vm2994_vm8, %v4193_v41, %v4189_v46  ;;  %v2782_v19 = vunpack.c.l.b16 %v2346_v9  ;;  %v2783_v38 = vunpack.c.h.b16 %v2346_v9 }
 0x2ea   : > { %v7530_v1 = vsel %vm7704_vm2, %v4198_v25, %v4194_v13  ;;  %v2034_v39 = vpop.xlane.xlu1 %2033  ;;  %v2031_v28 = vpop.xlane.xlu0 %2030 }
 0x2eb   : > { %v3482_v37 = vrot.slane %v2782_v19, %v7700_v7  ;;  %v3487_v17 = vrot.slane %v2783_v38, %v7701_v59  ;;  %v2378_v58 = vpack.c.bf16 %v2034_v39, %v2031_v28 }
 0x2ed   : > { %v3483_v5 = vsel %vm2994_vm8, %v3482_v37, %v3478_v33  ;;  %v2846_v18 = vunpack.c.l.b16 %v2378_v58  ;;  %v2847_v22 = vunpack.c.h.b16 %v2378_v58 }
 0x2ee   : > { %v7536_v48 = vsel %vm7705_vm3, %v3487_v17, %v3483_v5  ;;  %v2226_v46 = vpop.xlane.xlu1 %2225  ;;  %v2223_v50 = vpop.xlane.xlu0 %2222 }
 0x2ef   : > { %v3798_v57 = vrot.slane %v2846_v18, %v7700_v7  ;;  %v3803_v3 = vrot.slane %v2847_v22, %v7701_v59  ;;  %v2410_v42 = vpack.c.bf16 %v2226_v46, %v2223_v50 }
 0x2f1   : > { %v3799_v15 = vsel %vm2994_vm8, %v3798_v57, %v3794_v24  ;;  %v2910_v35 = vunpack.c.l.b16 %v2410_v42  ;;  %v2911_v2 = vunpack.c.h.b16 %v2410_v42 }
 0x2f2   : > { %v7542_v40 = vsel %vm7706_vm4, %v3803_v3, %v3799_v15  ;;  %v1896_v33 = vpop.xlane.xlu1 %1895  ;;  %v1893_v55 = vpop.xlane.xlu0 %1892 }
 0x2f3   : > { %v4114_v49 = vrot.slane %v2910_v35, %v7700_v7  ;;  %v4119_v16 = vrot.slane %v2911_v2, %v7701_v59 }
 0x2f5   : > { %v4115_v6 = vsel %vm2994_vm8, %v4114_v49, %v4110_v63  ;;  %v2355_v63 = vpack.c.bf16 %v1896_v33, %v1893_v55 }
 0x2f6   : > { %v7548_v30 = vsel %vm7707_vm5, %v4119_v16, %v4115_v6  ;;  %v2088_v61 = vpop.xlane.xlu1 %2087  ;;  %v2085_v34 = vpop.xlane.xlu0 %2084 }
 0x2f7   : > { %v2387_v44 = vpack.c.bf16 %v2088_v61, %v2085_v34  ;;  %v2800_v53 = vunpack.c.l.b16 %v2355_v63  ;;  %v2801_v38 = vunpack.c.h.b16 %v2355_v63 }
 0x2f9   : > { %v2864_v62 = vunpack.c.l.b16 %v2387_v44  ;;  %v3571_v39 = vrot.slane %v2800_v53, %v6391_v56  ;;  %v2865_v28 = vunpack.c.h.b16 %v2387_v44  ;;  %v3576_v15 = vrot.slane %v2801_v38, %v6399_v0 }
 0x2fa   : > { %v2280_v47 = vpop.xlane.xlu1 %2279  ;;  %v2277_v24 = vpop.xlane.xlu0 %2276 }
 0x2fb   : > { %v2419_v52 = vpack.c.bf16 %v2280_v47, %v2277_v24  ;;  %v3887_v37 = vrot.slane %v2864_v62, %v6391_v56  ;;  %v3572_v42 = vsel %vm3008_vm10, %v3571_v39, %v7518_v20  ;;  %v3892_v33 = vrot.slane %v2865_v28, %v6399_v0 }
 0x2fd   : > { %v2928_v32 = vunpack.c.l.b16 %v2419_v52  ;;  %v2929_v17 = vunpack.c.h.b16 %v2419_v52  ;;  %v3888_v2 = vsel %vm3008_vm10, %v3887_v37, %v7524_v26 }
 0x2fe   : > { %v1848_v54 = vpop.xlane.xlu1 %1847  ;;  %v1845_v45 = vpop.xlane.xlu0 %1844 }
 0x2ff   : > { %v2347_v27 = vpack.c.bf16 %v1848_v54, %v1845_v45  ;;  %v4203_v5 = vrot.slane %v2928_v32, %v6391_v56  ;;  %v4208_v55 = vrot.slane %v2929_v17, %v6399_v0 }
 0x301   : > { %v2784_v41 = vunpack.c.l.b16 %v2347_v27  ;;  %v2785_v18 = vunpack.c.h.b16 %v2347_v27  ;;  %v4204_v16 = vsel %vm3008_vm10, %v4203_v5, %v7530_v1  ;;  %v3893_v1 = vsel %vm3015_vm11, %v3892_v33, %v3888_v2 }
 0x302   : > { %v2040_v8 = vpop.xlane.xlu1 %2039  ;;  %v2037_v14 = vpop.xlane.xlu0 %2036 }
 0x303   : > { %v2379_v13 = vpack.c.bf16 %v2040_v8, %v2037_v14  ;;  %v3492_v22 = vrot.slane %v2784_v41, %v6391_v56  ;;  %v3497_v61 = vrot.slane %v2785_v18, %v6399_v0 }
 0x305   : > { %v2848_v57 = vunpack.c.l.b16 %v2379_v13  ;;  %v3493_v6 = vsel %vm3008_vm10, %v3492_v22, %v7536_v48  ;;  %v2849_v20 = vunpack.c.h.b16 %v2379_v13 }
 0x306   : > { %v2232_v60 = vpop.xlane.xlu1 %2231  ;;  %v2229_v23 = vpop.xlane.xlu0 %2228 }
 0x307   : > { %v3808_v24 = vrot.slane %v2848_v57, %v6391_v56 }
 0x309   : > { %v3809_v52 = vsel %vm3008_vm10, %v3808_v24, %v7542_v40  ;;  %v7708_v24 = vld [vmem:[#allocation11_spill] sm:$0xff] }
 0x30a   : > { %v1902_v4 = vpop.xlane.xlu1 %1901  ;;  %v1899_v10 = vpop.xlane.xlu0 %1898 }
 0x30b   : > { %v2356_v19 = vpack.c.bf16 %v1902_v4, %v1899_v10  ;;  %v3577_v4 = vsel %vm3015_vm11, %v3576_v15, %v3572_v42  ;;  %v7574_v10 = vpack.c.bf16 %v2232_v60, %v2229_v23 }
 0x30d   : > { %v2802_v3 = vunpack.c.l.b16 %v2356_v19  ;;  %v2803_v54 = vunpack.c.h.b16 %v2356_v19  ;;  %v2912_v13 = vunpack.c.l.b16 %v7574_v10  ;;  %v2913_v28 = vunpack.c.h.b16 %v7574_v10 }
 0x30e   : > { %v2094_v7 = vpop.xlane.xlu1 %2093  ;;  %v2091_v43 = vpop.xlane.xlu0 %2090 }
 0x30f   : > { %v2388_v58 = vpack.c.bf16 %v2094_v7, %v2091_v43  ;;  %v3581_v26 = vrot.slane %v2802_v3, %v6406_v11  ;;  %v4209_v7 = vsel %vm3015_vm11, %v4208_v55, %v4204_v16  ;;  %v7579_v43 = vsel %vm3015_vm11, %v3497_v61, %v3493_v6 }
 0x310   : > { %v3586_v60 = vrot.slane %v2803_v54, %v6409_v12 }
 0x311   : > { %v2866_v49 = vunpack.c.l.b16 %v2388_v58  ;;  %v2867_v8 = vunpack.c.h.b16 %v2388_v58  ;;  %v3582_v27 = vsel %vm3022_vm12, %v3581_v26, %v3577_v4 }
 0x312   : > { %v2286_v59 = vpop.xlane.xlu1 %2285  ;;  %v2283_v51 = vpop.xlane.xlu0 %2282  ;;  %v3587_v18 = vsel %vm3029_vm13, %v3586_v60, %v3582_v27 }
 0x313   : > { %v2420_v35 = vpack.c.bf16 %v2286_v59, %v2283_v51  ;;  %v3897_v48 = vrot.slane %v2866_v49, %v6406_v11  ;;  %v3813_v59 = vrot.slane %v2849_v20, %v6399_v0  ;;  %v3902_v53 = vrot.slane %v2867_v8, %v6409_v12 }
 0x315   : > { %v2930_v14 = vunpack.c.l.b16 %v2420_v35  ;;  %v2931_v62 = vunpack.c.h.b16 %v2420_v35  ;;  %v3898_v19 = vsel %vm3022_vm12, %v3897_v48, %v3893_v1  ;;  %v3814_v8 = vsel %vm3015_vm11, %v3813_v59, %v3809_v52 }
 0x316   : > { %v7550_v31 = vpop.xlane.xlu1 %1853  ;;  %v7552_v21 = vpop.xlane.xlu0 %1850  ;;  %v3903_v57 = vsel %vm3029_vm13, %v3902_v53, %v3898_v19 }
 0x317   : > { %v4213_v32 = vrot.slane %v2930_v14, %v6406_v11  ;;  %v2348_v40 = vpack.c.bf16 %v7550_v31, %v7552_v21  ;;  %v4218_v42 = vrot.slane %v2931_v62, %v6409_v12 }
 0x319   : > { %v4214_v3 = vsel %vm3022_vm12, %v4213_v32, %v4209_v7  ;;  %v2786_v33 = vunpack.c.l.b16 %v2348_v40  ;;  %v2787_v10 = vunpack.c.h.b16 %v2348_v40 }
 0x31a   : > { %v2046_v25 = vpop.xlane.xlu1 %2045  ;;  %v2043_v9 = vpop.xlane.xlu0 %2042  ;;  %v4219_v54 = vsel %vm3029_vm13, %v4218_v42, %v4214_v3 }
 0x31b   : > { %v2380_v41 = vpack.c.bf16 %v2046_v25, %v2043_v9  ;;  %v3502_v48 = vrot.slane %v2786_v33, %v6406_v11 }
 0x31d   : > { %v2850_v15 = vunpack.c.l.b16 %v2380_v41  ;;  %v2851_v26 = vunpack.c.h.b16 %v2380_v41 }
 0x31e   : > { %v2238_v46 = vpop.xlane.xlu1 %2237  ;;  %v2235_v50 = vpop.xlane.xlu0 %2234 }
 0x31f   : > { %v2412_v31 = vpack.c.bf16 %v2238_v46, %v2235_v50  ;;  %v4124_v50 = vrot.slane %v2912_v13, %v6391_v56  ;;  %v3818_v14 = vrot.slane %v2850_v15, %v6406_v11 }
 0x321   : > { %v2914_v4 = vunpack.c.l.b16 %v2412_v31  ;;  %v4125_v52 = vsel %vm3008_vm10, %v4124_v50, %v7548_v30  ;;  %v2915_v53 = vunpack.c.h.b16 %v2412_v31  ;;  %v3819_v32 = vsel %vm3022_vm12, %v3818_v14, %v3814_v8  ;;  %v7710_v8 = vld [vmem:[#allocation6_spill] sm:$0xff] }
 0x322   : > { %v1908_v34 = vpop.xlane.xlu1 %1907  ;;  %v1905_v47 = vpop.xlane.xlu0 %1904 }
 0x323   : > { %v2357_v45 = vpack.c.bf16 %v1908_v34, %v1905_v47  ;;  %v4134_v41 = vrot.slane %v2914_v4, %v6406_v11 }
 0x325   : > { %v2804_v51 = vunpack.c.l.b16 %v2357_v45  ;;  %v2805_v37 = vunpack.c.h.b16 %v2357_v45 }
 0x326   : > { %v2100_v63 = vpop.xlane.xlu1 %2099  ;;  %v2097_v44 = vpop.xlane.xlu0 %2096 }
 0x327   : > { %v2389_v23 = vpack.c.bf16 %v2100_v63, %v2097_v44  ;;  %v3591_v17 = vrot.slane %v2804_v51, %v6420_v29  ;;  %v3596_v55 = vrot.slane %v2805_v37, %v6427_v36  ;;  %v4129_v44 = vrot.slane %v2913_v28, %v6399_v0 }
 0x328   : > { %v3503_v0 = vsel %vm3022_vm12, %v3502_v48, %v7579_v43  ;;  %v2293_v48 = vld [vmem:[#allocation3] sm:$0xf] }
 0x329   : > { %v2868_v38 = vunpack.c.l.b16 %v2389_v23  ;;  %v2869_v39 = vunpack.c.h.b16 %v2389_v23  ;;  %v3592_v61 = vsel %vm3036_vm14, %v3591_v17, %v3587_v18  ;;  %v3823_v23 = vrot.slane %v2851_v26, %v6409_v12 }
 0x32a   : > { %v2292_v58 = vpop.xlane.xlu1 %2291  ;;  %v2289_v5 = vpop.xlane.xlu0 %2288  ;;  %v3597_v63 = vsel %vm3043_vm15, %v3596_v55, %v3592_v61  ;;  %v4130_v11 = vsel %vm3015_vm11, %v4129_v44, %v4125_v52  ;;  %v4139_v18 = vrot.slane %v2915_v53, %v6409_v12 }
 0x32b   : > { %v3907_v25 = vrot.slane %v2868_v38, %v6420_v29  ;;  %v3912_v9 = vrot.slane %v2869_v39, %v6427_v36  ;;  %v2421_v22 = vpack.c.bf16 %v2292_v58, %v2289_v5  ;;  %v3507_v38 = vrot.slane %v2787_v10, %v6409_v12 }
 0x32c   : > { %v3824_v5 = vsel %vm3029_vm13, %v3823_v23, %v3819_v32  ;;  %v4135_v43 = vsel %vm3022_vm12, %v4134_v41, %v4130_v11 }
 0x32d   : > { %v2932_v21 = vunpack.c.l.b16 %v2421_v22  ;;  %v2933_v35 = vunpack.c.h.b16 %v2421_v22  ;;  %v3908_v2 = vsel %vm3036_vm14, %v3907_v25, %v3903_v57  ;;  %v3508_v57 = vsel %vm3029_vm13, %v3507_v38, %v3503_v0 }
 0x32e   : > { %v1860_v49 = vpop.xlane.xlu1 %1859  ;;  %v1857_v16 = vpop.xlane.xlu0 %1856  ;;  %v3913_v6 = vsel %vm3043_vm15, %v3912_v9, %v3908_v2  ;;  %v4140_v2 = vsel %vm3029_vm13, %v4139_v18, %v4135_v43 }
 0x32f   : > { %v4223_v20 = vrot.slane %v2932_v21, %v6420_v29  ;;  %v4228_v34 = vrot.slane %v2933_v35, %v6427_v36  ;;  %v2349_v47 = vpack.c.bf16 %v1860_v49, %v1857_v16  ;;  %v4234_v46 = vsel %vm4230_vm9, %v3913_v6, %v7708_v24  ;;  %v7709_v35 = vld [vmem:[#allocation10_spill] sm:$0xff] }
 0x330   : > { %v4242_v45 = vpack.c.b16 %v4234_v46, %v4234_v46 }
 0x331   : > { %v4224_v1 = vsel %vm3036_vm14, %v4223_v20, %v4219_v54  ;;  %v2788_v27 = vunpack.c.l.b16 %v2349_v47  ;;  %v2789_v39 = vunpack.c.h.b16 %v2349_v47 }
 0x332   : > { %v2052_v7 = vpop.xlane.xlu1 %2051  ;;  %4968 = vmatprep.mubr.bf16.mxu1 %v4242_v45  ;;  %v2049_v51 = vpop.xlane.xlu0 %2048  ;;  %v4229_v56 = vsel %vm3043_vm15, %v4228_v34, %v4224_v1 }
 0x333   : > { %v2381_v60 = vpack.c.bf16 %v2052_v7, %v2049_v51  ;;  %v4238_v59 = vsel %vm4230_vm9, %v4229_v56, %v3597_v63  ;;  %v3512_v30 = vrot.slane %v2788_v27, %v6420_v29  ;;  %v3517_v3 = vrot.slane %v2789_v39, %v6427_v36 }
 0x334   : > { %v4246_v62 = vpack.c.b16 %v4238_v59, %v4238_v59 }
 0x335   : > { %v2852_v13 = vunpack.c.l.b16 %v2381_v60  ;;  %v2853_v19 = vunpack.c.h.b16 %v2381_v60  ;;  %v3513_v15 = vsel %vm3036_vm14, %v3512_v30, %v3508_v57 }
 0x336   : > { %v2244_v28 = vpop.xlane.xlu1 %2243  ;;  %5050 = vmatprep.mubr.bf16.mxu0 %v4246_v62  ;;  %v2241_v40 = vpop.xlane.xlu0 %2240  ;;  %v3518_v49 = vsel %vm3043_vm15, %v3517_v3, %v3513_v15 }
 0x337   : > { %v3828_v37 = vrot.slane %v2852_v13, %v6420_v29  ;;  %v3833_v17 = vrot.slane %v2853_v19, %v6427_v36  ;;  %v2413_v58 = vpack.c.bf16 %v2244_v28, %v2241_v40 }
 0x339   : > { %v3829_v25 = vsel %vm3036_vm14, %v3828_v37, %v3824_v5  ;;  %v2916_v9 = vunpack.c.l.b16 %v2413_v58  ;;  %v2917_v22 = vunpack.c.h.b16 %v2413_v58 }
 0x33a   : > { %v3834_v42 = vsel %vm3043_vm15, %v3833_v17, %v3829_v25 }
 0x33b   : > { %v4144_v31 = vrot.slane %v2916_v9, %v6420_v29  ;;  %v4149_v21 = vrot.slane %v2917_v22, %v6427_v36  ;;  %v4233_v12 = vsel %vm4230_vm9, %v3834_v42, %v7709_v35  ;;  %v5571_v29 = vmov 1983009808  }
 0x33c   : > { %v4241_v33 = vpack.c.b16 %v4233_v12, %v4233_v12  ;;  %v5063_v20 = vunpack.c.l.s4 %v5571_v29 }
 0x33d   : > { %v4145_v55 = vsel %vm3036_vm14, %v4144_v31, %v4140_v2 }
 0x33e   : > { %v4150_v16 = vsel %vm3043_vm15, %v4149_v21, %v4145_v55  ;;  %4969 = vmatmul.mubr.bf16.vlgmr.msra.gmra.mrb[0].mxu1 %v4241_v33  ;;  %v5064_v24 = vunpack.c.0.s8 %v5063_v20 }
 0x33f   : > { %v4237_v6 = vsel %vm4230_vm9, %v4150_v16, %v3518_v49 }
 0x340   : > { %v4245_v61 = vpack.c.b16 %v4237_v6, %v4237_v6  ;;  %v5067_v14 = vsub.s32 %v5064_v24, %v7710_v8 }
 0x342   : > { %5051 = vmatmul.mubr.bf16.vlgmr.msra.gmra.mrb[0].mxu0 %v4245_v61 }
 0x411   : > { %v4970_v36 = vpop.f32.mrb[0].mxu1 }
 0x412   : > { %v4972_v34 = vpop.f32.mrb[1].mxu1 }
 0x413   : > { %v4974_v47 = vpop.f32.mrb[2].mxu1 }
 0x414   : > { %v4975_v46 = vpop.f32.mrb[3].mxu1 }
 0x415   : > { %v5052_v50 = vpop.f32.mrb[0].mxu0 }
 0x416   : > { %v5283_v54 = vadd.f32 %v5052_v50, %v4970_v36  ;;  %v5054_v26 = vpop.f32.mrb[1].mxu0 }
 0x417   : > { %v5284_v45 = vadd.f32 %v5054_v26, %v4972_v34  ;;  %v5056_v4 = vpop.f32.mrb[2].mxu0 }
 0x418   : > { %v5057_v1 = vpop.f32.mrb[3].mxu0 }
 0x419   : > { %v5061_v10 = vcombine.low %v5283_v54, %v5284_v45 }
 0x41b   : > { %v5068_v7 = vrot.slane %v5061_v10, %v5067_v14 }
 0x41d   : > { %v5070_v51 = vadd.f32 %v5068_v7, %v2293_v48 }
 0x41f   : > { %5071 = vst [vmem:[#allocation3] sm:$0xf] %v5070_v51 }
 0x420   : > { %5530 = shalt.err (!%p5527_p3)
}
 0x421   : > { %s5531_s18 = scalar_lea.hbm %s7684_s3, 64 }
 0x422   : > { %p5532_p4 = scmp.ne.s32.totalorder %s7684_s3, %s5531_s18  ;;  %p5537_p7 = scmp.lt.u32.totalorder %s5531_s18, %s7684_s3 }
 0x424   : > { %p5533_p5 = pnand %p5532_p4, %p5297_p10 }
 0x426   : > { %p5534_p6 = pneg %p5533_p5 }
 0x428   : > { %p5539_p8 = pnand %p5537_p7, %p5534_p6 }
 0x42a   : > { %5542 = shalt.err (!%p5539_p8)
}
 0x42b   : > { %5294 = dma.vmem_to_hbm [thread:$0]  (%p5297_p10), %s5080_s11, 64, %s7684_s3, [#allocation4]  }
 0x42c   : > { %5556 = dma.done.wait (%p5297_p10), [#allocation4], 64  }
 0x42d   : > { %5558 = vsyncadd (%p5297_p10), [#allocation4], 4294967232 }
 0x42e PF: > { %p11_p9 = scmp.ge.s32.totalorder %s5612_s16, 4   ;;  %s7711_s12 = smov %s5565_s13 }
 0x42f   : > { %s7712_s13 = smov %s5621_s19  ;;  %s7713_s14 = smov %s5612_s16 }
 0x430   :  { %13 = sbr.rel (!%p11_p9) target bundleno = 2 (0x2), region = 109 }
 0x437   :  { %5092 = vsyncpa [#allocation4], 1 }
 0x438   :  { %5094 = vsyncpa [#allocation4 + $0x1], 1 }

</bundles_post_ra>
